<compile_context>
chip_gen: v5e
topology: v5e:2x2
jax: 0.10.0
libtpu: 0.0.40
codegen_flags: <defaults>
</compile_context>

<pallas_src>
import jax
import jax.numpy as jnp
from jax import lax
from jax.experimental import pallas as pl
from jax.experimental.pallas import tpu as pltpu

# ---- scaled-down ReformerConfig (same structure, small sizes) ----
MAX_POSITION_EMBEDDINGS = 512   # config.max_position_embeddings
HIDDEN = 128                    # config.hidden_size (multiple of 128 -> lane-dense stores)
HIDDEN_DROPOUT_PROB = 0.05      # config.hidden_dropout_prob (identity at inference)

ROW_BLOCK = 512                 # flattened position-id rows gathered per grid step
VOCAB_CHUNK = 128               # K-chunk of the one-hot matmul


# -------------------- Pallas kernel --------------------

def _pos_embed_kernel(ids_ref, hi_ref, lo_ref, out_ref):
    """Gather embedding-table rows selected by position ids.

    ids_ref : (1, 1, ROW_BLOCK)    int32 -- lane-dense flattened position ids
    hi_ref  : (VOCAB, HIDDEN)      bf16  -- high bf16 component of the f32 table
    lo_ref  : (VOCAB, HIDDEN)      bf16  -- low  bf16 component of the f32 table
    out_ref : (ROW_BLOCK, HIDDEN)  f32
    """
    ids = ids_ref[0]                            # (1, R) int32, rows on lanes
    rows = out_ref.shape[0]
    vocab = hi_ref.shape[0]

    acc = jnp.zeros(out_ref.shape, jnp.float32)

    # Chunk the one-hot over the vocab axis to bound vreg/VMEM pressure.
    # Transposed orientation: onehot_t[v, r] = (ids[r] == c + v); the MXU
    # contraction over dim 0 of both operands avoids any ids relayout.
    for c in range(0, vocab, VOCAB_CHUNK):
        vc = min(VOCAB_CHUNK, vocab - c)
        v_iota = c + lax.broadcasted_iota(jnp.int32, (vc, rows), 0)   # (Vc, R)
        onehot_t = (v_iota == ids).astype(jnp.bfloat16)               # (Vc, R)

        # out[r, h] += sum_v onehot_t[v, r] * table[v, h]
        acc += lax.dot_general(
            onehot_t, hi_ref[pl.ds(c, vc), :],
            dimension_numbers=(((0,), (0,)), ((), ())),
            preferred_element_type=jnp.float32)
        acc += lax.dot_general(
            onehot_t, lo_ref[pl.ds(c, vc), :],
            dimension_numbers=(((0,), (0,)), ((), ())),
            preferred_element_type=jnp.float32)

    # hidden dropout: identity (inference semantics)
    out_ref[...] = acc.astype(out_ref.dtype)


# -------------------- wrapper --------------------

def position_embeddings(position_ids, table):
    """position_ids: int (B, S); table: (MAX_POS, HIDDEN) f32 -> (B, S, HIDDEN) f32."""
    B, S = position_ids.shape
    vocab, hidden = table.shape

    n = B * S
    n_blocks = pl.cdiv(n, ROW_BLOCK)
    n_pad = n_blocks * ROW_BLOCK

    ids = position_ids.reshape(n).astype(jnp.int32)
    if n_pad != n:
        # padded rows gather table row 0; sliced off below
        ids = jnp.pad(ids, (0, n_pad - n))
    # lane-dense id blocks: each grid step reads a contiguous (1, ROW_BLOCK) tile
    ids = ids.reshape(n_blocks, 1, ROW_BLOCK)

    # Exact-enough f32 gather as two bf16 MXU passes: table ~= hi + lo.
    table_hi = table.astype(jnp.bfloat16)
    table_lo = (table - table_hi.astype(jnp.float32)).astype(jnp.bfloat16)

    out = pl.pallas_call(
        _pos_embed_kernel,
        grid=(n_blocks,),
        in_specs=[
            # position-id block for this grid step (lane-dense)
            pl.BlockSpec((1, 1, ROW_BLOCK), lambda i: (i, 0, 0)),
            # full embedding table (hi/lo): same block every step -> DMA'd once,
            # stays resident in VMEM
            pl.BlockSpec((vocab, hidden), lambda i: (0, 0)),
            pl.BlockSpec((vocab, hidden), lambda i: (0, 0)),
        ],
        out_specs=pl.BlockSpec((ROW_BLOCK, hidden), lambda i: (i, 0)),
        out_shape=jax.ShapeDtypeStruct((n_pad, hidden), jnp.float32),
        compiler_params=pltpu.CompilerParams(
            dimension_semantics=("parallel",)),   # row blocks independent (megacore)
    )(ids, table_hi, table_lo)

    if n_pad != n:
        out = out[:n]
    return out.reshape(B, S, hidden)


# -------------------- pure-JAX reference (for verification) --------------------

def reference(position_ids, table):
    # nn.Embedding lookup; dropout is identity at inference.
    return table[position_ids]


if __name__ == "__main__":
    key = jax.random.PRNGKey(0)
    k1, k2 = jax.random.split(key)

    # B*S = 1024 flattened positions -> 2 grid blocks of ROW_BLOCK=512 (no padding path)
    B, S = 4, 256
    position_ids = jax.random.randint(
        k1, (B, S), 0, MAX_POSITION_EMBEDDINGS, dtype=jnp.int32)

    # deterministic "nn.Embedding" weight (initializer_range=0.02)
    table = 0.02 * jax.random.normal(
        k2, (MAX_POSITION_EMBEDDINGS, HIDDEN), dtype=jnp.float32)

    out = position_embeddings(position_ids, table)
    jax.block_until_ready(out)

    ref = reference(position_ids, table)
    assert out.shape == (B, S, HIDDEN)
    assert jnp.allclose(out, ref, atol=1e-4, rtol=1e-4)
    print("KERNEL_OK")
</pallas_src>

<mosaic_0001>
module attributes {stable_mosaic.version = 11 : i64} {
  func.func @_pos_embed_kernel(%arg0: i32, %arg1: memref<1x1x512xi32, #tpu.memory_space<vmem>>, %arg2: memref<512x128xbf16, #tpu.memory_space<vmem>>, %arg3: memref<512x128xbf16, #tpu.memory_space<vmem>>, %arg4: memref<512x128xf32, #tpu.memory_space<vmem>>) attributes {dimension_semantics = [#tpu.dimension_semantics<parallel>], iteration_bounds = array<i64: 2>, scalar_prefetch = 0 : i64, scratch_operands = 0 : i64, tpu.core_type = #tpu.core_type<tc>, window_params = [{transform_indices = @transform_0, window_bounds = array<i64: 1, 1, 512>}, {pipeline_mode = #tpu.pipeline_mode<synchronous>, transform_indices = @transform_1, window_bounds = array<i64: 512, 128>}, {pipeline_mode = #tpu.pipeline_mode<synchronous>, transform_indices = @transform_2, window_bounds = array<i64: 512, 128>}, {transform_indices = @transform_3, window_bounds = array<i64: 512, 128>}]} {
    %c0 = arith.constant 0 : index
    %c0_0 = arith.constant 0 : index
    %c0_1 = arith.constant 0 : index
    %0 = vector.load %arg1[%c0, %c0_0, %c0_1] : memref<1x1x512xi32, #tpu.memory_space<vmem>>, vector<1x1x512xi32>
    %1 = vector.shape_cast %0 : vector<1x1x512xi32> to vector<1x512xi32>
    %cst = arith.constant 0.000000e+00 : f32
    %2 = vector.broadcast %cst : f32 to vector<512x128xf32>
    %3 = tpu.iota {dimensions = array<i32: 0>} : vector<128x512xi32>
    %c0_i32 = arith.constant 0 : i32
    %4 = vector.broadcast %c0_i32 : i32 to vector<128x512xi32>
    %5 = arith.addi %4, %3 : vector<128x512xi32>
    %6 = vector.broadcast %1 : vector<1x512xi32> to vector<128x512xi32>
    %7 = arith.cmpi eq, %5, %6 : vector<128x512xi32>
    %8 = arith.extui %7 : vector<128x512xi1> to vector<128x512xi32>
    %9 = arith.sitofp %8 : vector<128x512xi32> to vector<128x512xf32>
    %10 = arith.truncf %9 : vector<128x512xf32> to vector<128x512xbf16>
    %c0_2 = arith.constant 0 : index
    %c0_3 = arith.constant 0 : index
    %11 = vector.load %arg2[%c0_2, %c0_3] : memref<512x128xbf16, #tpu.memory_space<vmem>>, vector<128x128xbf16>
    %cst_4 = arith.constant dense<0.000000e+00> : vector<512x128xf32>
    %12 = tpu.matmul %10, %11, %cst_4 {dimension_numbers = #tpu.dot_dimension_numbers<[0], [0], [1], [1], [0, 1, 1, 1], [], []>} : vector<128x512xbf16>, vector<128x128xbf16>, vector<512x128xf32> -> vector<512x128xf32>
    %13 = arith.addf %2, %12 : vector<512x128xf32>
    %c0_5 = arith.constant 0 : index
    %c0_6 = arith.constant 0 : index
    %14 = vector.load %arg3[%c0_5, %c0_6] : memref<512x128xbf16, #tpu.memory_space<vmem>>, vector<128x128xbf16>
    %cst_7 = arith.constant dense<0.000000e+00> : vector<512x128xf32>
    %15 = tpu.matmul %10, %14, %cst_7 {dimension_numbers = #tpu.dot_dimension_numbers<[0], [0], [1], [1], [0, 1, 1, 1], [], []>} : vector<128x512xbf16>, vector<128x128xbf16>, vector<512x128xf32> -> vector<512x128xf32>
    %16 = arith.addf %13, %15 : vector<512x128xf32>
    %17 = tpu.iota {dimensions = array<i32: 0>} : vector<128x512xi32>
    %c128_i32 = arith.constant 128 : i32
    %18 = vector.broadcast %c128_i32 : i32 to vector<128x512xi32>
    %19 = arith.addi %18, %17 : vector<128x512xi32>
    %20 = vector.broadcast %1 : vector<1x512xi32> to vector<128x512xi32>
    %21 = arith.cmpi eq, %19, %20 : vector<128x512xi32>
    %22 = arith.extui %21 : vector<128x512xi1> to vector<128x512xi32>
    %23 = arith.sitofp %22 : vector<128x512xi32> to vector<128x512xf32>
    %24 = arith.truncf %23 : vector<128x512xf32> to vector<128x512xbf16>
    %c128 = arith.constant 128 : index
    %c0_8 = arith.constant 0 : index
    %25 = vector.load %arg2[%c128, %c0_8] : memref<512x128xbf16, #tpu.memory_space<vmem>>, vector<128x128xbf16>
    %cst_9 = arith.constant dense<0.000000e+00> : vector<512x128xf32>
    %26 = tpu.matmul %24, %25, %cst_9 {dimension_numbers = #tpu.dot_dimension_numbers<[0], [0], [1], [1], [0, 1, 1, 1], [], []>} : vector<128x512xbf16>, vector<128x128xbf16>, vector<512x128xf32> -> vector<512x128xf32>
    %27 = arith.addf %16, %26 : vector<512x128xf32>
    %c128_10 = arith.constant 128 : index
    %c0_11 = arith.constant 0 : index
    %28 = vector.load %arg3[%c128_10, %c0_11] : memref<512x128xbf16, #tpu.memory_space<vmem>>, vector<128x128xbf16>
    %cst_12 = arith.constant dense<0.000000e+00> : vector<512x128xf32>
    %29 = tpu.matmul %24, %28, %cst_12 {dimension_numbers = #tpu.dot_dimension_numbers<[0], [0], [1], [1], [0, 1, 1, 1], [], []>} : vector<128x512xbf16>, vector<128x128xbf16>, vector<512x128xf32> -> vector<512x128xf32>
    %30 = arith.addf %27, %29 : vector<512x128xf32>
    %31 = tpu.iota {dimensions = array<i32: 0>} : vector<128x512xi32>
    %c256_i32 = arith.constant 256 : i32
    %32 = vector.broadcast %c256_i32 : i32 to vector<128x512xi32>
    %33 = arith.addi %32, %31 : vector<128x512xi32>
    %34 = vector.broadcast %1 : vector<1x512xi32> to vector<128x512xi32>
    %35 = arith.cmpi eq, %33, %34 : vector<128x512xi32>
    %36 = arith.extui %35 : vector<128x512xi1> to vector<128x512xi32>
    %37 = arith.sitofp %36 : vector<128x512xi32> to vector<128x512xf32>
    %38 = arith.truncf %37 : vector<128x512xf32> to vector<128x512xbf16>
    %c256 = arith.constant 256 : index
    %c0_13 = arith.constant 0 : index
    %39 = vector.load %arg2[%c256, %c0_13] : memref<512x128xbf16, #tpu.memory_space<vmem>>, vector<128x128xbf16>
    %cst_14 = arith.constant dense<0.000000e+00> : vector<512x128xf32>
    %40 = tpu.matmul %38, %39, %cst_14 {dimension_numbers = #tpu.dot_dimension_numbers<[0], [0], [1], [1], [0, 1, 1, 1], [], []>} : vector<128x512xbf16>, vector<128x128xbf16>, vector<512x128xf32> -> vector<512x128xf32>
    %41 = arith.addf %30, %40 : vector<512x128xf32>
    %c256_15 = arith.constant 256 : index
    %c0_16 = arith.constant 0 : index
    %42 = vector.load %arg3[%c256_15, %c0_16] : memref<512x128xbf16, #tpu.memory_space<vmem>>, vector<128x128xbf16>
    %cst_17 = arith.constant dense<0.000000e+00> : vector<512x128xf32>
    %43 = tpu.matmul %38, %42, %cst_17 {dimension_numbers = #tpu.dot_dimension_numbers<[0], [0], [1], [1], [0, 1, 1, 1], [], []>} : vector<128x512xbf16>, vector<128x128xbf16>, vector<512x128xf32> -> vector<512x128xf32>
    %44 = arith.addf %41, %43 : vector<512x128xf32>
    %45 = tpu.iota {dimensions = array<i32: 0>} : vector<128x512xi32>
    %c384_i32 = arith.constant 384 : i32
    %46 = vector.broadcast %c384_i32 : i32 to vector<128x512xi32>
    %47 = arith.addi %46, %45 : vector<128x512xi32>
    %48 = vector.broadcast %1 : vector<1x512xi32> to vector<128x512xi32>
    %49 = arith.cmpi eq, %47, %48 : vector<128x512xi32>
    %50 = arith.extui %49 : vector<128x512xi1> to vector<128x512xi32>
    %51 = arith.sitofp %50 : vector<128x512xi32> to vector<128x512xf32>
    %52 = arith.truncf %51 : vector<128x512xf32> to vector<128x512xbf16>
    %c384 = arith.constant 384 : index
    %c0_18 = arith.constant 0 : index
    %53 = vector.load %arg2[%c384, %c0_18] : memref<512x128xbf16, #tpu.memory_space<vmem>>, vector<128x128xbf16>
    %cst_19 = arith.constant dense<0.000000e+00> : vector<512x128xf32>
    %54 = tpu.matmul %52, %53, %cst_19 {dimension_numbers = #tpu.dot_dimension_numbers<[0], [0], [1], [1], [0, 1, 1, 1], [], []>} : vector<128x512xbf16>, vector<128x128xbf16>, vector<512x128xf32> -> vector<512x128xf32>
    %55 = arith.addf %44, %54 : vector<512x128xf32>
    %c384_20 = arith.constant 384 : index
    %c0_21 = arith.constant 0 : index
    %56 = vector.load %arg3[%c384_20, %c0_21] : memref<512x128xbf16, #tpu.memory_space<vmem>>, vector<128x128xbf16>
    %cst_22 = arith.constant dense<0.000000e+00> : vector<512x128xf32>
    %57 = tpu.matmul %52, %56, %cst_22 {dimension_numbers = #tpu.dot_dimension_numbers<[0], [0], [1], [1], [0, 1, 1, 1], [], []>} : vector<128x512xbf16>, vector<128x128xbf16>, vector<512x128xf32> -> vector<512x128xf32>
    %58 = arith.addf %55, %57 : vector<512x128xf32>
    %c0_23 = arith.constant 0 : index
    %c0_24 = arith.constant 0 : index
    %59 = vector.load %arg4[%c0_23, %c0_24] : memref<512x128xf32, #tpu.memory_space<vmem>>, vector<512x128xf32>
    tpu.vector_store %arg4[%c0_23, %c0_24], %58 {strides = array<i32>} : memref<512x128xf32, #tpu.memory_space<vmem>>, vector<512x128xf32>,
    return
  }
  func.func @transform_0(%arg0: i32) -> (i32, i32, i32) {
    %c0_i32 = arith.constant 0 : i32
    %c0_i32_0 = arith.constant 0 : i32
    %c0_i32_1 = arith.constant 0 : i32
    return %arg0, %c0_i32, %c0_i32_0 : i32, i32, i32
  }
  func.func @transform_1(%arg0: i32) -> (i32, i32) {
    %c0_i32 = arith.constant 0 : i32
    %c0_i32_0 = arith.constant 0 : i32
    %c0_i32_1 = arith.constant 0 : i32
    return %c0_i32, %c0_i32_0 : i32, i32
  }
  func.func @transform_2(%arg0: i32) -> (i32, i32) {
    %c0_i32 = arith.constant 0 : i32
    %c0_i32_0 = arith.constant 0 : i32
    %c0_i32_1 = arith.constant 0 : i32
    return %c0_i32, %c0_i32_0 : i32, i32
  }
  func.func @transform_3(%arg0: i32) -> (i32, i32) {
    %c0_i32 = arith.constant 0 : i32
    %c0_i32_0 = arith.constant 0 : i32
    return %arg0, %c0_i32 : i32, i32
  }
}

</mosaic_0001>

<bundles_post_ra>
// kernel: tpu_custom_call.1
= control target key start
LH: loop header
LB: loop body
LE: loop exit
PB: predicated region body
PF: predicated region fallthrough
CT: control target
= control target key end

     0   :  { %8 = vsyncpa [#allocation3], 0  ;;  %s6257_s0 = inlined_call_operand.hbm [shape: s32[2,1,512], index: 0, kind: input, shape index: {}]   ;;  %s6258_s1 = inlined_call_operand.hbm [shape: bf16[512,128], index: 1, kind: input, shape index: {}]   ;;  %s6259_s2 = inlined_call_operand.hbm [shape: bf16[512,128], index: 2, kind: input, shape index: {}]   ;;  %s6260_s3 = inlined_call_operand.hbm [shape: f32[1024,128], index: 3, kind: output, shape index: {}]  }
   0x1   :  { %10 = vsyncpa [#allocation3 + $0x1], 0 }
   0x2   :  { %11 = vsyncpa [#allocation6], 0 }
   0x3   :  { %12 = vsyncpa [#allocation4], 0 }
   0x4   :  { %14 = vsyncpa [#allocation4 + $0x1], 0  ;;  %s4655_s12 = smov 0   ;;  %s4657_s13 = smov 0  }
   0x5   :  { %s4659_s14 = smov 0   ;;  %s4661_s15 = smov 0  }
   0x6 LB: > { %s130_s18 = sshll.u32 %s6258_s1, 4  ;;  %s4679_s19 = sadd.s32 4294967295, %s4626_s15   ;;  %s4626_s15 = sphi %s4661_s15, %s6380_s15   ;;  %s4622_s14 = sphi %s4659_s14, %s6379_s14   ;;  %s4618_s13 = sphi %s4657_s13, %s6378_s13   ;;  %s4614_s12 = sphi %s4655_s12, %s6377_s12   ;;  %s131_s18 = int_to_ptr.hbm [resolvable:$true] %s130_s18 }
   0x7   : > { %p3801_p0 = scmp.ge.s32.totalorder %s4626_s15, 1  ;;  %p41_p1 = scmp.eq.s32.totalorder %s4679_s19, 0 }
   0x8   : > { %p119_p2 = scmp.lt.s32.totalorder %s4626_s15, 3  ;;  %s4628_s21 = smov [#allocation5]  }
   0x9   : > { %s132_s22 = sshll.u32 %s4628_s21, 4  ;;  %s144_s25 = sshll.u32 %s6259_s2, 4  ;;  %s133_s22 = int_to_ptr.vmem [resolvable:$true] %s132_s22  ;;  %s145_s25 = int_to_ptr.hbm [resolvable:$true] %s144_s25 }
   0xa   : > { %p4684_p3 = pnand %p3801_p0, %p119_p2  ;;  %s4629_s26 = smov [#allocation7]  }
   0xb   : > { %s146_s27 = sshll.u32 %s4629_s26, 4  ;;  %s4630_s28 = smov 64   ;;  %s147_s27 = int_to_ptr.vmem [resolvable:$true] %s146_s27 }
   0xc   : > { %p4406_p4 = pneg %p4684_p3  ;;  %s4631_s29 = smov 4  }
   0xd   : > { %s3800_s30 = sadd.s32 4294967294, %s4626_s15   ;;  %s4698_s4 = sadd.s32 1, %s4626_s15  }
   0xe   : > { %p4407_p6 = pnand %p4406_p4, %p41_p1  ;;  %s24_s5 = ssub.s32 %s4626_s15, %s4698_s4 }
   0xf   : > { %s27_s6 = sadd.s32 1, %s4622_s14  ;;  %p25_p7 = scmp.eq.s32.totalorder %s24_s5, 0 }
  0x10   : > { %4409 = dma.hbm_to_vmem [thread:$0]  (!%p4407_p6), %s131_s18, 4096, %s133_s22, [#allocation6], %s4630_s28, %s4630_s28, %s4631_s29  }
  0x11   : > { %4412 = dma.hbm_to_vmem [thread:$0]  (!%p4407_p6), %s145_s25, 4096, %s147_s27, [#allocation6], %s4630_s28, %s4630_s28, %s4631_s29  }
  0x12   : > { %p34_p8 = scmp.ne.s32.totalorder %s4622_s14, %s4618_s13  ;;  %p35_p9 = scmp.eq.s32.totalorder %s4626_s15, 0 }
  0x13   : > { %p40_p10 = scmp.ne.s32.totalorder %s4618_s13, %s4614_s12  ;;  %p106_p13 = scmp.eq.s32.totalorder %s4679_s19, 1 }
  0x14   : > { %s4709_s7 = scalar_select %p25_p7, %s4622_s14, %s27_s6  }
  0x15   : > { %p4711_p11 = por %p35_p9, %p34_p8  ;;  %p4717_p12 = por %p41_p1, %p40_p10 }
  0x16   : > { %p112_p0 = scmp.eq.s32.totalorder %s3800_s30, 1  ;;  %p4423_p2 = scmp.lt.s32.totalorder %s4626_s15, 2 }
  0x17   : > { %s160_s10 = sand.u32 1, %s4622_s14   ;;  %p4724_p4 = por %p106_p13, %p34_p8 }
  0x18   : > { %p4728_p6 = por %p112_p0, %p40_p10  ;;  %s3805_s17 = sshll.u32 %s160_s10, 2 }
  0x19   : > { %s3806_s18 = sshll.u32 %s4626_s15, 2  ;;  %s164_s24 = scalar_lea.vmem [#allocation2], %s3805_s17 }
  0x1a   : > { %s168_s23 = scalar_lea.hbm %s6257_s0, %s3806_s18  ;;  %s172_s25 = sshll.u32 %s164_s24, 4  ;;  %s173_s25 = int_to_ptr.vmem [resolvable:$true] %s172_s25 }
  0x1b   : > { %s170_s26 = sshll.u32 %s168_s23, 4  ;;  %p4738_p7 = pnand %p4423_p2, %p4711_p11  ;;  %s171_s26 = int_to_ptr.hbm [resolvable:$true] %s170_s26 }
  0x1c   : > { %s161_s28 = scalar_lea.sflag [#allocation3], %s160_s10  ;;  %s4526_s29 = sshra.s32 %s171_s26, 4  ;;  %s4527_s29 = int_to_ptr.hbm [resolvable:$true] %s4526_s29 }
  0x1d   : > { %s4528_s30 = scalar_lea.hbm %s4527_s29, 4  ;;  %p4530_p9 = pneg %p4738_p7 }
  0x1e   : > { %p4529_p8 = scmp.ne.s32.totalorder %s4527_s29, %s4528_s30  ;;  %s4533_s17 = scalar_lea.hbm %s6257_s0, 8 }
  0x1f   : > { %p4534_p11 = scmp.lt.s32.totalorder %s4527_s29, %s6257_s0  ;;  %p4535_p0 = scmp.lt.s32.totalorder %s4533_s17, %s4528_s30 }
  0x20   : > { %p4531_p10 = pnand %p4530_p9, %p4529_p8 }
  0x21   : > { %p4536_p2 = por %p4535_p0, %p4534_p11 }
  0x22   : > { %p4532_p13 = pneg %p4531_p10 }
  0x24   : > { %p4537_p5 = pnand %p4536_p2, %p4532_p13 }
  0x26   : > { %4540 = shalt.err (!%p4537_p5)
}
  0x27   : > { %4416 = dma.hbm_to_vmem [thread:$0]  (!%p4738_p7), %s171_s26, 64, %s173_s25, %s161_s28  }
  0x28   : > { %181 = sbr.rel (%p4684_p3) target bundleno = 1392 (0x570), region = 32 }
  0x2d   : > { %s4755_s10 = sand.u32 1, %s4618_s13  }
  0x2e   : > { %s3808_s21 = sshll.u32 %s4755_s10, 2  ;;  %s184_s22 = scalar_lea.sflag [#allocation3], %s4755_s10 }
  0x2f   : > { %s187_s23 = scalar_lea.vmem [#allocation2], %s3808_s21 }
  0x30   : > { %4601 = dma.done.wait (%p4717_p12), %s184_s22, 64  }
  0x31   : > { %4603 = vsyncadd (%p4717_p12), %s184_s22, 4294967232 }
  0x32   : > { %4605 = dma.done.wait (%p41_p1), [#allocation6], 8192  }
  0x33   : > { %4607 = vsyncadd (%p41_p1), [#allocation6], 4294959104  ;;  %v223_v0 = vlaneseq  ;;  %v4778_v5 = vld [vmem:[%s187_s23] sm:$0xf]  ;;  %v6261_v10 = vmov 0.0   ;;  %s3811_s20 = sshll.u32 %s4755_s10, 9 }
  0x34   : > { %v4781_v6 = vperm.slane %v4778_v5, 0  ;;  %v4784_v7 = vperm.slane %v4778_v5, 1  ;;  %s5966_s9 = scalar_lea.vmem [#allocation8], %s3811_s20  ;;  %s4393_s24 = sshll.u32 %s4679_s19, 9 }
  0x35   : > { %v4767_v1 = vshrl.u32 %v223_v0, 7  ;;  %s3704_s27 = scalar_lea.hbm %s6260_s3, %s4393_s24  ;;  %s3705_s28 = sshll.u32 %s5966_s9, 4  ;;  %s3706_s28 = int_to_ptr.vmem [resolvable:$true] %s3705_s28 }
  0x36   : > { %s3707_s29 = sshll.u32 %s3704_s27, 4  ;;  %s3693_s19 = scalar_lea.sflag [#allocation4], %s4755_s10  ;;  %s3708_s29 = int_to_ptr.hbm [resolvable:$true] %s3707_s29 }
  0x37   : > { %v4770_v2 = vadd.s32 8, %v4767_v1  ;;  %v4773_v3 = vadd.s32 128, %v4767_v1  ;;  %v4787_v8 = vadd.s32 16, %v4767_v1  ;;  %v4790_v9 = vadd.s32 24, %v4767_v1  ;;  %s4570_s30 = sshra.s32 %s3708_s29, 4  ;;  %s4576_s18 = scalar_lea.hbm %s6260_s3, 1024  ;;  %s4571_s30 = int_to_ptr.hbm [resolvable:$true] %s4570_s30 }
  0x38   : > { %vm244_vm4 = vcmp.eq.s32.totalorder %v4767_v1, %v4781_v6  ;;  %vm245_vm5 = vcmp.eq.s32.totalorder %v4767_v1, %v4784_v7  ;;  %v4847_v35 = vadd.s32 32, %v4767_v1  ;;  %v4850_v36 = vadd.s32 40, %v4767_v1  ;;  %s4572_s5 = scalar_lea.hbm %s4571_s30, 512  ;;  %p4577_p12 = scmp.lt.s32.totalorder %s4571_s30, %s6260_s3 }
  0x39   : > { %v4776_v4 = vadd.s32 128, %v4770_v2  ;;  %vm998_vm0 = vcmp.eq.s32.totalorder %v4773_v3, %v4781_v6  ;;  %vm999_vm1 = vcmp.eq.s32.totalorder %v4773_v3, %v4784_v7  ;;  %vm248_vm6 = vcmp.eq.s32.totalorder %v4770_v2, %v4781_v6  ;;  %p4573_p1 = scmp.ne.s32.totalorder %s4571_s30, %s4572_s5  ;;  %p4578_p7 = scmp.lt.s32.totalorder %s4576_s18, %s4572_s5 }
  0x3a   : > { %v3940_v11 = vsel %vm998_vm0, 1.0, %v6261_v10  ;;  %v3941_v12 = vsel %vm999_vm1, 1.0, %v6261_v10  ;;  %vm249_vm7 = vcmp.eq.s32.totalorder %v4770_v2, %v4784_v7  ;;  %v3812_v17 = vsel %vm244_vm4, 1.0, %v6261_v10 }
  0x3b   : > { %vm1002_vm2 = vcmp.eq.s32.totalorder %v4776_v4, %v4781_v6  ;;  %vm1003_vm3 = vcmp.eq.s32.totalorder %v4776_v4, %v4784_v7  ;;  %v3813_v18 = vsel %vm245_vm5, 1.0, %v6261_v10  ;;  %v3816_v19 = vsel %vm248_vm6, 1.0, %v6261_v10  ;;  %p4574_p3 = pnand %p4573_p1, %p4724_p4  ;;  %p4579_p8 = por %p4578_p7, %p4577_p12 }
  0x3c   : > { %v3944_v13 = vsel %vm1002_vm2, 1.0, %v6261_v10  ;;  %v3945_v14 = vsel %vm1003_vm3, 1.0, %v6261_v10  ;;  %v3817_v20 = vsel %vm249_vm7, 1.0, %v6261_v10  ;;  %v436_v21 = vpack.c.bf16 %v3816_v19, %v3812_v17 }
  0x3d   : > { %v1190_v15 = vpack.c.bf16 %v3944_v13, %v3940_v11  ;;  %v1191_v16 = vpack.c.bf16 %v3945_v14, %v3941_v12  ;;  %v437_v22 = vpack.c.bf16 %v3817_v20, %v3813_v18  ;;  %v4817_v23 = vadd.s32 128, %v4787_v8  ;;  %p4575_p5 = pneg %p4574_p3 }
  0x3e   : > { %v4820_v24 = vadd.s32 128, %v4790_v9  ;;  %vm252_vm12 = vcmp.eq.s32.totalorder %v4787_v8, %v4781_v6  ;;  %vm253_vm13 = vcmp.eq.s32.totalorder %v4787_v8, %v4784_v7  ;;  %vm256_vm14 = vcmp.eq.s32.totalorder %v4790_v9, %v4781_v6 }
  0x3f   : > { %1238 = vxpose.binary.xlu0.c.b16.start [1/16] %v1191_v16, %v1190_v15, 128  ;;  %vm1006_vm8 = vcmp.eq.s32.totalorder %v4817_v23, %v4781_v6  ;;  %vm1007_vm9 = vcmp.eq.s32.totalorder %v4817_v23, %v4784_v7  ;;  %vm257_vm15 = vcmp.eq.s32.totalorder %v4790_v9, %v4784_v7  ;;  %v3820_v31 = vsel %vm252_vm12, 1.0, %v6261_v10  ;;  %p4580_p9 = pnand %p4579_p8, %p4575_p5 }
  0x40   : > { %500 = vxpose.binary.xlu1.c.b16.start [1/16] %v437_v22, %v436_v21, 128  ;;  %vm1010_vm10 = vcmp.eq.s32.totalorder %v4820_v24, %v4781_v6  ;;  %vm1011_vm11 = vcmp.eq.s32.totalorder %v4820_v24, %v4784_v7  ;;  %v3948_v25 = vsel %vm1006_vm8, 1.0, %v6261_v10  ;;  %v3949_v26 = vsel %vm1007_vm9, 1.0, %v6261_v10 }
  0x41   : > { %v3952_v27 = vsel %vm1010_vm10, 1.0, %v6261_v10  ;;  %v3953_v28 = vsel %vm1011_vm11, 1.0, %v6261_v10  ;;  %v3821_v32 = vsel %vm253_vm13, 1.0, %v6261_v10  ;;  %v3824_v33 = vsel %vm256_vm14, 1.0, %v6261_v10 }
  0x42   : > { %v1194_v29 = vpack.c.bf16 %v3952_v27, %v3948_v25  ;;  %v1195_v30 = vpack.c.bf16 %v3953_v28, %v3949_v26  ;;  %v3825_v34 = vsel %vm257_vm15, 1.0, %v6261_v10  ;;  %v440_v37 = vpack.c.bf16 %v3824_v33, %v3820_v31 }
  0x43   : > { %v441_v38 = vpack.c.bf16 %v3825_v34, %v3821_v32  ;;  %v4853_v39 = vadd.s32 128, %v4847_v35  ;;  %v4856_v40 = vadd.s32 128, %v4850_v36  ;;  %vm260_vm4 = vcmp.eq.s32.totalorder %v4847_v35, %v4781_v6 }
  0x44   : > { %vm261_vm5 = vcmp.eq.s32.totalorder %v4847_v35, %v4784_v7  ;;  %vm264_vm6 = vcmp.eq.s32.totalorder %v4850_v36, %v4781_v6  ;;  %vm265_vm7 = vcmp.eq.s32.totalorder %v4850_v36, %v4784_v7  ;;  %v4879_v47 = vadd.s32 48, %v4767_v1 }
  0x45   : > { %vm1014_vm0 = vcmp.eq.s32.totalorder %v4853_v39, %v4781_v6  ;;  %vm1015_vm1 = vcmp.eq.s32.totalorder %v4853_v39, %v4784_v7  ;;  %vm1018_vm2 = vcmp.eq.s32.totalorder %v4856_v40, %v4781_v6  ;;  %vm1019_vm3 = vcmp.eq.s32.totalorder %v4856_v40, %v4784_v7 }
  0x46   : > { %v3956_v41 = vsel %vm1014_vm0, 1.0, %v6261_v10  ;;  %v3957_v42 = vsel %vm1015_vm1, 1.0, %v6261_v10  ;;  %v3960_v43 = vsel %vm1018_vm2, 1.0, %v6261_v10  ;;  %v3961_v44 = vsel %vm1019_vm3, 1.0, %v6261_v10 }
  0x47   : > { %v1198_v45 = vpack.c.bf16 %v3960_v43, %v3956_v41  ;;  %v1199_v46 = vpack.c.bf16 %v3961_v44, %v3957_v42  ;;  %v3828_v48 = vsel %vm260_vm4, 1.0, %v6261_v10  ;;  %v3829_v49 = vsel %vm261_vm5, 1.0, %v6261_v10 }
  0x48   : > { %v3832_v50 = vsel %vm264_vm6, 1.0, %v6261_v10  ;;  %v3833_v51 = vsel %vm265_vm7, 1.0, %v6261_v10  ;;  %v4886_v52 = vadd.s32 56, %v4767_v1  ;;  %v4889_v55 = vadd.s32 128, %v4879_v47 }
  0x49   : > { %v444_v53 = vpack.c.bf16 %v3832_v50, %v3828_v48  ;;  %v445_v54 = vpack.c.bf16 %v3833_v51, %v3829_v49  ;;  %vm268_vm12 = vcmp.eq.s32.totalorder %v4879_v47, %v4781_v6  ;;  %vm269_vm13 = vcmp.eq.s32.totalorder %v4879_v47, %v4784_v7 }
  0x4a   : > { %v4892_v56 = vadd.s32 128, %v4886_v52  ;;  %vm1022_vm8 = vcmp.eq.s32.totalorder %v4889_v55, %v4781_v6  ;;  %vm1023_vm9 = vcmp.eq.s32.totalorder %v4889_v55, %v4784_v7  ;;  %vm272_vm14 = vcmp.eq.s32.totalorder %v4886_v52, %v4781_v6 }
  0x4b   : > { %v3964_v57 = vsel %vm1022_vm8, 1.0, %v6261_v10  ;;  %v3965_v58 = vsel %vm1023_vm9, 1.0, %v6261_v10  ;;  %vm273_vm15 = vcmp.eq.s32.totalorder %v4886_v52, %v4784_v7  ;;  %v3836_v63 = vsel %vm268_vm12, 1.0, %v6261_v10 }
  0x4c   : > { %vm1026_vm10 = vcmp.eq.s32.totalorder %v4892_v56, %v4781_v6  ;;  %vm1027_vm11 = vcmp.eq.s32.totalorder %v4892_v56, %v4784_v7  ;;  %v3837_v0 = vsel %vm269_vm13, 1.0, %v6261_v10  ;;  %v3840_v11 = vsel %vm272_vm14, 1.0, %v6261_v10 }
  0x4d   : > { %v3968_v59 = vsel %vm1026_vm10, 1.0, %v6261_v10  ;;  %v3969_v60 = vsel %vm1027_vm11, 1.0, %v6261_v10  ;;  %v3841_v12 = vsel %vm273_vm15, 1.0, %v6261_v10  ;;  %v4919_v13 = vadd.s32 64, %v4767_v1 }
  0x4e   : > { %v1202_v61 = vpack.c.bf16 %v3968_v59, %v3964_v57  ;;  %v1203_v62 = vpack.c.bf16 %v3969_v60, %v3965_v58  ;;  %v4922_v14 = vadd.s32 72, %v4767_v1  ;;  %v448_v15 = vpack.c.bf16 %v3840_v11, %v3836_v63  ;;  %v4352_v63 = vld [vmem:[#allocation5 + $0x78] sm:$0xff]  ;;  %v4343_v11 = vld [vmem:[#allocation7 + $0x30] sm:$0xff] }
  0x4f   : > { %1239 = vxpose.binary.xlu0.c.b16.cont [2/16] %v1195_v30, %v1194_v29, 128  ;;  %v449_v16 = vpack.c.bf16 %v3841_v12, %v3837_v0  ;;  %v4925_v17 = vadd.s32 128, %v4919_v13  ;;  %vm276_vm4 = vcmp.eq.s32.totalorder %v4919_v13, %v4781_v6  ;;  %vm277_vm5 = vcmp.eq.s32.totalorder %v4919_v13, %v4784_v7  ;;  %v4360_v0 = vld [vmem:[#allocation7 + $0x78] sm:$0xff]  ;;  %v4335_v12 = vld [vmem:[#allocation5 + $0x30] sm:$0xff] }
  0x50   : > { %501 = vxpose.binary.xlu1.c.b16.cont [2/16] %v441_v38, %v440_v37, 128  ;;  %v4928_v18 = vadd.s32 128, %v4922_v14  ;;  %vm280_vm6 = vcmp.eq.s32.totalorder %v4922_v14, %v4781_v6  ;;  %vm281_vm7 = vcmp.eq.s32.totalorder %v4922_v14, %v4784_v7  ;;  %v3844_v27 = vsel %vm276_vm4, 1.0, %v6261_v10 }
  0x51   : > { %vm1030_vm0 = vcmp.eq.s32.totalorder %v4925_v17, %v4781_v6  ;;  %vm1031_vm1 = vcmp.eq.s32.totalorder %v4925_v17, %v4784_v7  ;;  %v3845_v28 = vsel %vm277_vm5, 1.0, %v6261_v10  ;;  %v3848_v29 = vsel %vm280_vm6, 1.0, %v6261_v10  ;;  %1334 = vmatpush.bf16.msra.mxu2 %v4352_v63  ;;  %1631 = vmatpush.bf16.msra.mxu3 %v4360_v0  ;;  %v4348_v63 = vld [vmem:[#allocation5 + $0x58] sm:$0xff] }
  0x52   : > { %vm1034_vm2 = vcmp.eq.s32.totalorder %v4928_v18, %v4781_v6  ;;  %vm1035_vm3 = vcmp.eq.s32.totalorder %v4928_v18, %v4784_v7  ;;  %v3972_v19 = vsel %vm1030_vm0, 1.0, %v6261_v10  ;;  %v3973_v20 = vsel %vm1031_vm1, 1.0, %v6261_v10  ;;  %v4356_v0 = vld [vmem:[#allocation7 + $0x58] sm:$0xff] }
  0x53   : > { %v3976_v21 = vsel %vm1034_vm2, 1.0, %v6261_v10  ;;  %v3977_v22 = vsel %vm1035_vm3, 1.0, %v6261_v10  ;;  %v3849_v30 = vsel %vm281_vm7, 1.0, %v6261_v10  ;;  %v4955_v31 = vadd.s32 80, %v4767_v1 }
  0x54   : > { %v1206_v25 = vpack.c.bf16 %v3976_v21, %v3972_v19  ;;  %v1207_v26 = vpack.c.bf16 %v3977_v22, %v3973_v20  ;;  %v4958_v32 = vadd.s32 88, %v4767_v1  ;;  %v452_v33 = vpack.c.bf16 %v3848_v29, %v3844_v27  ;;  %v4350_v27 = vld [vmem:[#allocation5 + $0x68] sm:$0xff] }
  0x55   : > { %v453_v34 = vpack.c.bf16 %v3849_v30, %v3845_v28  ;;  %v4961_v37 = vadd.s32 128, %v4955_v31  ;;  %vm284_vm12 = vcmp.eq.s32.totalorder %v4955_v31, %v4781_v6  ;;  %vm285_vm13 = vcmp.eq.s32.totalorder %v4955_v31, %v4784_v7  ;;  %v4358_v28 = vld [vmem:[#allocation7 + $0x68] sm:$0xff] }
  0x56   : > { %v4964_v38 = vadd.s32 128, %v4958_v32  ;;  %vm288_vm14 = vcmp.eq.s32.totalorder %v4958_v32, %v4781_v6  ;;  %vm289_vm15 = vcmp.eq.s32.totalorder %v4958_v32, %v4784_v7  ;;  %v3852_v48 = vsel %vm284_vm12, 1.0, %v6261_v10 }
  0x57   : > { %vm1038_vm8 = vcmp.eq.s32.totalorder %v4961_v37, %v4781_v6  ;;  %vm1039_vm9 = vcmp.eq.s32.totalorder %v4961_v37, %v4784_v7  ;;  %v3853_v49 = vsel %vm285_vm13, 1.0, %v6261_v10  ;;  %v3856_v50 = vsel %vm288_vm14, 1.0, %v6261_v10 }
  0x58   : > { %vm1042_vm10 = vcmp.eq.s32.totalorder %v4964_v38, %v4781_v6  ;;  %vm1043_vm11 = vcmp.eq.s32.totalorder %v4964_v38, %v4784_v7  ;;  %v3980_v41 = vsel %vm1038_vm8, 1.0, %v6261_v10  ;;  %v3981_v42 = vsel %vm1039_vm9, 1.0, %v6261_v10 }
  0x59   : > { %v3984_v43 = vsel %vm1042_vm10, 1.0, %v6261_v10  ;;  %v3985_v44 = vsel %vm1043_vm11, 1.0, %v6261_v10  ;;  %v3857_v51 = vsel %vm289_vm15, 1.0, %v6261_v10  ;;  %v456_v57 = vpack.c.bf16 %v3856_v50, %v3852_v48  ;;  %v4349_v48 = vld [vmem:[#allocation5 + $0x60] sm:$0xff] }
  0x5a   : > { %v457_v58 = vpack.c.bf16 %v3857_v51, %v3853_v49  ;;  %v4357_v49 = vld [vmem:[#allocation7 + $0x60] sm:$0xff] }
  0x5f   : > { %1240 = vxpose.binary.xlu0.c.b16.cont [3/16] %v1199_v46, %v1198_v45, 128  ;;  %v1210_v45 = vpack.c.bf16 %v3984_v43, %v3980_v41  ;;  %v1211_v46 = vpack.c.bf16 %v3985_v44, %v3981_v42  ;;  %v5027_v43 = vadd.s32 112, %v4767_v1  ;;  %v5030_v44 = vadd.s32 120, %v4767_v1 }
  0x60   : > { %502 = vxpose.binary.xlu1.c.b16.cont [3/16] %v445_v54, %v444_v53, 128  ;;  %v4991_v53 = vadd.s32 96, %v4767_v1  ;;  %v4994_v54 = vadd.s32 104, %v4767_v1 }
  0x61   : > { %vm300_vm12 = vcmp.eq.s32.totalorder %v5027_v43, %v4781_v6  ;;  %vm301_vm13 = vcmp.eq.s32.totalorder %v5027_v43, %v4784_v7  ;;  %vm304_vm14 = vcmp.eq.s32.totalorder %v5030_v44, %v4781_v6  ;;  %vm305_vm15 = vcmp.eq.s32.totalorder %v5030_v44, %v4784_v7 }
  0x62   : > { %v4997_v59 = vadd.s32 128, %v4991_v53  ;;  %v5000_v60 = vadd.s32 128, %v4994_v54  ;;  %vm292_vm4 = vcmp.eq.s32.totalorder %v4991_v53, %v4781_v6  ;;  %vm293_vm5 = vcmp.eq.s32.totalorder %v4991_v53, %v4784_v7 }
  0x63   : > { %vm296_vm6 = vcmp.eq.s32.totalorder %v4994_v54, %v4781_v6  ;;  %vm297_vm7 = vcmp.eq.s32.totalorder %v4994_v54, %v4784_v7 }
  0x64   : > { %vm1046_vm0 = vcmp.eq.s32.totalorder %v4997_v59, %v4781_v6  ;;  %vm1047_vm1 = vcmp.eq.s32.totalorder %v4997_v59, %v4784_v7  ;;  %vm1050_vm2 = vcmp.eq.s32.totalorder %v5000_v60, %v4781_v6  ;;  %vm1051_vm3 = vcmp.eq.s32.totalorder %v5000_v60, %v4784_v7 }
  0x65   : > { %v3988_v19 = vsel %vm1046_vm0, 1.0, %v6261_v10  ;;  %v3989_v20 = vsel %vm1047_vm1, 1.0, %v6261_v10  ;;  %v3992_v21 = vsel %vm1050_vm2, 1.0, %v6261_v10  ;;  %v3993_v22 = vsel %vm1051_vm3, 1.0, %v6261_v10 }
  0x66   : > { %v1214_v29 = vpack.c.bf16 %v3992_v21, %v3988_v19  ;;  %v1215_v30 = vpack.c.bf16 %v3993_v22, %v3989_v20  ;;  %v3864_v41 = vsel %vm296_vm6, 1.0, %v6261_v10  ;;  %v3865_v42 = vsel %vm297_vm7, 1.0, %v6261_v10 }
  0x6f   : > { %1241 = vxpose.binary.xlu0.c.b16.cont [4/16] %v1203_v62, %v1202_v61, 128  ;;  %v4344_v61 = vld [vmem:[#allocation7 + $0x38] sm:$0xff] }
  0x70   : > { %503 = vxpose.binary.xlu1.c.b16.cont [4/16] %v449_v16, %v448_v15, 128  ;;  %v4336_v62 = vld [vmem:[#allocation5 + $0x38] sm:$0xff]  ;;  %v4351_v15 = vld [vmem:[#allocation5 + $0x70] sm:$0xff] }
  0x71   : > { %596 = vmatpush.bf16.msra.mxu0 %v4344_v61  ;;  %813 = vmatpush.bf16.msra.mxu1 %v4336_v62  ;;  %v4359_v16 = vld [vmem:[#allocation7 + $0x70] sm:$0xff]  ;;  %v4340_v61 = vld [vmem:[#allocation7 + $0x18] sm:$0xff] }
  0x72   : > { %1335 = vmatpush.bf16.msra.mxu2 %v4351_v15  ;;  %1632 = vmatpush.bf16.msra.mxu3 %v4359_v16  ;;  %v4332_v62 = vld [vmem:[#allocation5 + $0x18] sm:$0xff]  ;;  %v4347_v15 = vld [vmem:[#allocation5 + $0x50] sm:$0xff] }
  0x73   : > { %v4355_v16 = vld [vmem:[#allocation7 + $0x50] sm:$0xff] }
  0x75   : > { %597 = vmatpush.bf16.msra.mxu0 %v4343_v11  ;;  %814 = vmatpush.bf16.msra.mxu1 %v4335_v12  ;;  %v4339_v11 = vld [vmem:[#allocation7 + $0x10] sm:$0xff] }
  0x76   : > { %1336 = vmatpush.bf16.msra.mxu2 %v4350_v27  ;;  %1633 = vmatpush.bf16.msra.mxu3 %v4358_v28  ;;  %v4331_v12 = vld [vmem:[#allocation5 + $0x10] sm:$0xff]  ;;  %v4346_v27 = vld [vmem:[#allocation5 + $0x48] sm:$0xff] }
  0x77   : > { %v4354_v28 = vld [vmem:[#allocation7 + $0x48] sm:$0xff] }
  0x7a   : > { %1337 = vmatpush.bf16.msra.mxu2 %v4349_v48  ;;  %1634 = vmatpush.bf16.msra.mxu3 %v4357_v49  ;;  %v4345_v48 = vld [vmem:[#allocation5 + $0x40] sm:$0xff] }
  0x7b   : > { %v4353_v49 = vld [vmem:[#allocation7 + $0x40] sm:$0xff] }
  0x7e   : > { %1338 = vmatpush.bf16.msra.mxu2 %v4348_v63  ;;  %1635 = vmatpush.bf16.msra.mxu3 %v4356_v0  ;;  %v4392_v63 = vld [vmem:[#allocation7 + $0xf8] sm:$0xff] }
  0x7f   : > { %1242 = vxpose.binary.xlu0.c.b16.cont [5/16] %v1207_v26, %v1206_v25, 128  ;;  %v4342_v25 = vld [vmem:[#allocation7 + $0x28] sm:$0xff]  ;;  %v4376_v0 = vld [vmem:[#allocation7 + $0xb8] sm:$0xff] }
  0x80   : > { %504 = vxpose.binary.xlu1.c.b16.cont [5/16] %v453_v34, %v452_v33, 128  ;;  %v4334_v26 = vld [vmem:[#allocation5 + $0x28] sm:$0xff]  ;;  %v3860_v33 = vsel %vm292_vm4, 1.0, %v6261_v10  ;;  %v3861_v34 = vsel %vm293_vm5, 1.0, %v6261_v10 }
  0x81   : > { %598 = vmatpush.bf16.msra.mxu0 %v4342_v25  ;;  %815 = vmatpush.bf16.msra.mxu1 %v4334_v26  ;;  %v460_v50 = vpack.c.bf16 %v3864_v41, %v3860_v33  ;;  %v461_v51 = vpack.c.bf16 %v3865_v42, %v3861_v34  ;;  %v4338_v25 = vld [vmem:[#allocation7 + $0x8] sm:$0xff]  ;;  %v3868_v33 = vsel %vm300_vm12, 1.0, %v6261_v10  ;;  %v3869_v34 = vsel %vm301_vm13, 1.0, %v6261_v10 }
  0x82   : > { %v4330_v26 = vld [vmem:[#allocation5 + $0x8] sm:$0xff]  ;;  %1339 = vmatpush.bf16.msra.mxu2 %v4347_v15  ;;  %1636 = vmatpush.bf16.msra.mxu3 %v4355_v16  ;;  %v3872_v41 = vsel %vm304_vm14, 1.0, %v6261_v10  ;;  %v3873_v42 = vsel %vm305_vm15, 1.0, %v6261_v10 }
  0x86   : > { %1340 = vmatpush.bf16.msra.mxu2 %v4346_v27  ;;  %1637 = vmatpush.bf16.msra.mxu3 %v4354_v28  ;;  %v4383_v27 = vld [vmem:[#allocation5 + $0xf0] sm:$0xff] }
  0x87   : > { %v4367_v28 = vld [vmem:[#allocation5 + $0xb0] sm:$0xff] }
  0x8a   : > { %1341 = vmatpush.bf16.msra.mxu2 %v4345_v48  ;;  %1638 = vmatpush.bf16.msra.mxu3 %v4353_v49 }
  0x8e   : > { %3395 = vmatpush.bf16.msrb.mxu3 %v4392_v63 }
  0x8f   : > { %1243 = vxpose.binary.xlu0.c.b16.cont [6/16] %v1211_v46, %v1210_v45, 128  ;;  %v4341_v45 = vld [vmem:[#allocation7 + $0x20] sm:$0xff] }
  0x90   : > { %505 = vxpose.binary.xlu1.c.b16.cont [6/16] %v457_v58, %v456_v57, 128  ;;  %v4333_v46 = vld [vmem:[#allocation5 + $0x20] sm:$0xff]  ;;  %v5033_v57 = vadd.s32 128, %v5027_v43  ;;  %v5036_v58 = vadd.s32 128, %v5030_v44 }
  0x91   : > { %599 = vmatpush.bf16.msra.mxu0 %v4341_v45  ;;  %816 = vmatpush.bf16.msra.mxu1 %v4333_v46  ;;  %v4337_v45 = vld [vmem:[#allocation7] sm:$0xff] }
  0x92   : > { %vm1054_vm8 = vcmp.eq.s32.totalorder %v5033_v57, %v4781_v6  ;;  %vm1055_vm9 = vcmp.eq.s32.totalorder %v5033_v57, %v4784_v7  ;;  %vm1058_vm10 = vcmp.eq.s32.totalorder %v5036_v58, %v4781_v6  ;;  %vm1059_vm11 = vcmp.eq.s32.totalorder %v5036_v58, %v4784_v7  ;;  %v4329_v46 = vld [vmem:[#allocation5] sm:$0xff] }
  0x93   : > { %v3996_v19 = vsel %vm1054_vm8, 1.0, %v6261_v10  ;;  %v3997_v20 = vsel %vm1055_vm9, 1.0, %v6261_v10  ;;  %v4000_v21 = vsel %vm1058_vm10, 1.0, %v6261_v10  ;;  %v4001_v22 = vsel %vm1059_vm11, 1.0, %v6261_v10 }
  0x95   : > { %600 = vmatpush.bf16.msra.mxu0 %v4340_v61  ;;  %817 = vmatpush.bf16.msra.mxu1 %v4332_v62  ;;  %v4384_v61 = vld [vmem:[#allocation5 + $0xf8] sm:$0xff] }
  0x96   : > { %v4368_v62 = vld [vmem:[#allocation5 + $0xb8] sm:$0xff]  ;;  %3098 = vmatpush.bf16.msrb.mxu2 %v4384_v61 }
  0x99   : > { %601 = vmatpush.bf16.msra.mxu0 %v4339_v11  ;;  %818 = vmatpush.bf16.msra.mxu1 %v4331_v12 }
  0x9a   : > { %3099 = vmatpush.bf16.msrb.mxu2 %v4383_v27 }
  0x9d   : > { %602 = vmatpush.bf16.msra.mxu0 %v4338_v25  ;;  %819 = vmatpush.bf16.msra.mxu1 %v4330_v26 }
  0x9f   : > { %1244 = vxpose.binary.xlu0.c.b16.cont [7/16] %v1215_v30, %v1214_v29, 128  ;;  %v1218_v29 = vpack.c.bf16 %v4000_v21, %v3996_v19  ;;  %v1219_v30 = vpack.c.bf16 %v4001_v22, %v3997_v20 }
  0xa0   : > { %506 = vxpose.binary.xlu1.c.b16.cont [7/16] %v461_v51, %v460_v50, 128  ;;  %v464_v50 = vpack.c.bf16 %v3872_v41, %v3868_v33  ;;  %v465_v51 = vpack.c.bf16 %v3873_v42, %v3869_v34  ;;  %v5075_v42 = vperm.slane %v4778_v5, 2 }
  0xa1   : > { %603 = vmatpush.bf16.msra.mxu0 %v4337_v45  ;;  %820 = vmatpush.bf16.msra.mxu1 %v4329_v46  ;;  %v5078_v45 = vperm.slane %v4778_v5, 3 }
  0xa2   : > { %vm246_vm0 = vcmp.eq.s32.totalorder %v4767_v1, %v5075_v42  ;;  %vm250_vm2 = vcmp.eq.s32.totalorder %v4770_v2, %v5075_v42  ;;  %vm1000_vm4 = vcmp.eq.s32.totalorder %v4773_v3, %v5075_v42  ;;  %vm1004_vm6 = vcmp.eq.s32.totalorder %v4776_v4, %v5075_v42 }
  0xa3   : > { %vm247_vm1 = vcmp.eq.s32.totalorder %v4767_v1, %v5078_v45  ;;  %vm251_vm3 = vcmp.eq.s32.totalorder %v4770_v2, %v5078_v45  ;;  %v3814_v48 = vsel %vm246_vm0, 1.0, %v6261_v10  ;;  %v3818_v49 = vsel %vm250_vm2, 1.0, %v6261_v10 }
  0xa4   : > { %v3815_v5 = vsel %vm247_vm1, 1.0, %v6261_v10  ;;  %vm1001_vm5 = vcmp.eq.s32.totalorder %v4773_v3, %v5078_v45  ;;  %vm1005_vm7 = vcmp.eq.s32.totalorder %v4776_v4, %v5078_v45  ;;  %vm254_vm8 = vcmp.eq.s32.totalorder %v4787_v8, %v5075_v42 }
  0xa5   : > { %2216 = vmatpush.bf16.msrb.mxu0 %v4368_v62  ;;  %2513 = vmatpush.bf16.msrb.mxu1 %v4376_v0  ;;  %v3942_v0 = vsel %vm1000_vm4, 1.0, %v6261_v10  ;;  %vm255_vm9 = vcmp.eq.s32.totalorder %v4787_v8, %v5078_v45  ;;  %vm258_vm10 = vcmp.eq.s32.totalorder %v4790_v9, %v5075_v42  ;;  %vm259_vm11 = vcmp.eq.s32.totalorder %v4790_v9, %v5078_v45 }
  0xa6   : > { %v3822_v4 = vsel %vm254_vm8, 1.0, %v6261_v10  ;;  %v3823_v27 = vsel %vm255_vm9, 1.0, %v6261_v10  ;;  %vm1008_vm12 = vcmp.eq.s32.totalorder %v4817_v23, %v5075_v42  ;;  %vm1009_vm13 = vcmp.eq.s32.totalorder %v4817_v23, %v5078_v45 }
  0xa7   : > { %vm1012_vm14 = vcmp.eq.s32.totalorder %v4820_v24, %v5075_v42  ;;  %vm1013_vm15 = vcmp.eq.s32.totalorder %v4820_v24, %v5078_v45  ;;  %vm262_vm0 = vcmp.eq.s32.totalorder %v4847_v35, %v5075_v42  ;;  %vm263_vm1 = vcmp.eq.s32.totalorder %v4847_v35, %v5078_v45 }
  0xa8   : > { %vm266_vm2 = vcmp.eq.s32.totalorder %v4850_v36, %v5075_v42  ;;  %v3830_v24 = vsel %vm262_vm0, 1.0, %v6261_v10  ;;  %vm1016_vm4 = vcmp.eq.s32.totalorder %v4853_v39, %v5075_v42  ;;  %vm270_vm8 = vcmp.eq.s32.totalorder %v4879_v47, %v5075_v42 }
  0xa9   : > { %2217 = vmatpush.bf16.msrb.mxu0 %v4367_v28  ;;  %v3826_v28 = vsel %vm258_vm10, 1.0, %v6261_v10  ;;  %vm271_vm9 = vcmp.eq.s32.totalorder %v4879_v47, %v5078_v45  ;;  %vm274_vm10 = vcmp.eq.s32.totalorder %v4886_v52, %v5075_v42  ;;  %vm278_vm0 = vcmp.eq.s32.totalorder %v4919_v13, %v5075_v42 }
  0xaf   : > { %1245 = vxpose.binary.xlu0.c.b16.end [8/16] %v1219_v30, %v1218_v29, 128  ;;  %v4391_v29 = vld [vmem:[#allocation7 + $0xf0] sm:$0xff] }
  0xb0   : > { %507 = vxpose.binary.xlu1.c.b16.end [8/16] %v465_v51, %v464_v50, 128  ;;  %v4375_v30 = vld [vmem:[#allocation7 + $0xb0] sm:$0xff]  ;;  %v3819_v50 = vsel %vm251_vm3, 1.0, %v6261_v10  ;;  %v438_v51 = vpack.c.bf16 %v3818_v49, %v3814_v48  ;;  %v3951_v49 = vsel %vm1009_vm13, 1.0, %v6261_v10  ;;  %vm267_vm3 = vcmp.eq.s32.totalorder %v4850_v36, %v5078_v45 }
  0xb1   : > { %3396 = vmatpush.bf16.msrb.mxu3 %v4391_v29  ;;  %2514 = vmatpush.bf16.msrb.mxu1 %v4375_v30  ;;  %v439_v61 = vpack.c.bf16 %v3819_v50, %v3815_v5  ;;  %v3827_v29 = vsel %vm259_vm11, 1.0, %v6261_v10  ;;  %v442_v30 = vpack.c.bf16 %v3826_v28, %v3822_v4  ;;  %v3950_v5 = vsel %vm1008_vm12, 1.0, %v6261_v10 }
  0xb2   : > { %v3954_v50 = vsel %vm1012_vm14, 1.0, %v6261_v10  ;;  %vm275_vm11 = vcmp.eq.s32.totalorder %v4886_v52, %v5078_v45  ;;  %vm1024_vm12 = vcmp.eq.s32.totalorder %v4889_v55, %v5075_v42  ;;  %vm1025_vm13 = vcmp.eq.s32.totalorder %v4889_v55, %v5078_v45 }
  0xb3   : > { %vm1028_vm14 = vcmp.eq.s32.totalorder %v4892_v56, %v5075_v42 }
  0xbf   : > { %524 = vxpose.binary.xlu0.c.b16.start [1/16] %v439_v61, %v438_v51, 128  ;;  %v3955_v51 = vsel %vm1013_vm15, 1.0, %v6261_v10  ;;  %v1196_v61 = vpack.c.bf16 %v3954_v50, %v3950_v5  ;;  %v4366_v50 = vld [vmem:[#allocation5 + $0xa8] sm:$0xff]  ;;  %vm1029_vm15 = vcmp.eq.s32.totalorder %v4892_v56, %v5078_v45  ;;  %v3846_v56 = vsel %vm278_vm0, 1.0, %v6261_v10 }
  0xc0   : > { %2218 = vmatpush.bf16.msrb.mxu0 %v4366_v50  ;;  %vm294_vm0 = vcmp.eq.s32.totalorder %v4991_v53, %v5075_v42 }
  0xeb   : > { %v1246_v11 = vpop.trf.xlu0 }
  0xec   : > { %1342 = vmatmul.bf16.vlgmr.msra.gmra.mxu2 %v1246_v11  ;;  %1639 = vmatmul.bf16.vlgmr.msra.gmra.mxu3 %v1246_v11  ;;  %v508_v12 = vpop.trf.xlu1  ;;  %v3943_v11 = vsel %vm1001_vm5, 1.0, %v6261_v10  ;;  %vm1017_vm5 = vcmp.eq.s32.totalorder %v4853_v39, %v5078_v45 }
  0xed   : > { %604 = vmatmul.bf16.vlgmr.msra.gmra.mxu0 %v508_v12  ;;  %821 = vmatmul.bf16.vlgmr.msra.gmra.mxu1 %v508_v12  ;;  %v3946_v12 = vsel %vm1004_vm6, 1.0, %v6261_v10  ;;  %vm1020_vm6 = vcmp.eq.s32.totalorder %v4856_v40, %v5075_v42  ;;  %v3959_v28 = vsel %vm1017_vm5, 1.0, %v6261_v10  ;;  %vm1033_vm5 = vcmp.eq.s32.totalorder %v4925_v17, %v5078_v45 }
  0xf3   : > { %v5062_v15 = vpop.trf.xlu0 }
  0xf4   : > { %v5064_v16 = vpop.trf.xlu1 }
  0xfb   : > { %v1248_v19 = vpop.trf.xlu0 }
  0xfc   : > { %1347 = vmatmul.bf16.gmra.mxu2 %v1248_v19  ;;  %1644 = vmatmul.bf16.gmra.mxu3 %v1248_v19  ;;  %v510_v20 = vpop.trf.xlu1  ;;  %v3947_v19 = vsel %vm1005_vm7, 1.0, %v6261_v10  ;;  %vm1021_vm7 = vcmp.eq.s32.totalorder %v4856_v40, %v5078_v45  ;;  %v4382_v40 = vld [vmem:[#allocation5 + $0xe8] sm:$0xff] }
  0xfd   : > { %609 = vmatmul.bf16.gmra.mxu0 %v510_v20  ;;  %826 = vmatmul.bf16.gmra.mxu1 %v510_v20  ;;  %v1192_v20 = vpack.c.bf16 %v3946_v12, %v3942_v0  ;;  %v1197_v0 = vpack.c.bf16 %v3955_v51, %v3951_v49  ;;  %v3831_v12 = vsel %vm263_vm1, 1.0, %v6261_v10  ;;  %v4390_v51 = vld [vmem:[#allocation7 + $0xe8] sm:$0xff]  ;;  %vm279_vm1 = vcmp.eq.s32.totalorder %v4919_v13, %v5078_v45 }
  0xfe   : > { %3100 = vmatpush.bf16.msrb.mxu2 %v4382_v40  ;;  %3397 = vmatpush.bf16.msrb.mxu3 %v4390_v51 }
 0x103   : > { %v5066_v21 = vpop.trf.xlu0 }
 0x104   : > { %v5068_v22 = vpop.trf.xlu1 }
 0x10b   : > { %v1250_v25 = vpop.trf.xlu0 }
 0x10c   : > { %1352 = vmatmul.bf16.gmra.mxu2 %v1250_v25  ;;  %1649 = vmatmul.bf16.gmra.mxu3 %v1250_v25  ;;  %v512_v26 = vpop.trf.xlu1  ;;  %v1193_v25 = vpack.c.bf16 %v3947_v19, %v3943_v11  ;;  %v3834_v19 = vsel %vm266_vm2, 1.0, %v6261_v10  ;;  %vm282_vm2 = vcmp.eq.s32.totalorder %v4922_v14, %v5075_v42 }
 0x10d   : > { %614 = vmatmul.bf16.gmra.mxu0 %v512_v26  ;;  %831 = vmatmul.bf16.gmra.mxu1 %v512_v26 }
 0x10e   : > { %1262 = vxpose.binary.xlu2.c.b16.start [1/16] %v1193_v25, %v1192_v20, 128  ;;  %v3835_v20 = vsel %vm267_vm3, 1.0, %v6261_v10  ;;  %v446_v25 = vpack.c.bf16 %v3834_v19, %v3830_v24  ;;  %v4374_v19 = vld [vmem:[#allocation7 + $0xa8] sm:$0xff]  ;;  %vm283_vm3 = vcmp.eq.s32.totalorder %v4922_v14, %v5078_v45 }
 0x10f   : > { %2515 = vmatpush.bf16.msrb.mxu1 %v4374_v19  ;;  %v3851_v40 = vsel %vm283_vm3, 1.0, %v6261_v10  ;;  %vm299_vm3 = vcmp.eq.s32.totalorder %v4994_v54, %v5078_v45 }
 0x113   : > { %v5070_v33 = vpop.trf.xlu0 }
 0x114   : > { %v5072_v34 = vpop.trf.xlu1 }
 0x11b   : > { %v1252_v41 = vpop.trf.xlu0 }
 0x11c   : > { %1357 = vmatmul.bf16.gmra.mxu2 %v1252_v41  ;;  %1654 = vmatmul.bf16.gmra.mxu3 %v1252_v41  ;;  %v514_v46 = vpop.trf.xlu1  ;;  %v443_v41 = vpack.c.bf16 %v3827_v29, %v3823_v27  ;;  %v3958_v27 = vsel %vm1016_vm4, 1.0, %v6261_v10  ;;  %v3962_v29 = vsel %vm1020_vm6, 1.0, %v6261_v10  ;;  %vm1032_vm4 = vcmp.eq.s32.totalorder %v4925_v17, %v5075_v42 }
 0x11d   : > { %619 = vmatmul.bf16.gmra.mxu0 %v514_v46  ;;  %836 = vmatmul.bf16.gmra.mxu1 %v514_v46  ;;  %v1200_v5 = vpack.c.bf16 %v3962_v29, %v3958_v27  ;;  %v3967_v27 = vsel %vm1025_vm13, 1.0, %v6261_v10  ;;  %v3971_v29 = vsel %vm1029_vm15, 1.0, %v6261_v10  ;;  %vm1036_vm6 = vcmp.eq.s32.totalorder %v4928_v18, %v5075_v42 }
 0x11e   : > { %525 = vxpose.binary.xlu0.c.b16.cont [2/16] %v443_v41, %v442_v30, 128  ;;  %v3963_v30 = vsel %vm1021_vm7, 1.0, %v6261_v10  ;;  %vm1037_vm7 = vcmp.eq.s32.totalorder %v4928_v18, %v5078_v45  ;;  %vm1041_vm13 = vcmp.eq.s32.totalorder %v4961_v37, %v5078_v45  ;;  %vm1045_vm15 = vcmp.eq.s32.totalorder %v4964_v38, %v5078_v45 }
 0x11f   : > { %1263 = vxpose.binary.xlu2.c.b16.cont [2/16] %v1197_v0, %v1196_v61, 128  ;;  %v1201_v49 = vpack.c.bf16 %v3963_v30, %v3959_v28  ;;  %v3838_v61 = vsel %vm270_vm8, 1.0, %v6261_v10  ;;  %v3839_v0 = vsel %vm271_vm9, 1.0, %v6261_v10  ;;  %v3970_v28 = vsel %vm1028_vm14, 1.0, %v6261_v10 }
 0x120   : > { %vm286_vm8 = vcmp.eq.s32.totalorder %v4955_v31, %v5075_v42  ;;  %vm287_vm9 = vcmp.eq.s32.totalorder %v4955_v31, %v5078_v45  ;;  %vm1044_vm14 = vcmp.eq.s32.totalorder %v4964_v38, %v5075_v42 }
 0x123   : > { %v5092_v62 = vpop.trf.xlu0 }
 0x124   : > { %v5094_v63 = vpop.trf.xlu1 }
 0x12b   : > { %v1254_v26 = vpop.trf.xlu0 }
 0x12c   : > { %1362 = vmatmul.bf16.gmra.mxu2 %v1254_v26  ;;  %1659 = vmatmul.bf16.gmra.mxu3 %v1254_v26  ;;  %v516_v3 = vpop.trf.xlu1  ;;  %v447_v26 = vpack.c.bf16 %v3835_v20, %v3831_v12 }
 0x12d   : > { %624 = vmatmul.bf16.gmra.mxu0 %v516_v3  ;;  %841 = vmatmul.bf16.gmra.mxu1 %v516_v3 }
 0x12e   : > { %526 = vxpose.binary.xlu0.c.b16.cont [3/16] %v447_v26, %v446_v25, 128  ;;  %v3966_v26 = vsel %vm1024_vm12, 1.0, %v6261_v10  ;;  %vm1040_vm12 = vcmp.eq.s32.totalorder %v4961_v37, %v5075_v42 }
 0x12f   : > { %1264 = vxpose.binary.xlu2.c.b16.cont [3/16] %v1201_v49, %v1200_v5, 128  ;;  %v1205_v5 = vpack.c.bf16 %v3971_v29, %v3967_v27  ;;  %v3847_v49 = vsel %vm279_vm1, 1.0, %v6261_v10  ;;  %v3854_v27 = vsel %vm286_vm8, 1.0, %v6261_v10  ;;  %vm295_vm1 = vcmp.eq.s32.totalorder %v4991_v53, %v5078_v45 }
 0x130   : > { %v455_v51 = vpack.c.bf16 %v3851_v40, %v3847_v49  ;;  %vm302_vm8 = vcmp.eq.s32.totalorder %v5027_v43, %v5075_v42 }
 0x133   : > { %v5120_v46 = vpop.trf.xlu0 }
 0x134   : > { %v5122_v48 = vpop.trf.xlu1 }
 0x13b   : > { %v1256_v11 = vpop.trf.xlu0 }
 0x13c   : > { %1367 = vmatmul.bf16.gmra.mxu2 %v1256_v11  ;;  %1664 = vmatmul.bf16.gmra.mxu3 %v1256_v11  ;;  %v518_v23 = vpop.trf.xlu1  ;;  %v3842_v11 = vsel %vm274_vm10, 1.0, %v6261_v10  ;;  %vm290_vm10 = vcmp.eq.s32.totalorder %v4958_v32, %v5075_v42 }
 0x13d   : > { %629 = vmatmul.bf16.gmra.mxu0 %v518_v23  ;;  %846 = vmatmul.bf16.gmra.mxu1 %v518_v23  ;;  %v3843_v23 = vsel %vm275_vm11, 1.0, %v6261_v10  ;;  %v450_v24 = vpack.c.bf16 %v3842_v11, %v3838_v61  ;;  %v3974_v61 = vsel %vm1032_vm4, 1.0, %v6261_v10  ;;  %v3978_v11 = vsel %vm1036_vm6, 1.0, %v6261_v10 }
 0x13e   : > { %v451_v12 = vpack.c.bf16 %v3843_v23, %v3839_v0  ;;  %v3975_v0 = vsel %vm1033_vm5, 1.0, %v6261_v10  ;;  %v3979_v23 = vsel %vm1037_vm7, 1.0, %v6261_v10  ;;  %vm291_vm11 = vcmp.eq.s32.totalorder %v4958_v32, %v5078_v45 }
 0x13f   : > { %v3858_v29 = vsel %vm290_vm10, 1.0, %v6261_v10  ;;  %vm1048_vm4 = vcmp.eq.s32.totalorder %v4997_v59, %v5075_v42  ;;  %vm1049_vm5 = vcmp.eq.s32.totalorder %v4997_v59, %v5078_v45  ;;  %vm1052_vm6 = vcmp.eq.s32.totalorder %v5000_v60, %v5075_v42 }
 0x140   : > { %527 = vxpose.binary.xlu0.c.b16.cont [4/16] %v451_v12, %v450_v24, 128  ;;  %v1208_v24 = vpack.c.bf16 %v3978_v11, %v3974_v61  ;;  %v1209_v12 = vpack.c.bf16 %v3979_v23, %v3975_v0  ;;  %v3982_v0 = vsel %vm1040_vm12, 1.0, %v6261_v10  ;;  %v3983_v11 = vsel %vm1041_vm13, 1.0, %v6261_v10 }
 0x141   : > { %v3986_v23 = vsel %vm1044_vm14, 1.0, %v6261_v10  ;;  %vm1053_vm7 = vcmp.eq.s32.totalorder %v5000_v60, %v5078_v45  ;;  %vm306_vm10 = vcmp.eq.s32.totalorder %v5030_v44, %v5075_v42  ;;  %vm1056_vm12 = vcmp.eq.s32.totalorder %v5033_v57, %v5075_v42 }
 0x142   : > { %vm1057_vm13 = vcmp.eq.s32.totalorder %v5033_v57, %v5078_v45  ;;  %vm1060_vm14 = vcmp.eq.s32.totalorder %v5036_v58, %v5075_v42 }
 0x143   : > { %v5148_v3 = vpop.trf.xlu0 }
 0x144   : > { %v5150_v4 = vpop.trf.xlu1 }
 0x14b   : > { %v1258_v41 = vpop.trf.xlu0 }
 0x14c   : > { %1372 = vmatmul.bf16.gmra.mxu2 %v1258_v41  ;;  %1669 = vmatmul.bf16.gmra.mxu3 %v1258_v41  ;;  %v520_v39 = vpop.trf.xlu1  ;;  %v1204_v41 = vpack.c.bf16 %v3970_v28, %v3966_v26  ;;  %v3855_v28 = vsel %vm287_vm9, 1.0, %v6261_v10  ;;  %vm303_vm9 = vcmp.eq.s32.totalorder %v5027_v43, %v5078_v45 }
 0x14d   : > { %634 = vmatmul.bf16.gmra.mxu0 %v520_v39  ;;  %851 = vmatmul.bf16.gmra.mxu1 %v520_v39  ;;  %v3850_v39 = vsel %vm282_vm2, 1.0, %v6261_v10  ;;  %vm298_vm2 = vcmp.eq.s32.totalorder %v4994_v54, %v5075_v42 }
 0x14e   : > { %1265 = vxpose.binary.xlu2.c.b16.cont [4/16] %v1205_v5, %v1204_v41, 128  ;;  %v454_v50 = vpack.c.bf16 %v3850_v39, %v3846_v56  ;;  %v458_v5 = vpack.c.bf16 %v3858_v29, %v3854_v27  ;;  %v3866_v27 = vsel %vm298_vm2, 1.0, %v6261_v10  ;;  %v3867_v29 = vsel %vm299_vm3, 1.0, %v6261_v10 }
 0x150   : > { %528 = vxpose.binary.xlu0.c.b16.cont [5/16] %v455_v51, %v454_v50, 128 }
 0x153   : > { %v5176_v20 = vpop.trf.xlu0 }
 0x154   : > { %v5178_v25 = vpop.trf.xlu1 }
 0x15b   : > { %v1260_v30 = vpop.trf.xlu0 }
 0x15c   : > { %1377 = vmatmul.bf16.gmra.mxu2 %v1260_v30  ;;  %1674 = vmatmul.bf16.gmra.mxu3 %v1260_v30  ;;  %v522_v55 = vpop.trf.xlu1  ;;  %v3859_v30 = vsel %vm291_vm11, 1.0, %v6261_v10  ;;  %vm307_vm11 = vcmp.eq.s32.totalorder %v5030_v44, %v5078_v45 }
 0x15d   : > { %639 = vmatmul.bf16.gmra.mxu0 %v522_v55  ;;  %856 = vmatmul.bf16.gmra.mxu1 %v522_v55  ;;  %v459_v55 = vpack.c.bf16 %v3859_v30, %v3855_v28 }
 0x15e   : > { %1266 = vxpose.binary.xlu2.c.b16.cont [5/16] %v1209_v12, %v1208_v24, 128  ;;  %v3987_v24 = vsel %vm1045_vm15, 1.0, %v6261_v10  ;;  %v1212_v12 = vpack.c.bf16 %v3986_v23, %v3982_v0  ;;  %v3991_v0 = vsel %vm1049_vm5, 1.0, %v6261_v10  ;;  %v3995_v23 = vsel %vm1053_vm7, 1.0, %v6261_v10 }
 0x15f   : > { %v1213_v37 = vpack.c.bf16 %v3987_v24, %v3983_v11  ;;  %v3994_v11 = vsel %vm1052_vm6, 1.0, %v6261_v10  ;;  %v1217_v59 = vpack.c.bf16 %v3995_v23, %v3991_v0  ;;  %vm1061_vm15 = vcmp.eq.s32.totalorder %v5036_v58, %v5078_v45 }
 0x160   : > { %529 = vxpose.binary.xlu0.c.b16.cont [6/16] %v459_v55, %v458_v5, 128  ;;  %v3998_v0 = vsel %vm1056_vm12, 1.0, %v6261_v10  ;;  %v4002_v23 = vsel %vm1060_vm14, 1.0, %v6261_v10 }
 0x16a   : > { %v605_v19 = vpop.f32.mrf.mxu0  ;;  %v822_v26 = vpop.f32.mrf.mxu1 }
 0x16b   : > { %v823_v17 = vadd.f32 %v822_v26, %v605_v19 }
 0x16c   : > { %1382 = vmatmul.bf16.gmra.mxu2 %v5062_v15  ;;  %1679 = vmatmul.bf16.gmra.mxu3 %v5062_v15 }
 0x16d   : > { %644 = vmatmul.bf16.gmra.mxu0 %v5064_v16  ;;  %861 = vmatmul.bf16.gmra.mxu1 %v5064_v16 }
 0x16e   : > { %1267 = vxpose.binary.xlu2.c.b16.cont [6/16] %v1213_v37, %v1212_v12, 128 }
 0x16f   : > { %v1343_v18 = vpop.f32.mrf.mxu2  ;;  %v1640_v15 = vpop.f32.mrf.mxu3 }
 0x170   : > { %v1503_v41 = vadd.f32 %v1343_v18, %v823_v17 }
 0x172   : > { %v5232_v56 = vadd.f32 %v1640_v15, %v1503_v41  ;;  %v607_v49 = vpop.f32.mrf.mxu0  ;;  %v824_v39 = vpop.f32.mrf.mxu1  ;;  %v3863_v15 = vsel %vm295_vm1, 1.0, %v6261_v10 }
 0x173   : > { %v825_v40 = vadd.f32 %v824_v39, %v607_v49  ;;  %v463_v41 = vpack.c.bf16 %v3867_v29, %v3863_v15  ;;  %v3874_v15 = vsel %vm306_vm10, 1.0, %v6261_v10 }
 0x174   : > { %6273 = vst [vmem:[#allocation12_spill] sm:$0xff] %v5232_v56 }
 0x177   : > { %v1345_v16 = vpop.f32.mrf.mxu2  ;;  %v1642_v50 = vpop.f32.mrf.mxu3 }
 0x178   : > { %v1504_v51 = vadd.f32 %v1345_v16, %v825_v40 }
 0x17a   : > { %v5242_v61 = vadd.f32 %v1642_v50, %v1504_v51  ;;  %v610_v19 = vpop.f32.mrf.mxu0  ;;  %v827_v26 = vpop.f32.mrf.mxu1  ;;  %v3990_v51 = vsel %vm1048_vm4, 1.0, %v6261_v10 }
 0x17b   : > { %v828_v17 = vadd.f32 %v827_v26, %v610_v19  ;;  %v1216_v24 = vpack.c.bf16 %v3994_v11, %v3990_v51  ;;  %v3999_v11 = vsel %vm1057_vm13, 1.0, %v6261_v10 }
 0x17c   : > { %6274 = vst [vmem:[#allocation13_spill] sm:$0xff] %v5242_v61  ;;  %1387 = vmatmul.bf16.gmra.mxu2 %v5066_v21  ;;  %1684 = vmatmul.bf16.gmra.mxu3 %v5066_v21  ;;  %v3862_v21 = vsel %vm294_vm0, 1.0, %v6261_v10 }
 0x17d   : > { %649 = vmatmul.bf16.gmra.mxu0 %v5068_v22  ;;  %866 = vmatmul.bf16.gmra.mxu1 %v5068_v22  ;;  %v462_v30 = vpack.c.bf16 %v3866_v27, %v3862_v21  ;;  %v3871_v21 = vsel %vm303_vm9, 1.0, %v6261_v10 }
 0x17e   : > { %1268 = vxpose.binary.xlu2.c.b16.cont [7/16] %v1217_v59, %v1216_v24, 128  ;;  %v4003_v24 = vsel %vm1061_vm15, 1.0, %v6261_v10 }
 0x17f   : > { %v1348_v38 = vpop.f32.mrf.mxu2  ;;  %v1645_v18 = vpop.f32.mrf.mxu3  ;;  %530 = vxpose.binary.xlu0.c.b16.cont [7/16] %v463_v41, %v462_v30, 128  ;;  %v4373_v41 = vld [vmem:[#allocation7 + $0xa0] sm:$0xff]  ;;  %v1221_v57 = vpack.c.bf16 %v4003_v24, %v3999_v11 }
 0x180   : > { %v1505_v28 = vadd.f32 %v1348_v38, %v828_v17  ;;  %v4381_v17 = vld [vmem:[#allocation5 + $0xe0] sm:$0xff]  ;;  %2516 = vmatpush.bf16.msrb.mxu1 %v4373_v41 }
 0x181   : > { %v4389_v38 = vld [vmem:[#allocation7 + $0xe0] sm:$0xff]  ;;  %3101 = vmatpush.bf16.msrb.mxu2 %v4381_v17 }
 0x182   : > { %v5264_v5 = vadd.f32 %v1645_v18, %v1505_v28  ;;  %v612_v22 = vpop.f32.mrf.mxu0  ;;  %v829_v55 = vpop.f32.mrf.mxu1  ;;  %v3870_v18 = vsel %vm302_vm8, 1.0, %v6261_v10  ;;  %v3875_v28 = vsel %vm307_vm11, 1.0, %v6261_v10  ;;  %3398 = vmatpush.bf16.msrb.mxu3 %v4389_v38 }
 0x183   : > { %v830_v49 = vadd.f32 %v829_v55, %v612_v22  ;;  %v466_v29 = vpack.c.bf16 %v3874_v15, %v3870_v18 }
 0x184   : > { %6275 = vst [vmem:[#allocation14_spill] sm:$0xff] %v5264_v5 }
 0x187   : > { %v1350_v39 = vpop.f32.mrf.mxu2  ;;  %v1647_v40 = vpop.f32.mrf.mxu3 }
 0x188   : > { %v1506_v16 = vadd.f32 %v1350_v39, %v830_v49 }
 0x18a   : > { %v5274_v50 = vadd.f32 %v1647_v40, %v1506_v16  ;;  %v615_v12 = vpop.f32.mrf.mxu0  ;;  %v832_v19 = vpop.f32.mrf.mxu1 }
 0x18b   : > { %v833_v26 = vadd.f32 %v832_v19, %v615_v12  ;;  %v1220_v12 = vpack.c.bf16 %v4002_v23, %v3998_v0 }
 0x18c   : > { %6276 = vst [vmem:[#allocation15_spill] sm:$0xff] %v5274_v50  ;;  %1392 = vmatmul.bf16.gmra.mxu2 %v5070_v33  ;;  %1689 = vmatmul.bf16.gmra.mxu3 %v5070_v33  ;;  %v4365_v33 = vld [vmem:[#allocation5 + $0xa0] sm:$0xff] }
 0x18d   : > { %654 = vmatmul.bf16.gmra.mxu0 %v5072_v34  ;;  %871 = vmatmul.bf16.gmra.mxu1 %v5072_v34  ;;  %v467_v34 = vpack.c.bf16 %v3875_v28, %v3871_v21 }
 0x18e   : > { %2219 = vmatpush.bf16.msrb.mxu0 %v4365_v33 }
 0x18f   : > { %v1353_v60 = vpop.f32.mrf.mxu2  ;;  %v1650_v37 = vpop.f32.mrf.mxu3  ;;  %531 = vxpose.binary.xlu0.c.b16.end [8/16] %v467_v34, %v466_v29, 128 }
 0x190   : > { %v1507_v27 = vadd.f32 %v1353_v60, %v833_v26  ;;  %1269 = vxpose.binary.xlu2.c.b16.end [8/16] %v1221_v57, %v1220_v12, 128 }
 0x192   : > { %v5296_v30 = vadd.f32 %v1650_v37, %v1507_v27  ;;  %v617_v22 = vpop.f32.mrf.mxu0  ;;  %v834_v55 = vpop.f32.mrf.mxu1 }
 0x193   : > { %v835_v49 = vadd.f32 %v834_v55, %v617_v22 }
 0x194   : > { %6277 = vst [vmem:[#allocation16_spill] sm:$0xff] %v5296_v30 }
 0x197   : > { %v1355_v39 = vpop.f32.mrf.mxu2  ;;  %v1652_v40 = vpop.f32.mrf.mxu3 }
 0x198   : > { %v1508_v16 = vadd.f32 %v1355_v39, %v835_v49 }
 0x19a   : > { %v5306_v51 = vadd.f32 %v1652_v40, %v1508_v16  ;;  %v620_v19 = vpop.f32.mrf.mxu0  ;;  %v837_v59 = vpop.f32.mrf.mxu1 }
 0x19b   : > { %v838_v26 = vadd.f32 %v837_v59, %v620_v19 }
 0x19c   : > { %6278 = vst [vmem:[#allocation17_spill] sm:$0xff] %v5306_v51  ;;  %1397 = vmatmul.bf16.gmra.mxu2 %v5092_v62  ;;  %1694 = vmatmul.bf16.gmra.mxu3 %v5092_v62  ;;  %v5488_v51 = vadd.s32 256, %v4850_v36 }
 0x19d   : > { %659 = vmatmul.bf16.gmra.mxu0 %v5094_v63  ;;  %876 = vmatmul.bf16.gmra.mxu1 %v5094_v63 }
 0x19f   : > { %v1358_v58 = vpop.f32.mrf.mxu2  ;;  %v1655_v60 = vpop.f32.mrf.mxu3 }
 0x1a0   : > { %v1509_v37 = vadd.f32 %v1358_v58, %v838_v26 }
 0x1a2   : > { %v5316_v17 = vadd.f32 %v1655_v60, %v1509_v37  ;;  %v622_v33 = vpop.f32.mrf.mxu0  ;;  %v839_v38 = vpop.f32.mrf.mxu1 }
 0x1a3   : > { %v840_v18 = vadd.f32 %v839_v38, %v622_v33 }
 0x1a4   : > { %6279 = vst [vmem:[#allocation18_spill] sm:$0xff] %v5316_v17  ;;  %v5485_v17 = vadd.s32 256, %v4847_v35 }
 0x1a7   : > { %v1360_v21 = vpop.f32.mrf.mxu2  ;;  %v1657_v15 = vpop.f32.mrf.mxu3 }
 0x1a8   : > { %v1510_v27 = vadd.f32 %v1360_v21, %v840_v18  ;;  %v1261_v18 = vpop.trf.xlu0 }
 0x1aa   : > { %v5318_v28 = vadd.f32 %v1657_v15, %v1510_v27  ;;  %v625_v62 = vpop.f32.mrf.mxu0  ;;  %v842_v29 = vpop.f32.mrf.mxu1 }
 0x1ab   : > { %v843_v63 = vadd.f32 %v842_v29, %v625_v62  ;;  %v4380_v29 = vld [vmem:[#allocation5 + $0xd8] sm:$0xff] }
 0x1ac   : > { %6280 = vst [vmem:[#allocation19_spill] sm:$0xff] %v5318_v28  ;;  %1402 = vmatmul.bf16.gmra.mxu2 %v5120_v46  ;;  %1699 = vmatmul.bf16.gmra.mxu3 %v5120_v46 }
 0x1ad   : > { %664 = vmatmul.bf16.gmra.mxu0 %v5122_v48  ;;  %881 = vmatmul.bf16.gmra.mxu1 %v5122_v48 }
 0x1ae   : > { %3102 = vmatpush.bf16.msrb.mxu2 %v4380_v29 }
 0x1af   : > { %v1363_v34 = vpop.f32.mrf.mxu2  ;;  %v1660_v41 = vpop.f32.mrf.mxu3 }
 0x1b0   : > { %v1511_v22 = vadd.f32 %v1363_v34, %v843_v63  ;;  %v4364_v63 = vld [vmem:[#allocation5 + $0x98] sm:$0xff] }
 0x1b1   : > { %v4388_v34 = vld [vmem:[#allocation7 + $0xd8] sm:$0xff]  ;;  %2220 = vmatpush.bf16.msrb.mxu0 %v4364_v63 }
 0x1b2   : > { %v5324_v55 = vadd.f32 %v1660_v41, %v1511_v22  ;;  %v627_v49 = vpop.f32.mrf.mxu0  ;;  %v844_v39 = vpop.f32.mrf.mxu1  ;;  %3399 = vmatpush.bf16.msrb.mxu3 %v4388_v34 }
 0x1b3   : > { %v845_v40 = vadd.f32 %v844_v39, %v627_v49 }
 0x1b4   : > { %6281 = vst [vmem:[#allocation20_spill] sm:$0xff] %v5324_v55 }
 0x1b7   : > { %v1365_v16 = vpop.f32.mrf.mxu2  ;;  %v1662_v0 = vpop.f32.mrf.mxu3 }
 0x1b8   : > { %v1512_v11 = vadd.f32 %v1365_v16, %v845_v40  ;;  %v4372_v40 = vld [vmem:[#allocation7 + $0x98] sm:$0xff] }
 0x1b9   : > { %2517 = vmatpush.bf16.msrb.mxu1 %v4372_v40 }
 0x1ba   : > { %v5326_v23 = vadd.f32 %v1662_v0, %v1512_v11  ;;  %v630_v24 = vpop.f32.mrf.mxu0  ;;  %v847_v46 = vpop.f32.mrf.mxu1 }
 0x1bb   : > { %v848_v48 = vadd.f32 %v847_v46, %v630_v24 }
 0x1bc   : > { %6282 = vst [vmem:[#allocation21_spill] sm:$0xff] %v5326_v23  ;;  %1407 = vmatmul.bf16.gmra.mxu2 %v5148_v3  ;;  %1704 = vmatmul.bf16.gmra.mxu3 %v5148_v3  ;;  %v5444_v23 = vadd.s32 256, %v4790_v9 }
 0x1bd   : > { %669 = vmatmul.bf16.gmra.mxu0 %v5150_v4  ;;  %886 = vmatmul.bf16.gmra.mxu1 %v5150_v4 }
 0x1be   : > { %vm1892_vm14 = vcmp.eq.s32.totalorder %v5444_v23, %v4781_v6  ;;  %vm1893_vm15 = vcmp.eq.s32.totalorder %v5444_v23, %v4784_v7 }
 0x1bf   : > { %v1368_v12 = vpop.f32.mrf.mxu2  ;;  %v1665_v19 = vpop.f32.mrf.mxu3 }
 0x1c0   : > { %v1513_v59 = vadd.f32 %v1368_v12, %v848_v48 }
 0x1c1   : > { %v1270_v22 = vpop.trf.xlu2 }
 0x1c2   : > { %v5332_v57 = vadd.f32 %v1665_v19, %v1513_v59  ;;  %v632_v26 = vpop.f32.mrf.mxu0  ;;  %v849_v58 = vpop.f32.mrf.mxu1 }
 0x1c3   : > { %v850_v60 = vadd.f32 %v849_v58, %v632_v26  ;;  %v523_v19 = vpop.trf.xlu1 }
 0x1c4   : > { %6283 = vst [vmem:[#allocation22_spill] sm:$0xff] %v5332_v57  ;;  %v5441_v57 = vadd.s32 256, %v4787_v8 }
 0x1c6   : > { %vm1888_vm12 = vcmp.eq.s32.totalorder %v5441_v57, %v4781_v6  ;;  %vm1889_vm13 = vcmp.eq.s32.totalorder %v5441_v57, %v4784_v7 }
 0x1c7   : > { %v1370_v37 = vpop.f32.mrf.mxu2  ;;  %v1667_v33 = vpop.f32.mrf.mxu3 }
 0x1c8   : > { %v1514_v38 = vadd.f32 %v1370_v37, %v850_v60 }
 0x1c9   : > { %v5342_v46 = vpop.trf.xlu2 }
 0x1ca   : > { %v5334_v21 = vadd.f32 %v1667_v33, %v1514_v38  ;;  %v635_v3 = vpop.f32.mrf.mxu0  ;;  %v852_v15 = vpop.f32.mrf.mxu1 }
 0x1cb   : > { %v853_v4 = vadd.f32 %v852_v15, %v635_v3  ;;  %v532_v49 = vpop.trf.xlu0 }
 0x1cc   : > { %6284 = vst [vmem:[#allocation23_spill] sm:$0xff] %v5334_v21  ;;  %1412 = vmatmul.bf16.gmra.mxu2 %v5176_v20  ;;  %1709 = vmatmul.bf16.gmra.mxu3 %v5176_v20  ;;  %v5404_v21 = vadd.s32 256, %v4770_v2 }
 0x1cd   : > { %674 = vmatmul.bf16.gmra.mxu0 %v5178_v25  ;;  %891 = vmatmul.bf16.gmra.mxu1 %v5178_v25 }
 0x1ce   : > { %vm1884_vm6 = vcmp.eq.s32.totalorder %v5404_v21, %v4781_v6  ;;  %vm1885_vm7 = vcmp.eq.s32.totalorder %v5404_v21, %v4784_v7 }
 0x1cf   : > { %v1373_v27 = vpop.f32.mrf.mxu2  ;;  %v1670_v62 = vpop.f32.mrf.mxu3 }
 0x1d0   : > { %v1515_v41 = vadd.f32 %v1373_v27, %v853_v4 }
 0x1d1   : > { %v1272_v38 = vpop.trf.xlu2 }
 0x1d2   : > { %v5340_v39 = vadd.f32 %v1670_v62, %v1515_v41  ;;  %v637_v20 = vpop.f32.mrf.mxu0  ;;  %v854_v16 = vpop.f32.mrf.mxu1 }
 0x1d3   : > { %v855_v0 = vadd.f32 %v854_v16, %v637_v20  ;;  %v5344_v48 = vpop.trf.xlu0 }
 0x1d4   : > { %6285 = vst [vmem:[#allocation24_spill] sm:$0xff] %v5340_v39  ;;  %v5401_v39 = vadd.s32 256, %v4767_v1 }
 0x1d6   : > { %vm1880_vm4 = vcmp.eq.s32.totalorder %v5401_v39, %v4781_v6  ;;  %vm1881_vm5 = vcmp.eq.s32.totalorder %v5401_v39, %v4784_v7 }
 0x1d7   : > { %v1375_v11 = vpop.f32.mrf.mxu2  ;;  %v1672_v25 = vpop.f32.mrf.mxu3 }
 0x1d8   : > { %v1516_v24 = vadd.f32 %v1375_v11, %v855_v0 }
 0x1d9   : > { %v5350_v41 = vpop.trf.xlu2 }
 0x1da   : > { %v5346_v12 = vadd.f32 %v1672_v25, %v1516_v24  ;;  %v640_v59 = vpop.f32.mrf.mxu0  ;;  %v857_v26 = vpop.f32.mrf.mxu1 }
 0x1db   : > { %v858_v58 = vadd.f32 %v857_v26, %v640_v59  ;;  %v534_v3 = vpop.trf.xlu0 }
 0x1dc   : > { %6286 = vst [vmem:[#allocation25_spill] sm:$0xff] %v5346_v12  ;;  %1417 = vmatmul.bf16.gmra.mxu2 %v1261_v18  ;;  %1714 = vmatmul.bf16.gmra.mxu3 %v1261_v18 }
 0x1dd   : > { %679 = vmatmul.bf16.gmra.mxu0 %v523_v19  ;;  %896 = vmatmul.bf16.gmra.mxu1 %v523_v19 }
 0x1df   : > { %v1378_v60 = vpop.f32.mrf.mxu2  ;;  %v1675_v37 = vpop.f32.mrf.mxu3 }
 0x1e0   : > { %v1517_v33 = vadd.f32 %v1378_v60, %v858_v58 }
 0x1e1   : > { %v1274_v19 = vpop.trf.xlu2 }
 0x1e2   : > { %v5348_v15 = vadd.f32 %v1675_v37, %v1517_v33  ;;  %v642_v4 = vpop.f32.mrf.mxu0  ;;  %v859_v27 = vpop.f32.mrf.mxu1 }
 0x1e3   : > { %v860_v62 = vadd.f32 %v859_v27, %v642_v4  ;;  %v5352_v40 = vpop.trf.xlu0 }
 0x1e4   : > { %6287 = vst [vmem:[#allocation26_spill] sm:$0xff] %v5348_v15 }
 0x1e7   : > { %v1380_v29 = vpop.f32.mrf.mxu2  ;;  %v1677_v63 = vpop.f32.mrf.mxu3 }
 0x1e8   : > { %v1518_v34 = vadd.f32 %v1380_v29, %v860_v62 }
 0x1e9   : > { %v5358_v62 = vpop.trf.xlu2 }
 0x1ea   : > { %v5354_v18 = vadd.f32 %v1677_v63, %v1518_v34  ;;  %v645_v20 = vpop.f32.mrf.mxu0  ;;  %v862_v16 = vpop.f32.mrf.mxu1 }
 0x1eb   : > { %v863_v0 = vadd.f32 %v862_v16, %v645_v20  ;;  %v536_v59 = vpop.trf.xlu0 }
 0x1ec   : > { %6288 = vst [vmem:[#allocation27_spill] sm:$0xff] %v5354_v18  ;;  %1422 = vmatmul.bf16.gmra.mxu2 %v1270_v22  ;;  %1719 = vmatmul.bf16.gmra.mxu3 %v1270_v22 }
 0x1ed   : > { %684 = vmatmul.bf16.gmra.mxu0 %v532_v49  ;;  %901 = vmatmul.bf16.gmra.mxu1 %v532_v49 }
 0x1ef   : > { %v1383_v11 = vpop.f32.mrf.mxu2  ;;  %v1680_v25 = vpop.f32.mrf.mxu3 }
 0x1f0   : > { %v1519_v24 = vadd.f32 %v1383_v11, %v863_v0 }
 0x1f2   : > { %v5356_v26 = vadd.f32 %v1680_v25, %v1519_v24  ;;  %v647_v58 = vpop.f32.mrf.mxu0  ;;  %v864_v60 = vpop.f32.mrf.mxu1 }
 0x1f3   : > { %v865_v37 = vadd.f32 %v864_v60, %v647_v58  ;;  %v5362_v22 = vpop.trf.xlu0  ;;  %v1276_v25 = vpop.trf.xlu2 }
 0x1f4   : > { %6289 = vst [vmem:[#allocation28_spill] sm:$0xff] %v5356_v26 }
 0x1f7   : > { %v1385_v33 = vpop.f32.mrf.mxu2  ;;  %v1682_v4 = vpop.f32.mrf.mxu3 }
 0x1f8   : > { %v1520_v27 = vadd.f32 %v1385_v33, %v865_v37 }
 0x1fa   : > { %v5360_v29 = vadd.f32 %v1682_v4, %v1520_v27  ;;  %v650_v49 = vpop.f32.mrf.mxu0  ;;  %v867_v63 = vpop.f32.mrf.mxu1 }
 0x1fb   : > { %v868_v34 = vadd.f32 %v867_v63, %v650_v49  ;;  %v538_v37 = vpop.trf.xlu0  ;;  %v5368_v49 = vpop.trf.xlu2 }
 0x1fc   : > { %6290 = vst [vmem:[#allocation29_spill] sm:$0xff] %v5360_v29  ;;  %1427 = vmatmul.bf16.gmra.mxu2 %v1272_v38  ;;  %1724 = vmatmul.bf16.gmra.mxu3 %v1272_v38 }
 0x1fd   : > { %689 = vmatmul.bf16.gmra.mxu0 %v534_v3  ;;  %906 = vmatmul.bf16.gmra.mxu1 %v534_v3 }
 0x1ff   : > { %v1388_v20 = vpop.f32.mrf.mxu2  ;;  %v1685_v16 = vpop.f32.mrf.mxu3 }
 0x200   : > { %v1521_v0 = vadd.f32 %v1388_v20, %v868_v34  ;;  %v4379_v20 = vld [vmem:[#allocation5 + $0xd0] sm:$0xff] }
 0x201   : > { %3103 = vmatpush.bf16.msrb.mxu2 %v4379_v20  ;;  %v5380_v20 = vadd.s32 384, %v4770_v2 }
 0x202   : > { %v5364_v11 = vadd.f32 %v1685_v16, %v1521_v0  ;;  %v652_v24 = vpop.f32.mrf.mxu0  ;;  %v869_v58 = vpop.f32.mrf.mxu1  ;;  %v4363_v16 = vld [vmem:[#allocation5 + $0x90] sm:$0xff] }
 0x203   : > { %v870_v60 = vadd.f32 %v869_v58, %v652_v24  ;;  %v4387_v0 = vld [vmem:[#allocation7 + $0xd0] sm:$0xff]  ;;  %v5370_v58 = vpop.trf.xlu0  ;;  %2221 = vmatpush.bf16.msrb.mxu0 %v4363_v16  ;;  %vm2766_vm2 = vcmp.eq.s32.totalorder %v5380_v20, %v4781_v6  ;;  %vm2767_vm3 = vcmp.eq.s32.totalorder %v5380_v20, %v4784_v7 }
 0x204   : > { %6291 = vst [vmem:[#allocation30_spill] sm:$0xff] %v5364_v11  ;;  %3400 = vmatpush.bf16.msrb.mxu3 %v4387_v0 }
 0x207   : > { %v1390_v33 = vpop.f32.mrf.mxu2  ;;  %v1687_v4 = vpop.f32.mrf.mxu3 }
 0x208   : > { %v1522_v27 = vadd.f32 %v1390_v33, %v870_v60  ;;  %v4371_v33 = vld [vmem:[#allocation7 + $0x90] sm:$0xff] }
 0x209   : > { %2518 = vmatpush.bf16.msrb.mxu1 %v4371_v33 }
 0x20a   : > { %v5366_v10 = vadd.f32 %v1687_v4, %v1522_v27  ;;  %v655_v29 = vpop.f32.mrf.mxu0  ;;  %v872_v38 = vpop.f32.mrf.mxu1 }
 0x20b   : > { %v873_v3 = vadd.f32 %v872_v38, %v655_v29  ;;  %v540_v26 = vpop.trf.xlu0 }
 0x20c   : > { %6292 = vst [vmem:[#allocation31_spill] sm:$0xff] %v5366_v10  ;;  %1432 = vmatmul.bf16.gmra.mxu2 %v1274_v19  ;;  %1729 = vmatmul.bf16.gmra.mxu3 %v1274_v19  ;;  %v1278_v10 = vpop.trf.xlu2 }
 0x20d   : > { %694 = vmatmul.bf16.gmra.mxu0 %v536_v59  ;;  %911 = vmatmul.bf16.gmra.mxu1 %v536_v59 }
 0x20f   : > { %v1393_v63 = vpop.f32.mrf.mxu2  ;;  %v1690_v34 = vpop.f32.mrf.mxu3 }
 0x210   : > { %v1523_v24 = vadd.f32 %v1393_v63, %v873_v3 }
 0x212   : > { %v5372_v60 = vadd.f32 %v1690_v34, %v1523_v24  ;;  %v657_v19 = vpop.f32.mrf.mxu0  ;;  %v874_v29 = vpop.f32.mrf.mxu1  ;;  %v5377_v34 = vadd.s32 384, %v4767_v1  ;;  %v6295_v24 = vmov 0.0  }
 0x213   : > { %v875_v4 = vadd.f32 %v874_v29, %v657_v19  ;;  %v4200_v29 = vsel %vm2766_vm2, 1.0, %v6295_v24  ;;  %v5398_v18 = vpop.trf.xlu0  ;;  %v4068_v1 = vsel %vm1880_vm4, 1.0, %v6295_v24  ;;  %v4069_v2 = vsel %vm1881_vm5, 1.0, %v6295_v24 }
 0x214   : > { %6293 = vst [vmem:[#allocation32_spill] sm:$0xff] %v5372_v60  ;;  %vm2762_vm0 = vcmp.eq.s32.totalorder %v5377_v34, %v4781_v6  ;;  %vm2763_vm1 = vcmp.eq.s32.totalorder %v5377_v34, %v4784_v7  ;;  %vm1896_vm4 = vcmp.eq.s32.totalorder %v5485_v17, %v4781_v6  ;;  %vm1897_vm5 = vcmp.eq.s32.totalorder %v5485_v17, %v4784_v7 }
 0x215   : > { %v4196_v33 = vsel %vm2762_vm0, 1.0, %v6295_v24  ;;  %v4197_v19 = vsel %vm2763_vm1, 1.0, %v6295_v24 }
 0x217   : > { %v1395_v27 = vpop.f32.mrf.mxu2  ;;  %v1692_v59 = vpop.f32.mrf.mxu3 }
 0x218   : > { %v1524_v38 = vadd.f32 %v1395_v27, %v875_v4  ;;  %v4201_v4 = vsel %vm2767_vm3, 1.0, %v6295_v24 }
 0x21a   : > { %v5374_v11 = vadd.f32 %v1692_v59, %v1524_v38  ;;  %v660_v3 = vpop.f32.mrf.mxu0  ;;  %v877_v63 = vpop.f32.mrf.mxu1  ;;  %v2954_v59 = vpack.c.bf16 %v4200_v29, %v4196_v33  ;;  %v2955_v38 = vpack.c.bf16 %v4201_v4, %v4197_v19  ;;  %v5421_v29 = vadd.s32 384, %v4787_v8 }
 0x21b   : > { %v878_v16 = vadd.f32 %v877_v63, %v660_v3  ;;  %v5396_v63 = vpop.trf.xlu2 }
 0x21c   : > { %6294 = vst [vmem:[#allocation33_spill] sm:$0xff] %v5374_v11  ;;  %1437 = vmatmul.bf16.gmra.mxu2 %v1276_v25  ;;  %1734 = vmatmul.bf16.gmra.mxu3 %v1276_v25  ;;  %vm2770_vm8 = vcmp.eq.s32.totalorder %v5421_v29, %v4781_v6  ;;  %vm2771_vm9 = vcmp.eq.s32.totalorder %v5421_v29, %v4784_v7 }
 0x21d   : > { %699 = vmatmul.bf16.gmra.mxu0 %v538_v37  ;;  %916 = vmatmul.bf16.gmra.mxu1 %v538_v37 }
 0x21e   : > { %3002 = vxpose.binary.xlu1.c.b16.start [1/16] %v2955_v38, %v2954_v59, 128  ;;  %v4204_v38 = vsel %vm2770_vm8, 1.0, %v6295_v24 }
 0x21f   : > { %v1398_v25 = vpop.f32.mrf.mxu2  ;;  %v1695_v0 = vpop.f32.mrf.mxu3 }
 0x220   : > { %v1525_v27 = vadd.f32 %v1398_v25, %v878_v16 }
 0x222   : > { %v5394_v3 = vadd.f32 %v1695_v0, %v1525_v27  ;;  %v662_v11 = vpop.f32.mrf.mxu0  ;;  %v879_v37 = vpop.f32.mrf.mxu1 }
 0x223   : > { %v880_v60 = vadd.f32 %v879_v37, %v662_v11  ;;  %v1280_v27 = vpop.trf.xlu2  ;;  %v4205_v37 = vsel %vm2771_vm9, 1.0, %v6295_v24 }
 0x224   : > { %6296 = vst [vmem:[#allocation34_spill] sm:$0xff] %v5394_v3 }
 0x227   : > { %v1400_v15 = vpop.f32.mrf.mxu2  ;;  %v1697_v12 = vpop.f32.mrf.mxu3 }
 0x228   : > { %v1526_v16 = vadd.f32 %v1400_v15, %v880_v60  ;;  %v4072_v15 = vsel %vm1884_vm6, 1.0, %v6295_v24  ;;  %v4073_v60 = vsel %vm1885_vm7, 1.0, %v6295_v24  ;;  %vm1900_vm6 = vcmp.eq.s32.totalorder %v5488_v51, %v4781_v6 }
 0x229   : > { %v2072_v25 = vpack.c.bf16 %v4072_v15, %v4068_v1  ;;  %v2073_v19 = vpack.c.bf16 %v4073_v60, %v4069_v2  ;;  %v542_v60 = vpop.trf.xlu0  ;;  %vm1901_vm7 = vcmp.eq.s32.totalorder %v5488_v51, %v4784_v7 }
 0x22a   : > { %v5414_v11 = vadd.f32 %v1697_v12, %v1526_v16  ;;  %v665_v0 = vpop.f32.mrf.mxu0  ;;  %v882_v33 = vpop.f32.mrf.mxu1  ;;  %v5424_v12 = vadd.s32 384, %v4790_v9  ;;  %v4076_v9 = vsel %vm1888_vm12, 1.0, %v6295_v24 }
 0x22b   : > { %v883_v4 = vadd.f32 %v882_v33, %v665_v0  ;;  %2120 = vxpose.binary.xlu2.c.b16.start [1/16] %v2073_v19, %v2072_v25, 128 }
 0x22c   : > { %6297 = vst [vmem:[#allocation35_spill] sm:$0xff] %v5414_v11  ;;  %1442 = vmatmul.bf16.gmra.mxu2 %v1278_v10  ;;  %1739 = vmatmul.bf16.gmra.mxu3 %v1278_v10  ;;  %vm2774_vm10 = vcmp.eq.s32.totalorder %v5424_v12, %v4781_v6  ;;  %vm2775_vm11 = vcmp.eq.s32.totalorder %v5424_v12, %v4784_v7 }
 0x22d   : > { %704 = vmatmul.bf16.gmra.mxu0 %v540_v26  ;;  %921 = vmatmul.bf16.gmra.mxu1 %v540_v26  ;;  %v4208_v16 = vsel %vm2774_vm10, 1.0, %v6295_v24  ;;  %v4209_v2 = vsel %vm2775_vm11, 1.0, %v6295_v24 }
 0x22e   : > { %v2958_v15 = vpack.c.bf16 %v4208_v16, %v4204_v38  ;;  %v2959_v25 = vpack.c.bf16 %v4209_v2, %v4205_v37  ;;  %v4081_v37 = vsel %vm1893_vm15, 1.0, %v6295_v24 }
 0x22f   : > { %v1403_v10 = vpop.f32.mrf.mxu2  ;;  %v1700_v59 = vpop.f32.mrf.mxu3 }
 0x230   : > { %v1527_v1 = vadd.f32 %v1403_v10, %v883_v4  ;;  %3003 = vxpose.binary.xlu1.c.b16.cont [2/16] %v2959_v25, %v2958_v15, 128  ;;  %v5446_v10 = vpop.trf.xlu2  ;;  %v5465_v25 = vadd.s32 384, %v4847_v35  ;;  %v4084_v35 = vsel %vm1896_vm4, 1.0, %v6295_v24 }
 0x231   : > { %v5461_v38 = vpop.trf.xlu0 }
 0x232   : > { %v5438_v0 = vadd.f32 %v1700_v59, %v1527_v1  ;;  %v667_v26 = vpop.f32.mrf.mxu0  ;;  %v884_v33 = vpop.f32.mrf.mxu1  ;;  %v4080_v59 = vsel %vm1892_vm14, 1.0, %v6295_v24  ;;  %vm2778_vm0 = vcmp.eq.s32.totalorder %v5465_v25, %v4781_v6  ;;  %vm2779_vm1 = vcmp.eq.s32.totalorder %v5465_v25, %v4784_v7 }
 0x233   : > { %v885_v19 = vadd.f32 %v884_v33, %v667_v26  ;;  %v2076_v16 = vpack.c.bf16 %v4080_v59, %v4076_v9 }
 0x234   : > { %6298 = vst [vmem:[#allocation36_spill] sm:$0xff] %v5438_v0 }
 0x237   : > { %v1405_v11 = vpop.f32.mrf.mxu2  ;;  %v1702_v3 = vpop.f32.mrf.mxu3 }
 0x238   : > { %v1528_v4 = vadd.f32 %v1405_v11, %v885_v19  ;;  %v4077_v11 = vsel %vm1889_vm13, 1.0, %v6295_v24  ;;  %v4212_v19 = vsel %vm2778_vm0, 1.0, %v6295_v24 }
 0x239   : > { %v2077_v15 = vpack.c.bf16 %v4081_v37, %v4077_v11  ;;  %v544_v0 = vpop.trf.xlu0 }
 0x23a   : > { %v5456_v8 = vadd.f32 %v1702_v3, %v1528_v4  ;;  %v670_v1 = vpop.f32.mrf.mxu0  ;;  %v887_v2 = vpop.f32.mrf.mxu1  ;;  %v5468_v3 = vadd.s32 384, %v4850_v36  ;;  %v4213_v4 = vsel %vm2779_vm1, 1.0, %v6295_v24  ;;  %v4085_v36 = vsel %vm1897_vm5, 1.0, %v6295_v24 }
 0x23b   : > { %v888_v26 = vadd.f32 %v887_v2, %v670_v1  ;;  %2121 = vxpose.binary.xlu2.c.b16.cont [2/16] %v2077_v15, %v2076_v16, 128  ;;  %v1282_v2 = vpop.trf.xlu2 }
 0x23c   : > { %6299 = vst [vmem:[#allocation37_spill] sm:$0xff] %v5456_v8  ;;  %1447 = vmatmul.bf16.gmra.mxu2 %v1280_v27  ;;  %1744 = vmatmul.bf16.gmra.mxu3 %v1280_v27  ;;  %vm2782_vm2 = vcmp.eq.s32.totalorder %v5468_v3, %v4781_v6  ;;  %vm2783_vm3 = vcmp.eq.s32.totalorder %v5468_v3, %v4784_v7 }
 0x23d   : > { %709 = vmatmul.bf16.gmra.mxu0 %v542_v60  ;;  %926 = vmatmul.bf16.gmra.mxu1 %v542_v60  ;;  %v4216_v9 = vsel %vm2782_vm2, 1.0, %v6295_v24  ;;  %v4217_v59 = vsel %vm2783_vm3, 1.0, %v6295_v24 }
 0x23e   : > { %v2962_v37 = vpack.c.bf16 %v4216_v9, %v4212_v19  ;;  %v2963_v16 = vpack.c.bf16 %v4217_v59, %v4213_v4 }
 0x23f   : > { %v1408_v27 = vpop.f32.mrf.mxu2  ;;  %v1705_v33 = vpop.f32.mrf.mxu3 }
 0x240   : > { %v1529_v11 = vadd.f32 %v1408_v27, %v888_v26  ;;  %3004 = vxpose.binary.xlu1.c.b16.cont [3/16] %v2963_v16, %v2962_v37, 128 }
 0x242   : > { %v5482_v1 = vadd.f32 %v1705_v33, %v1529_v11  ;;  %v672_v60 = vpop.f32.mrf.mxu0  ;;  %v889_v15 = vpop.f32.mrf.mxu1  ;;  %v5505_v11 = vadd.s32 384, %v4879_v47 }
 0x243   : > { %v890_v8 = vadd.f32 %v889_v15, %v672_v60  ;;  %v5510_v37 = vpop.trf.xlu2  ;;  %v4378_v60 = vld [vmem:[#allocation5 + $0xc8] sm:$0xff] }
 0x244   : > { %6300 = vst [vmem:[#allocation38_spill] sm:$0xff] %v5482_v1  ;;  %vm2786_vm8 = vcmp.eq.s32.totalorder %v5505_v11, %v4781_v6  ;;  %vm2787_vm9 = vcmp.eq.s32.totalorder %v5505_v11, %v4784_v7  ;;  %v4362_v15 = vld [vmem:[#allocation5 + $0x88] sm:$0xff]  ;;  %3104 = vmatpush.bf16.msrb.mxu2 %v4378_v60 }
 0x245   : > { %2222 = vmatpush.bf16.msrb.mxu0 %v4362_v15 }
 0x247   : > { %v1410_v55 = vpop.f32.mrf.mxu2  ;;  %v1707_v28 = vpop.f32.mrf.mxu3 }
 0x248   : > { %v1530_v26 = vadd.f32 %v1410_v55, %v890_v8  ;;  %v4088_v55 = vsel %vm1900_vm6, 1.0, %v6295_v24  ;;  %v4089_v8 = vsel %vm1901_vm7, 1.0, %v6295_v24 }
 0x249   : > { %v2080_v33 = vpack.c.bf16 %v4088_v55, %v4084_v35  ;;  %v2081_v9 = vpack.c.bf16 %v4089_v8, %v4085_v36  ;;  %v4220_v35 = vsel %vm2786_vm8, 1.0, %v6295_v24  ;;  %v4221_v36 = vsel %vm2787_vm9, 1.0, %v6295_v24 }
 0x24a   : > { %v5498_v27 = vadd.f32 %v1707_v28, %v1530_v26  ;;  %v675_v19 = vpop.f32.mrf.mxu0  ;;  %v892_v4 = vpop.f32.mrf.mxu1  ;;  %v5508_v28 = vadd.s32 384, %v4886_v52  ;;  %v4386_v26 = vld [vmem:[#allocation7 + $0xc8] sm:$0xff] }
 0x24b   : > { %v893_v59 = vadd.f32 %v892_v4, %v675_v19  ;;  %2122 = vxpose.binary.xlu2.c.b16.cont [3/16] %v2081_v9, %v2080_v33, 128  ;;  %v5524_v4 = vpop.trf.xlu0  ;;  %v1284_v15 = vpop.trf.xlu2 }
 0x24c   : > { %6301 = vst [vmem:[#allocation39_spill] sm:$0xff] %v5498_v27  ;;  %1452 = vmatmul.bf16.gmra.mxu2 %v1282_v2  ;;  %1749 = vmatmul.bf16.gmra.mxu3 %v1282_v2  ;;  %vm2790_vm10 = vcmp.eq.s32.totalorder %v5508_v28, %v4781_v6  ;;  %vm2791_vm11 = vcmp.eq.s32.totalorder %v5508_v28, %v4784_v7  ;;  %v4370_v27 = vld [vmem:[#allocation7 + $0x88] sm:$0xff] }
 0x24d   : > { %714 = vmatmul.bf16.gmra.mxu0 %v544_v0  ;;  %931 = vmatmul.bf16.gmra.mxu1 %v544_v0  ;;  %v4224_v55 = vsel %vm2790_vm10, 1.0, %v6295_v24  ;;  %v4225_v33 = vsel %vm2791_vm11, 1.0, %v6295_v24 }
 0x24e   : > { %v2966_v19 = vpack.c.bf16 %v4224_v55, %v4220_v35  ;;  %v2967_v0 = vpack.c.bf16 %v4225_v33, %v4221_v36  ;;  %3401 = vmatpush.bf16.msrb.mxu3 %v4386_v26  ;;  %2519 = vmatpush.bf16.msrb.mxu1 %v4370_v27  ;;  %v5549_v36 = vadd.s32 384, %v4919_v13 }
 0x24f   : > { %v1413_v16 = vpop.f32.mrf.mxu2  ;;  %v1710_v2 = vpop.f32.mrf.mxu3 }
 0x250   : > { %v1531_v8 = vadd.f32 %v1413_v16, %v893_v59  ;;  %3005 = vxpose.binary.xlu1.c.b16.cont [4/16] %v2967_v0, %v2966_v19, 128  ;;  %v5529_v59 = vadd.s32 256, %v4879_v47  ;;  %v5532_v16 = vadd.s32 256, %v4886_v52  ;;  %vm2794_vm0 = vcmp.eq.s32.totalorder %v5549_v36, %v4781_v6 }
 0x251   : > { %vm2795_vm1 = vcmp.eq.s32.totalorder %v5549_v36, %v4784_v7  ;;  %v4228_v19 = vsel %vm2794_vm0, 1.0, %v6295_v24 }
 0x252   : > { %v5526_v9 = vadd.f32 %v1710_v2, %v1531_v8  ;;  %v677_v1 = vpop.f32.mrf.mxu0  ;;  %v894_v30 = vpop.f32.mrf.mxu1  ;;  %vm1904_vm12 = vcmp.eq.s32.totalorder %v5529_v59, %v4781_v6  ;;  %vm1905_vm13 = vcmp.eq.s32.totalorder %v5529_v59, %v4784_v7  ;;  %vm1908_vm14 = vcmp.eq.s32.totalorder %v5532_v16, %v4781_v6 }
 0x253   : > { %v895_v50 = vadd.f32 %v894_v30, %v677_v1  ;;  %vm1909_vm15 = vcmp.eq.s32.totalorder %v5532_v16, %v4784_v7  ;;  %v4092_v47 = vsel %vm1904_vm12, 1.0, %v6295_v24  ;;  %v4093_v52 = vsel %vm1905_vm13, 1.0, %v6295_v24 }
 0x254   : > { %6302 = vst [vmem:[#allocation40_spill] sm:$0xff] %v5526_v9  ;;  %v4097_v1 = vsel %vm1909_vm15, 1.0, %v6295_v24  ;;  %v4229_v0 = vsel %vm2795_vm1, 1.0, %v6295_v24  ;;  %v5572_v9 = vadd.s32 256, %v4922_v14 }
 0x255   : > { %v2085_v35 = vpack.c.bf16 %v4097_v1, %v4093_v52 }
 0x256   : > { %vm1916_vm6 = vcmp.eq.s32.totalorder %v5572_v9, %v4781_v6  ;;  %vm1917_vm7 = vcmp.eq.s32.totalorder %v5572_v9, %v4784_v7 }
 0x257   : > { %v1415_v5 = vpop.f32.mrf.mxu2  ;;  %v1712_v61 = vpop.f32.mrf.mxu3 }
 0x258   : > { %v1532_v60 = vadd.f32 %v1415_v5, %v895_v50  ;;  %v4096_v5 = vsel %vm1908_vm14, 1.0, %v6295_v24  ;;  %v546_v50 = vpop.trf.xlu0 }
 0x259   : > { %v2084_v27 = vpack.c.bf16 %v4096_v5, %v4092_v47 }
 0x25a   : > { %v5542_v30 = vadd.f32 %v1712_v61, %v1532_v60  ;;  %v680_v2 = vpop.f32.mrf.mxu0  ;;  %v897_v26 = vpop.f32.mrf.mxu1  ;;  %v5552_v61 = vadd.s32 384, %v4922_v14 }
 0x25b   : > { %v898_v55 = vadd.f32 %v897_v26, %v680_v2  ;;  %2123 = vxpose.binary.xlu2.c.b16.cont [4/16] %v2085_v35, %v2084_v27, 128 }
 0x25c   : > { %6303 = vst [vmem:[#allocation41_spill] sm:$0xff] %v5542_v30  ;;  %1457 = vmatmul.bf16.gmra.mxu2 %v1284_v15  ;;  %1754 = vmatmul.bf16.gmra.mxu3 %v1284_v15  ;;  %vm2798_vm2 = vcmp.eq.s32.totalorder %v5552_v61, %v4781_v6  ;;  %vm2799_vm3 = vcmp.eq.s32.totalorder %v5552_v61, %v4784_v7  ;;  %v5569_v30 = vadd.s32 256, %v4919_v13 }
 0x25d   : > { %719 = vmatmul.bf16.gmra.mxu0 %v546_v50  ;;  %936 = vmatmul.bf16.gmra.mxu1 %v546_v50  ;;  %v4232_v60 = vsel %vm2798_vm2, 1.0, %v6295_v24  ;;  %v4233_v47 = vsel %vm2799_vm3, 1.0, %v6295_v24 }
 0x25e   : > { %v2970_v52 = vpack.c.bf16 %v4232_v60, %v4228_v19  ;;  %v2971_v5 = vpack.c.bf16 %v4233_v47, %v4229_v0  ;;  %vm1912_vm4 = vcmp.eq.s32.totalorder %v5569_v30, %v4781_v6  ;;  %vm1913_vm5 = vcmp.eq.s32.totalorder %v5569_v30, %v4784_v7 }
 0x25f   : > { %v1418_v8 = vpop.f32.mrf.mxu2  ;;  %v1715_v33 = vpop.f32.mrf.mxu3  ;;  %v4100_v13 = vsel %vm1912_vm4, 1.0, %v6295_v24  ;;  %v4101_v14 = vsel %vm1913_vm5, 1.0, %v6295_v24  ;;  %v5591_v47 = vadd.s32 384, %v4955_v31 }
 0x260   : > { %v1533_v15 = vadd.f32 %v1418_v8, %v898_v55  ;;  %3006 = vxpose.binary.xlu1.c.b16.cont [5/16] %v2971_v5, %v2970_v52, 128  ;;  %v4104_v8 = vsel %vm1916_vm6, 1.0, %v6295_v24 }
 0x261   : > { %v2088_v19 = vpack.c.bf16 %v4104_v8, %v4100_v13  ;;  %vm2802_vm8 = vcmp.eq.s32.totalorder %v5591_v47, %v4781_v6  ;;  %vm2803_vm9 = vcmp.eq.s32.totalorder %v5591_v47, %v4784_v7 }
 0x262   : > { %v5566_v1 = vadd.f32 %v1715_v33, %v1533_v15  ;;  %v682_v50 = vpop.f32.mrf.mxu0  ;;  %v899_v27 = vpop.f32.mrf.mxu1  ;;  %v4105_v33 = vsel %vm1917_vm7, 1.0, %v6295_v24 }
 0x263   : > { %v900_v2 = vadd.f32 %v899_v27, %v682_v50  ;;  %v2089_v15 = vpack.c.bf16 %v4105_v33, %v4101_v14  ;;  %v4236_v50 = vsel %vm2802_vm8, 1.0, %v6295_v24  ;;  %v4237_v27 = vsel %vm2803_vm9, 1.0, %v6295_v24 }
 0x264   : > { %6304 = vst [vmem:[#allocation42_spill] sm:$0xff] %v5566_v1 }
 0x267   : > { %v1420_v26 = vpop.f32.mrf.mxu2  ;;  %v1717_v35 = vpop.f32.mrf.mxu3 }
 0x268   : > { %v1534_v56 = vadd.f32 %v1420_v26, %v900_v2 }
 0x26a   : > { %v5582_v55 = vadd.f32 %v1717_v35, %v1534_v56  ;;  %v685_v0 = vpop.f32.mrf.mxu0  ;;  %v902_v60 = vpop.f32.mrf.mxu1  ;;  %v5594_v56 = vadd.s32 384, %v4958_v32 }
 0x26b   : > { %v903_v52 = vadd.f32 %v902_v60, %v685_v0  ;;  %2124 = vxpose.binary.xlu2.c.b16.cont [5/16] %v2089_v15, %v2088_v19, 128  ;;  %v5613_v15 = vadd.s32 256, %v4955_v31 }
 0x26c   : > { %6305 = vst [vmem:[#allocation43_spill] sm:$0xff] %v5582_v55  ;;  %1462 = vmatmul.bf16.gmra.mxu2 %v5342_v46  ;;  %1759 = vmatmul.bf16.gmra.mxu3 %v5342_v46  ;;  %vm2806_vm10 = vcmp.eq.s32.totalorder %v5594_v56, %v4781_v6  ;;  %vm2807_vm11 = vcmp.eq.s32.totalorder %v5594_v56, %v4784_v7  ;;  %v5616_v55 = vadd.s32 256, %v4958_v32 }
 0x26d   : > { %724 = vmatmul.bf16.gmra.mxu0 %v5344_v48  ;;  %941 = vmatmul.bf16.gmra.mxu1 %v5344_v48  ;;  %v4240_v2 = vsel %vm2806_vm10, 1.0, %v6295_v24  ;;  %v4241_v35 = vsel %vm2807_vm11, 1.0, %v6295_v24  ;;  %vm1920_vm12 = vcmp.eq.s32.totalorder %v5613_v15, %v4781_v6  ;;  %vm1921_vm13 = vcmp.eq.s32.totalorder %v5613_v15, %v4784_v7 }
 0x26e   : > { %v2974_v13 = vpack.c.bf16 %v4240_v2, %v4236_v50  ;;  %v2975_v14 = vpack.c.bf16 %v4241_v35, %v4237_v27  ;;  %vm1924_vm14 = vcmp.eq.s32.totalorder %v5616_v55, %v4781_v6  ;;  %vm1925_vm15 = vcmp.eq.s32.totalorder %v5616_v55, %v4784_v7 }
 0x26f   : > { %v1423_v46 = vpop.f32.mrf.mxu2  ;;  %v1720_v5 = vpop.f32.mrf.mxu3  ;;  %v4108_v31 = vsel %vm1920_vm12, 1.0, %v6295_v24  ;;  %v4109_v32 = vsel %vm1921_vm13, 1.0, %v6295_v24  ;;  %v5635_v35 = vadd.s32 384, %v4991_v53 }
 0x270   : > { %v1535_v26 = vadd.f32 %v1423_v46, %v903_v52  ;;  %3007 = vxpose.binary.xlu1.c.b16.cont [6/16] %v2975_v14, %v2974_v13, 128  ;;  %v4112_v46 = vsel %vm1924_vm14, 1.0, %v6295_v24 }
 0x271   : > { %v2092_v50 = vpack.c.bf16 %v4112_v46, %v4108_v31  ;;  %vm2810_vm0 = vcmp.eq.s32.totalorder %v5635_v35, %v4781_v6  ;;  %vm2811_vm1 = vcmp.eq.s32.totalorder %v5635_v35, %v4784_v7 }
 0x272   : > { %v5610_v8 = vadd.f32 %v1720_v5, %v1535_v26  ;;  %v687_v48 = vpop.f32.mrf.mxu0  ;;  %v904_v33 = vpop.f32.mrf.mxu1  ;;  %v4113_v5 = vsel %vm1925_vm15, 1.0, %v6295_v24 }
 0x273   : > { %v905_v19 = vadd.f32 %v904_v33, %v687_v48  ;;  %v2093_v26 = vpack.c.bf16 %v4113_v5, %v4109_v32  ;;  %v4244_v48 = vsel %vm2810_vm0, 1.0, %v6295_v24  ;;  %v4245_v33 = vsel %vm2811_vm1, 1.0, %v6295_v24 }
 0x274   : > { %6306 = vst [vmem:[#allocation44_spill] sm:$0xff] %v5610_v8  ;;  %vm2764_vm0 = vcmp.eq.s32.totalorder %v5377_v34, %v5075_v42  ;;  %vm2765_vm1 = vcmp.eq.s32.totalorder %v5377_v34, %v5078_v45 }
 0x277   : > { %v1425_v0 = vpop.f32.mrf.mxu2  ;;  %v1722_v60 = vpop.f32.mrf.mxu3 }
 0x278   : > { %v1536_v1 = vadd.f32 %v1425_v0, %v905_v19 }
 0x27a   : > { %v5626_v52 = vadd.f32 %v1722_v60, %v1536_v1  ;;  %v690_v27 = vpop.f32.mrf.mxu0  ;;  %v907_v2 = vpop.f32.mrf.mxu1  ;;  %v5638_v1 = vadd.s32 384, %v4994_v54 }
 0x27b   : > { %v908_v13 = vadd.f32 %v907_v2, %v690_v27  ;;  %2125 = vxpose.binary.xlu2.c.b16.cont [6/16] %v2093_v26, %v2092_v50, 128  ;;  %v5657_v26 = vadd.s32 256, %v4991_v53 }
 0x27c   : > { %6307 = vst [vmem:[#allocation45_spill] sm:$0xff] %v5626_v52  ;;  %1467 = vmatmul.bf16.gmra.mxu2 %v5350_v41  ;;  %1764 = vmatmul.bf16.gmra.mxu3 %v5350_v41  ;;  %vm2814_vm2 = vcmp.eq.s32.totalorder %v5638_v1, %v4781_v6  ;;  %vm2815_vm3 = vcmp.eq.s32.totalorder %v5638_v1, %v4784_v7  ;;  %v5660_v52 = vadd.s32 256, %v4994_v54 }
 0x27d   : > { %729 = vmatmul.bf16.gmra.mxu0 %v5352_v40  ;;  %946 = vmatmul.bf16.gmra.mxu1 %v5352_v40  ;;  %v4248_v19 = vsel %vm2814_vm2, 1.0, %v6295_v24  ;;  %v4249_v60 = vsel %vm2815_vm3, 1.0, %v6295_v24  ;;  %vm1928_vm4 = vcmp.eq.s32.totalorder %v5657_v26, %v4781_v6  ;;  %vm1929_vm5 = vcmp.eq.s32.totalorder %v5657_v26, %v4784_v7 }
 0x27e   : > { %v2978_v31 = vpack.c.bf16 %v4248_v19, %v4244_v48  ;;  %v2979_v32 = vpack.c.bf16 %v4249_v60, %v4245_v33  ;;  %vm1932_vm6 = vcmp.eq.s32.totalorder %v5660_v52, %v4781_v6  ;;  %vm1933_vm7 = vcmp.eq.s32.totalorder %v5660_v52, %v4784_v7 }
 0x27f   : > { %v1428_v41 = vpop.f32.mrf.mxu2  ;;  %v1725_v14 = vpop.f32.mrf.mxu3  ;;  %v4116_v53 = vsel %vm1928_vm4, 1.0, %v6295_v24  ;;  %v4117_v54 = vsel %vm1929_vm5, 1.0, %v6295_v24  ;;  %v5679_v60 = vadd.s32 384, %v5027_v43  ;;  %vm2768_vm2 = vcmp.eq.s32.totalorder %v5380_v20, %v5075_v42 }
 0x280   : > { %v1537_v0 = vadd.f32 %v1428_v41, %v908_v13  ;;  %3008 = vxpose.binary.xlu1.c.b16.cont [7/16] %v2979_v32, %v2978_v31, 128  ;;  %v4120_v41 = vsel %vm1932_vm6, 1.0, %v6295_v24  ;;  %vm2769_vm3 = vcmp.eq.s32.totalorder %v5380_v20, %v5078_v45  ;;  %vm1882_vm4 = vcmp.eq.s32.totalorder %v5401_v39, %v5075_v42 }
 0x281   : > { %v2096_v48 = vpack.c.bf16 %v4120_v41, %v4116_v53  ;;  %6310 = vst [vmem:[#allocation48_spill] sm:$0xff] %v5679_v60  ;;  %vm2818_vm8 = vcmp.eq.s32.totalorder %v5679_v60, %v4781_v6  ;;  %vm2819_vm9 = vcmp.eq.s32.totalorder %v5679_v60, %v4784_v7  ;;  %v5701_v60 = vadd.s32 256, %v5027_v43 }
 0x282   : > { %v5654_v46 = vadd.f32 %v1725_v14, %v1537_v0  ;;  %v692_v40 = vpop.f32.mrf.mxu0  ;;  %v909_v5 = vpop.f32.mrf.mxu1  ;;  %v4121_v14 = vsel %vm1933_vm7, 1.0, %v6295_v24  ;;  %vm1883_vm5 = vcmp.eq.s32.totalorder %v5401_v39, %v5078_v45  ;;  %vm1886_vm6 = vcmp.eq.s32.totalorder %v5404_v21, %v5075_v42 }
 0x283   : > { %v910_v50 = vadd.f32 %v909_v5, %v692_v40  ;;  %v2097_v0 = vpack.c.bf16 %v4121_v14, %v4117_v54  ;;  %v4377_v40 = vld [vmem:[#allocation5 + $0xc0] sm:$0xff]  ;;  %vm1936_vm12 = vcmp.eq.s32.totalorder %v5701_v60, %v4781_v6  ;;  %vm1937_vm13 = vcmp.eq.s32.totalorder %v5701_v60, %v4784_v7 }
 0x284   : > { %6308 = vst [vmem:[#allocation46_spill] sm:$0xff] %v5654_v46  ;;  %v4361_v5 = vld [vmem:[#allocation5 + $0x80] sm:$0xff]  ;;  %3105 = vmatpush.bf16.msrb.mxu2 %v4377_v40  ;;  %v4124_v43 = vsel %vm1936_vm12, 1.0, %v6295_v24  ;;  %vm1887_vm7 = vcmp.eq.s32.totalorder %v5404_v21, %v5078_v45  ;;  %v4070_v20 = vsel %vm1882_vm4, 1.0, %v6295_v24  ;;  %vm1890_vm12 = vcmp.eq.s32.totalorder %v5441_v57, %v5075_v42 }
 0x285   : > { %2223 = vmatpush.bf16.msrb.mxu0 %v4361_v5  ;;  %vm1898_vm4 = vcmp.eq.s32.totalorder %v5485_v17, %v5075_v42 }
 0x287   : > { %v1430_v27 = vpop.f32.mrf.mxu2  ;;  %v1727_v2 = vpop.f32.mrf.mxu3 }
 0x288   : > { %v1538_v8 = vadd.f32 %v1430_v27, %v910_v50  ;;  %v4385_v50 = vld [vmem:[#allocation7 + $0xc0] sm:$0xff]  ;;  %v4252_v27 = vsel %vm2818_vm8, 1.0, %v6295_v24  ;;  %vm2772_vm8 = vcmp.eq.s32.totalorder %v5421_v29, %v5075_v42 }
 0x289   : > { %3402 = vmatpush.bf16.msrb.mxu3 %v4385_v50 }
 0x28a   : > { %v5670_v13 = vadd.f32 %v1727_v2, %v1538_v8  ;;  %v695_v33 = vpop.f32.mrf.mxu0  ;;  %v912_v19 = vpop.f32.mrf.mxu1  ;;  %v5682_v8 = vadd.s32 384, %v5030_v44  ;;  %v4253_v2 = vsel %vm2819_vm9, 1.0, %v6295_v24  ;;  %vm2773_vm9 = vcmp.eq.s32.totalorder %v5421_v29, %v5078_v45 }
 0x28b   : > { %v913_v31 = vadd.f32 %v912_v19, %v695_v33  ;;  %2126 = vxpose.binary.xlu2.c.b16.cont [7/16] %v2097_v0, %v2096_v48, 128  ;;  %v4369_v33 = vld [vmem:[#allocation7 + $0x80] sm:$0xff] }
 0x28c   : > { %6309 = vst [vmem:[#allocation47_spill] sm:$0xff] %v5670_v13  ;;  %1472 = vmatmul.bf16.gmra.mxu2 %v5358_v62  ;;  %1769 = vmatmul.bf16.gmra.mxu3 %v5358_v62  ;;  %vm2822_vm10 = vcmp.eq.s32.totalorder %v5682_v8, %v4781_v6  ;;  %vm2823_vm11 = vcmp.eq.s32.totalorder %v5682_v8, %v4784_v7 }
 0x28d   : > { %6311 = vst [vmem:[#allocation49_spill] sm:$0xff] %v5682_v8  ;;  %734 = vmatmul.bf16.gmra.mxu0 %v5362_v22  ;;  %951 = vmatmul.bf16.gmra.mxu1 %v5362_v22  ;;  %v4256_v53 = vsel %vm2822_vm10, 1.0, %v6295_v24  ;;  %v4257_v41 = vsel %vm2823_vm11, 1.0, %v6295_v24  ;;  %vm2776_vm10 = vcmp.eq.s32.totalorder %v5424_v12, %v5075_v42  ;;  %vm2777_vm11 = vcmp.eq.s32.totalorder %v5424_v12, %v5078_v45 }
 0x28e   : > { %v2982_v14 = vpack.c.bf16 %v4256_v53, %v4252_v27  ;;  %v2983_v22 = vpack.c.bf16 %v4257_v41, %v4253_v2  ;;  %2520 = vmatpush.bf16.msrb.mxu1 %v4369_v33  ;;  %v4078_v12 = vsel %vm1890_vm12, 1.0, %v6295_v24  ;;  %vm1906_vm12 = vcmp.eq.s32.totalorder %v5529_v59, %v5075_v42 }
 0x28f   : > { %v1433_v62 = vpop.f32.mrf.mxu2  ;;  %v1730_v32 = vpop.f32.mrf.mxu3 }
 0x290   : > { %v1539_v54 = vadd.f32 %v1433_v62, %v913_v31  ;;  %3009 = vxpose.binary.xlu1.c.b16.end [8/16] %v2983_v22, %v2982_v14, 128  ;;  %v5704_v31 = vadd.s32 256, %v5030_v44  ;;  %v4125_v44 = vsel %vm1937_vm13, 1.0, %v6295_v24  ;;  %vm1891_vm13 = vcmp.eq.s32.totalorder %v5441_v57, %v5078_v45 }
 0x292   : > { %v5698_v48 = vadd.f32 %v1730_v32, %v1539_v54  ;;  %v697_v19 = vpop.f32.mrf.mxu0  ;;  %v914_v0 = vpop.f32.mrf.mxu1  ;;  %vm1940_vm14 = vcmp.eq.s32.totalorder %v5704_v31, %v4781_v6  ;;  %vm1941_vm15 = vcmp.eq.s32.totalorder %v5704_v31, %v4784_v7 }
 0x293   : > { %v915_v13 = vadd.f32 %v914_v0, %v697_v19 }
 0x297   : > { %v1435_v46 = vpop.f32.mrf.mxu2  ;;  %v1732_v8 = vpop.f32.mrf.mxu3 }
 0x298   : > { %v1540_v62 = vadd.f32 %v1435_v46, %v915_v13  ;;  %v4128_v46 = vsel %vm1940_vm14, 1.0, %v6295_v24  ;;  %v4129_v13 = vsel %vm1941_vm15, 1.0, %v6295_v24  ;;  %vm1894_vm14 = vcmp.eq.s32.totalorder %v5444_v23, %v5075_v42 }
 0x299   : > { %v2100_v40 = vpack.c.bf16 %v4128_v46, %v4124_v43  ;;  %v2101_v6 = vpack.c.bf16 %v4129_v13, %v4125_v44  ;;  %vm1895_vm15 = vcmp.eq.s32.totalorder %v5444_v23, %v5078_v45 }
 0x29a   : > { %v5714_v32 = vadd.f32 %v1732_v8, %v1540_v62  ;;  %v700_v5 = vpop.f32.mrf.mxu0  ;;  %v917_v50 = vpop.f32.mrf.mxu1 }
 0x29b   : > { %v918_v27 = vadd.f32 %v917_v50, %v700_v5  ;;  %2127 = vxpose.binary.xlu2.c.b16.end [8/16] %v2101_v6, %v2100_v40, 128 }
 0x29c   : > { %1477 = vmatmul.bf16.gmra.mxu2 %v5368_v49  ;;  %1774 = vmatmul.bf16.gmra.mxu3 %v5368_v49 }
 0x29d   : > { %739 = vmatmul.bf16.gmra.mxu0 %v5370_v58  ;;  %956 = vmatmul.bf16.gmra.mxu1 %v5370_v58 }
 0x29f   : > { %v1438_v7 = vpop.f32.mrf.mxu2  ;;  %v1735_v8 = vpop.f32.mrf.mxu3 }
 0x2a0   : > { %v1541_v2 = vadd.f32 %v1438_v7, %v918_v27 }
 0x2a2   : > { %v5724_v53 = vadd.f32 %v1735_v8, %v1541_v2  ;;  %v702_v54 = vpop.f32.mrf.mxu0  ;;  %v919_v41 = vpop.f32.mrf.mxu1 }
 0x2a3   : > { %v920_v14 = vadd.f32 %v919_v41, %v702_v54 }
 0x2a7   : > { %v1440_v22 = vpop.f32.mrf.mxu2  ;;  %v1737_v33 = vpop.f32.mrf.mxu3 }
 0x2a8   : > { %v1542_v19 = vadd.f32 %v1440_v22, %v920_v14 }
 0x2aa   : > { %v5726_v0 = vadd.f32 %v1737_v33, %v1542_v19  ;;  %v705_v49 = vpop.f32.mrf.mxu0  ;;  %v922_v62 = vpop.f32.mrf.mxu1 }
 0x2ab   : > { %v923_v58 = vadd.f32 %v922_v62, %v705_v49 }
 0x2ac   : > { %1482 = vmatmul.bf16.gmra.mxu2 %v5396_v63  ;;  %1779 = vmatmul.bf16.gmra.mxu3 %v5396_v63 }
 0x2ad   : > { %744 = vmatmul.bf16.gmra.mxu0 %v5398_v18  ;;  %961 = vmatmul.bf16.gmra.mxu1 %v5398_v18 }
 0x2af   : > { %v1443_v43 = vpop.f32.mrf.mxu2  ;;  %v1740_v44 = vpop.f32.mrf.mxu3 }
 0x2b0   : > { %v1543_v46 = vadd.f32 %v1443_v43, %v923_v58 }
 0x2b2   : > { %v5732_v13 = vadd.f32 %v1740_v44, %v1543_v46  ;;  %v707_v40 = vpop.f32.mrf.mxu0  ;;  %v924_v5 = vpop.f32.mrf.mxu1 }
 0x2b3   : > { %v925_v50 = vadd.f32 %v924_v5, %v707_v40  ;;  %v1285_v44 = vpop.trf.xlu2 }
 0x2b4   : > { %6312 = vst [vmem:[#allocation50_spill] sm:$0xff] %v5732_v13 }
 0x2b7   : > { %v1445_v6 = vpop.f32.mrf.mxu2  ;;  %v1742_v27 = vpop.f32.mrf.mxu3 }
 0x2b8   : > { %v1544_v7 = vadd.f32 %v1445_v6, %v925_v50 }
 0x2ba   : > { %v5734_v8 = vadd.f32 %v1742_v27, %v1544_v7  ;;  %v710_v2 = vpop.f32.mrf.mxu0  ;;  %v927_v63 = vpop.f32.mrf.mxu1 }
 0x2bb   : > { %v928_v18 = vadd.f32 %v927_v63, %v710_v2 }
 0x2bc   : > { %6313 = vst [vmem:[#allocation51_spill] sm:$0xff] %v5734_v8  ;;  %1487 = vmatmul.bf16.gmra.mxu2 %v5446_v10  ;;  %1784 = vmatmul.bf16.gmra.mxu3 %v5446_v10 }
 0x2bd   : > { %749 = vmatmul.bf16.gmra.mxu0 %v5461_v38  ;;  %966 = vmatmul.bf16.gmra.mxu1 %v5461_v38 }
 0x2bf   : > { %v1448_v54 = vpop.f32.mrf.mxu2  ;;  %v1745_v41 = vpop.f32.mrf.mxu3 }
 0x2c0   : > { %v1545_v14 = vadd.f32 %v1448_v54, %v928_v18 }
 0x2c2   : > { %v5740_v22 = vadd.f32 %v1745_v41, %v1545_v14  ;;  %v712_v33 = vpop.f32.mrf.mxu0  ;;  %v929_v19 = vpop.f32.mrf.mxu1 }
 0x2c3   : > { %v930_v49 = vadd.f32 %v929_v19, %v712_v33 }
 0x2c4   : > { %6314 = vst [vmem:[#allocation52_spill] sm:$0xff] %v5740_v22 }
 0x2c7   : > { %v1450_v62 = vpop.f32.mrf.mxu2  ;;  %v1747_v58 = vpop.f32.mrf.mxu3 }
 0x2c8   : > { %v1546_v43 = vadd.f32 %v1450_v62, %v930_v49 }
 0x2ca   : > { %v5742_v46 = vadd.f32 %v1747_v58, %v1546_v43  ;;  %v715_v10 = vpop.f32.mrf.mxu0  ;;  %v932_v40 = vpop.f32.mrf.mxu1 }
 0x2cb   : > { %v933_v38 = vadd.f32 %v932_v40, %v715_v10 }
 0x2cc   : > { %6315 = vst [vmem:[#allocation53_spill] sm:$0xff] %v5742_v46  ;;  %1492 = vmatmul.bf16.gmra.mxu2 %v5510_v37  ;;  %1789 = vmatmul.bf16.gmra.mxu3 %v5510_v37  ;;  %v2128_v27 = vpop.trf.xlu2  ;;  %v3010_v7 = vpop.trf.xlu1 }
 0x2cd   : > { %754 = vmatmul.bf16.gmra.mxu0 %v5524_v4  ;;  %971 = vmatmul.bf16.gmra.mxu1 %v5524_v4  ;;  %v547_v4 = vpop.trf.xlu0 }
 0x2cf   : > { %v1453_v5 = vpop.f32.mrf.mxu2  ;;  %v1750_v50 = vpop.f32.mrf.mxu3 }
 0x2d0   : > { %v1547_v6 = vadd.f32 %v1453_v5, %v933_v38 }
 0x2d2   : > { %v5748_v2 = vadd.f32 %v1750_v50, %v1547_v6  ;;  %v717_v63 = vpop.f32.mrf.mxu0  ;;  %v934_v18 = vpop.f32.mrf.mxu1 }
 0x2d3   : > { %v935_v54 = vadd.f32 %v934_v18, %v717_v63 }
 0x2d4   : > { %6316 = vst [vmem:[#allocation54_spill] sm:$0xff] %v5748_v2  ;;  %v5750_v19 = vpop.trf.xlu2  ;;  %v5752_v37 = vpop.trf.xlu1 }
 0x2d7   : > { %v1455_v41 = vpop.f32.mrf.mxu2  ;;  %v1752_v14 = vpop.f32.mrf.mxu3 }
 0x2d8   : > { %v1548_v33 = vadd.f32 %v1455_v41, %v935_v54 }
 0x2da   : > { %v5754_v49 = vadd.f32 %v1752_v14, %v1548_v33  ;;  %v720_v62 = vpop.f32.mrf.mxu0  ;;  %v937_v58 = vpop.f32.mrf.mxu1 }
 0x2db   : > { %v938_v43 = vadd.f32 %v937_v58, %v720_v62 }
 0x2dc   : > { %6317 = vst [vmem:[#allocation55_spill] sm:$0xff] %v5754_v49  ;;  %1497 = vmatmul.bf16.gmra.mxu2 %v1285_v44  ;;  %1794 = vmatmul.bf16.gmra.mxu3 %v1285_v44  ;;  %v2130_v5 = vpop.trf.xlu2  ;;  %v3012_v50 = vpop.trf.xlu1 }
 0x2dd   : > { %759 = vmatmul.bf16.gmra.mxu0 %v547_v4  ;;  %976 = vmatmul.bf16.gmra.mxu1 %v547_v4 }
 0x2df   : > { %v1458_v10 = vpop.f32.mrf.mxu2  ;;  %v1755_v40 = vpop.f32.mrf.mxu3 }
 0x2e0   : > { %v1549_v38 = vadd.f32 %v1458_v10, %v938_v43 }
 0x2e2   : > { %v5756_v6 = vadd.f32 %v1755_v40, %v1549_v38  ;;  %v722_v63 = vpop.f32.mrf.mxu0  ;;  %v939_v18 = vpop.f32.mrf.mxu1 }
 0x2e3   : > { %v940_v54 = vadd.f32 %v939_v18, %v722_v63 }
 0x2e4   : > { %6318 = vst [vmem:[#allocation56_spill] sm:$0xff] %v5756_v6  ;;  %v5758_v49 = vpop.trf.xlu2  ;;  %v5760_v2 = vpop.trf.xlu1 }
 0x2e7   : > { %v1460_v41 = vpop.f32.mrf.mxu2  ;;  %v1757_v14 = vpop.f32.mrf.mxu3 }
 0x2e8   : > { %v1550_v33 = vadd.f32 %v1460_v41, %v940_v54 }
 0x2ea   : > { %v5762_v44 = vadd.f32 %v1757_v14, %v1550_v33  ;;  %v725_v4 = vpop.f32.mrf.mxu0  ;;  %v942_v62 = vpop.f32.mrf.mxu1 }
 0x2eb   : > { %v943_v58 = vadd.f32 %v942_v62, %v725_v4 }
 0x2ec   : > { %6319 = vst [vmem:[#allocation57_spill] sm:$0xff] %v5762_v44  ;;  %3106 = vmatmul.bf16.vlgmr.msrb.gmra.mxu2 %v3010_v7  ;;  %3403 = vmatmul.bf16.vlgmr.msrb.gmra.mxu3 %v3010_v7  ;;  %v3014_v38 = vpop.trf.xlu1  ;;  %v2132_v63 = vpop.trf.xlu2 }
 0x2ed   : > { %2224 = vmatmul.bf16.vlgmr.msrb.gmra.mxu0 %v2128_v27  ;;  %2521 = vmatmul.bf16.vlgmr.msrb.gmra.mxu1 %v2128_v27 }
 0x2ef   : > { %v1463_v43 = vpop.f32.mrf.mxu2  ;;  %v1760_v10 = vpop.f32.mrf.mxu3 }
 0x2f0   : > { %v1551_v40 = vadd.f32 %v1463_v43, %v943_v58 }
 0x2f2   : > { %v5764_v18 = vadd.f32 %v1760_v10, %v1551_v40  ;;  %v727_v54 = vpop.f32.mrf.mxu0  ;;  %v944_v41 = vpop.f32.mrf.mxu1 }
 0x2f3   : > { %v945_v6 = vadd.f32 %v944_v41, %v727_v54 }
 0x2f4   : > { %6320 = vst [vmem:[#allocation58_spill] sm:$0xff] %v5764_v18  ;;  %v5766_v44 = vpop.trf.xlu1  ;;  %v5770_v7 = vpop.trf.xlu2 }
 0x2f7   : > { %v1465_v46 = vpop.f32.mrf.mxu2  ;;  %v1762_v14 = vpop.f32.mrf.mxu3 }
 0x2f8   : > { %v1552_v33 = vadd.f32 %v1465_v46, %v945_v6 }
 0x2fa   : > { %v5768_v22 = vadd.f32 %v1762_v14, %v1552_v33  ;;  %v730_v27 = vpop.f32.mrf.mxu0  ;;  %v947_v4 = vpop.f32.mrf.mxu1 }
 0x2fb   : > { %v948_v62 = vadd.f32 %v947_v4, %v730_v27 }
 0x2fc   : > { %6321 = vst [vmem:[#allocation59_spill] sm:$0xff] %v5768_v22  ;;  %3111 = vmatmul.bf16.gmra.mxu2 %v3012_v50  ;;  %3408 = vmatmul.bf16.gmra.mxu3 %v3012_v50  ;;  %v3016_v54 = vpop.trf.xlu1  ;;  %v2134_v14 = vpop.trf.xlu2 }
 0x2fd   : > { %2229 = vmatmul.bf16.gmra.mxu0 %v2130_v5  ;;  %2526 = vmatmul.bf16.gmra.mxu1 %v2130_v5 }
 0x2ff   : > { %v1468_v58 = vpop.f32.mrf.mxu2  ;;  %v1765_v43 = vpop.f32.mrf.mxu3 }
 0x300   : > { %v1553_v10 = vadd.f32 %v1468_v58, %v948_v62 }
 0x302   : > { %v5772_v40 = vadd.f32 %v1765_v43, %v1553_v10  ;;  %v732_v46 = vpop.f32.mrf.mxu0  ;;  %v949_v6 = vpop.f32.mrf.mxu1 }
 0x303   : > { %v950_v41 = vadd.f32 %v949_v6, %v732_v46 }
 0x304   : > { %6322 = vst [vmem:[#allocation60_spill] sm:$0xff] %v5772_v40  ;;  %v5776_v27 = vpop.trf.xlu1  ;;  %v5778_v43 = vpop.trf.xlu2 }
 0x307   : > { %v1470_v33 = vpop.f32.mrf.mxu2  ;;  %v1767_v22 = vpop.f32.mrf.mxu3 }
 0x308   : > { %v1554_v18 = vadd.f32 %v1470_v33, %v950_v41 }
 0x30a   : > { %v5774_v8 = vadd.f32 %v1767_v22, %v1554_v18  ;;  %v735_v13 = vpop.f32.mrf.mxu0  ;;  %v952_v50 = vpop.f32.mrf.mxu1 }
 0x30b   : > { %v953_v5 = vadd.f32 %v952_v50, %v735_v13 }
 0x30c   : > { %6323 = vst [vmem:[#allocation61_spill] sm:$0xff] %v5774_v8  ;;  %3116 = vmatmul.bf16.gmra.mxu2 %v3014_v38  ;;  %3413 = vmatmul.bf16.gmra.mxu3 %v3014_v38  ;;  %v3018_v8 = vpop.trf.xlu1  ;;  %v2136_v13 = vpop.trf.xlu2 }
 0x30d   : > { %2234 = vmatmul.bf16.gmra.mxu0 %v2132_v63  ;;  %2531 = vmatmul.bf16.gmra.mxu1 %v2132_v63 }
 0x30f   : > { %v1473_v4 = vpop.f32.mrf.mxu2  ;;  %v1770_v62 = vpop.f32.mrf.mxu3 }
 0x310   : > { %v1555_v58 = vadd.f32 %v1473_v4, %v953_v5 }
 0x312   : > { %v5780_v10 = vadd.f32 %v1770_v62, %v1555_v58  ;;  %v737_v46 = vpop.f32.mrf.mxu0  ;;  %v954_v6 = vpop.f32.mrf.mxu1  ;;  %v4198_v62 = vsel %vm2764_vm0, 1.0, %v6295_v24  ;;  %v4203_v58 = vsel %vm2769_vm3, 1.0, %v6295_v24  ;;  %vm2780_vm0 = vcmp.eq.s32.totalorder %v5465_v25, %v5075_v42 }
 0x313   : > { %v955_v22 = vadd.f32 %v954_v6, %v737_v46  ;;  %vm2785_vm3 = vcmp.eq.s32.totalorder %v5468_v3, %v5078_v45 }
 0x314   : > { %v5812_v21 = vpop.trf.xlu2 }
 0x317   : > { %v1475_v18 = vpop.f32.mrf.mxu2  ;;  %v1772_v41 = vpop.f32.mrf.mxu3 }
 0x318   : > { %v1556_v33 = vadd.f32 %v1475_v18, %v955_v22  ;;  %v4071_v22 = vsel %vm1883_vm5, 1.0, %v6295_v24  ;;  %v4074_v18 = vsel %vm1886_vm6, 1.0, %v6295_v24  ;;  %vm1899_vm5 = vcmp.eq.s32.totalorder %v5485_v17, %v5078_v45 }
 0x319   : > { %v2074_v39 = vpack.c.bf16 %v4074_v18, %v4070_v20  ;;  %v4207_v18 = vsel %vm2773_vm9, 1.0, %v6295_v24  ;;  %vm1902_vm6 = vcmp.eq.s32.totalorder %v5488_v51, %v5075_v42  ;;  %vm2789_vm9 = vcmp.eq.s32.totalorder %v5505_v11, %v5078_v45 }
 0x31a   : > { %v5782_v38 = vadd.f32 %v1772_v41, %v1556_v33  ;;  %v740_v50 = vpop.f32.mrf.mxu0  ;;  %v957_v40 = vpop.f32.mrf.mxu1  ;;  %v4075_v41 = vsel %vm1887_vm7, 1.0, %v6295_v24  ;;  %vm1903_vm7 = vcmp.eq.s32.totalorder %v5488_v51, %v5078_v45 }
 0x31b   : > { %v958_v63 = vadd.f32 %v957_v40, %v740_v50  ;;  %v4199_v40 = vsel %vm2765_vm1, 1.0, %v6295_v24  ;;  %v5810_v33 = vpop.trf.xlu1  ;;  %v2075_v50 = vpack.c.bf16 %v4075_v41, %v4071_v22  ;;  %v4210_v41 = vsel %vm2776_vm10, 1.0, %v6295_v24 }
 0x31c   : > { %3121 = vmatmul.bf16.gmra.mxu2 %v3016_v54  ;;  %3418 = vmatmul.bf16.gmra.mxu3 %v3016_v54  ;;  %v4202_v54 = vsel %vm2768_vm2, 1.0, %v6295_v24  ;;  %v2957_v6 = vpack.c.bf16 %v4203_v58, %v4199_v40  ;;  %vm2781_vm1 = vcmp.eq.s32.totalorder %v5465_v25, %v5078_v45  ;;  %vm2784_vm2 = vcmp.eq.s32.totalorder %v5468_v3, %v5075_v42 }
 0x31d   : > { %2239 = vmatmul.bf16.gmra.mxu0 %v2134_v14  ;;  %2536 = vmatmul.bf16.gmra.mxu1 %v2134_v14  ;;  %v2956_v34 = vpack.c.bf16 %v4202_v54, %v4198_v62  ;;  %v4086_v3 = vsel %vm1898_vm4, 1.0, %v6295_v24  ;;  %vm2792_vm10 = vcmp.eq.s32.totalorder %v5508_v28, %v5075_v42  ;;  %vm1914_vm4 = vcmp.eq.s32.totalorder %v5569_v30, %v5075_v42 }
 0x31e   : > { %2144 = vxpose.binary.xlu1.c.b16.start [1/16] %v2075_v50, %v2074_v39, 128  ;;  %v4211_v39 = vsel %vm2777_vm11, 1.0, %v6295_v24  ;;  %vm2793_vm11 = vcmp.eq.s32.totalorder %v5508_v28, %v5078_v45  ;;  %v4094_v28 = vsel %vm1906_vm12, 1.0, %v6295_v24  ;;  %vm1922_vm12 = vcmp.eq.s32.totalorder %v5613_v15, %v5075_v42 }
 0x31f   : > { %v1478_v5 = vpop.f32.mrf.mxu2  ;;  %v1775_v4 = vpop.f32.mrf.mxu3  ;;  %3026 = vxpose.binary.xlu0.c.b16.start [1/16] %v2957_v6, %v2956_v34, 128 }
 0x320   : > { %v1557_v46 = vadd.f32 %v1478_v5, %v958_v63 }
 0x322   : > { %v5805_v14 = vadd.f32 %v1775_v4, %v1557_v46  ;;  %v742_v63 = vpop.f32.mrf.mxu0  ;;  %v959_v5 = vpop.f32.mrf.mxu1 }
 0x323   : > { %v960_v62 = vadd.f32 %v959_v5, %v742_v63  ;;  %v2961_v63 = vpack.c.bf16 %v4211_v39, %v4207_v18  ;;  %v2138_v5 = vpop.trf.xlu2 }
 0x324   : > { %6324 = vst [vmem:[#allocation62_spill] sm:$0xff] %v5805_v14  ;;  %v3020_v14 = vpop.trf.xlu1 }
 0x327   : > { %v1480_v40 = vpop.f32.mrf.mxu2  ;;  %v1777_v4 = vpop.f32.mrf.mxu3 }
 0x328   : > { %v1558_v54 = vadd.f32 %v1480_v40, %v960_v62  ;;  %v4079_v62 = vsel %vm1891_vm13, 1.0, %v6295_v24  ;;  %v4082_v40 = vsel %vm1894_vm14, 1.0, %v6295_v24  ;;  %vm1907_vm13 = vcmp.eq.s32.totalorder %v5529_v59, %v5078_v45 }
 0x329   : > { %vm1910_vm14 = vcmp.eq.s32.totalorder %v5532_v16, %v5075_v42 }
 0x32a   : > { %v5814_v58 = vadd.f32 %v1777_v4, %v1558_v54  ;;  %v745_v46 = vpop.f32.mrf.mxu0  ;;  %v962_v34 = vpop.f32.mrf.mxu1  ;;  %v4083_v4 = vsel %vm1895_vm15, 1.0, %v6295_v24  ;;  %v2078_v54 = vpack.c.bf16 %v4082_v40, %v4078_v12  ;;  %v4218_v40 = vsel %vm2784_vm2, 1.0, %v6295_v24 }
 0x32b   : > { %v963_v6 = vadd.f32 %v962_v34, %v745_v46  ;;  %v2079_v46 = vpack.c.bf16 %v4083_v4, %v4079_v62  ;;  %v4214_v62 = vsel %vm2780_vm0, 1.0, %v6295_v24  ;;  %v4219_v4 = vsel %vm2785_vm3, 1.0, %v6295_v24 }
 0x32c   : > { %3126 = vmatmul.bf16.gmra.mxu2 %v3018_v8  ;;  %3423 = vmatmul.bf16.gmra.mxu3 %v3018_v8  ;;  %v4206_v8 = vsel %vm2772_vm8, 1.0, %v6295_v24  ;;  %v5842_v18 = vpop.trf.xlu1  ;;  %v2964_v25 = vpack.c.bf16 %v4218_v40, %v4214_v62  ;;  %vm2788_vm8 = vcmp.eq.s32.totalorder %v5505_v11, %v5075_v42  ;;  %vm1911_vm15 = vcmp.eq.s32.totalorder %v5532_v16, %v5078_v45 }
 0x32d   : > { %2244 = vmatmul.bf16.gmra.mxu0 %v2136_v13  ;;  %2541 = vmatmul.bf16.gmra.mxu1 %v2136_v13  ;;  %v2960_v29 = vpack.c.bf16 %v4210_v41, %v4206_v8  ;;  %v5846_v41 = vpop.trf.xlu2  ;;  %vm2796_vm0 = vcmp.eq.s32.totalorder %v5549_v36, %v5075_v42  ;;  %vm2800_vm2 = vcmp.eq.s32.totalorder %v5552_v61, %v5075_v42 }
 0x32e   : > { %2145 = vxpose.binary.xlu1.c.b16.cont [2/16] %v2079_v46, %v2078_v54, 128  ;;  %vm2801_vm3 = vcmp.eq.s32.totalorder %v5552_v61, %v5078_v45  ;;  %v4102_v61 = vsel %vm1914_vm4, 1.0, %v6295_v24  ;;  %vm1930_vm4 = vcmp.eq.s32.totalorder %v5657_v26, %v5075_v42 }
 0x32f   : > { %v1483_v20 = vpop.f32.mrf.mxu2  ;;  %v1780_v22 = vpop.f32.mrf.mxu3  ;;  %3027 = vxpose.binary.xlu0.c.b16.cont [2/16] %v2961_v63, %v2960_v29, 128 }
 0x330   : > { %v1559_v50 = vadd.f32 %v1483_v20, %v963_v6 }
 0x332   : > { %v5837_v13 = vadd.f32 %v1780_v22, %v1559_v50  ;;  %v747_v57 = vpop.f32.mrf.mxu0  ;;  %v964_v34 = vpop.f32.mrf.mxu1 }
 0x333   : > { %v965_v6 = vadd.f32 %v964_v34, %v747_v57  ;;  %v4087_v57 = vsel %vm1899_vm5, 1.0, %v6295_v24  ;;  %v4090_v34 = vsel %vm1902_vm6, 1.0, %v6295_v24  ;;  %vm1915_vm5 = vcmp.eq.s32.totalorder %v5569_v30, %v5078_v45 }
 0x334   : > { %vm1918_vm6 = vcmp.eq.s32.totalorder %v5572_v9, %v5075_v42 }
 0x337   : > { %v1485_v20 = vpop.f32.mrf.mxu2  ;;  %v1782_v8 = vpop.f32.mrf.mxu3 }
 0x338   : > { %v1560_v23 = vadd.f32 %v1485_v20, %v965_v6  ;;  %v4091_v6 = vsel %vm1903_vm7, 1.0, %v6295_v24  ;;  %v3022_v20 = vpop.trf.xlu1  ;;  %vm1919_vm7 = vcmp.eq.s32.totalorder %v5572_v9, %v5078_v45 }
 0x339   : > { %v2083_v17 = vpack.c.bf16 %v4091_v6, %v4087_v57  ;;  %v4223_v57 = vsel %vm2789_vm9, 1.0, %v6295_v24  ;;  %v4227_v6 = vsel %vm2793_vm11, 1.0, %v6295_v24  ;;  %vm2805_vm9 = vcmp.eq.s32.totalorder %v5591_v47, %v5078_v45 }
 0x33a   : > { %v5844_v22 = vadd.f32 %v1782_v8, %v1560_v23  ;;  %v750_v39 = vpop.f32.mrf.mxu0  ;;  %v967_v50 = vpop.f32.mrf.mxu1  ;;  %v2082_v8 = vpack.c.bf16 %v4090_v34, %v4086_v3  ;;  %v4222_v3 = vsel %vm2788_vm8, 1.0, %v6295_v24  ;;  %v4226_v34 = vsel %vm2792_vm10, 1.0, %v6295_v24 }
 0x33b   : > { %v968_v29 = vadd.f32 %v967_v50, %v750_v39  ;;  %v2968_v11 = vpack.c.bf16 %v4226_v34, %v4222_v3  ;;  %vm2804_vm8 = vcmp.eq.s32.totalorder %v5591_v47, %v5075_v42  ;;  %vm2808_vm10 = vcmp.eq.s32.totalorder %v5594_v56, %v5075_v42 }
 0x33c   : > { %3131 = vmatmul.bf16.gmra.mxu2 %v3020_v14  ;;  %3428 = vmatmul.bf16.gmra.mxu3 %v3020_v14  ;;  %v4215_v14 = vsel %vm2781_vm1, 1.0, %v6295_v24  ;;  %vm2797_vm1 = vcmp.eq.s32.totalorder %v5549_v36, %v5078_v45  ;;  %vm2809_vm11 = vcmp.eq.s32.totalorder %v5594_v56, %v5078_v45  ;;  %v4242_v47 = vsel %vm2808_vm10, 1.0, %v6295_v24 }
 0x33d   : > { %2249 = vmatmul.bf16.gmra.mxu0 %v2138_v5  ;;  %2546 = vmatmul.bf16.gmra.mxu1 %v2138_v5  ;;  %v2965_v46 = vpack.c.bf16 %v4219_v4, %v4215_v14 }
 0x33e   : > { %2146 = vxpose.binary.xlu1.c.b16.cont [3/16] %v2083_v17, %v2082_v8, 128  ;;  %v2969_v8 = vpack.c.bf16 %v4227_v6, %v4223_v57 }
 0x33f   : > { %v1488_v63 = vpop.f32.mrf.mxu2  ;;  %v1785_v12 = vpop.f32.mrf.mxu3  ;;  %3028 = vxpose.binary.xlu0.c.b16.cont [3/16] %v2965_v46, %v2964_v25, 128 }
 0x340   : > { %v1561_v54 = vadd.f32 %v1488_v63, %v968_v29  ;;  %v2140_v29 = vpop.trf.xlu2 }
 0x342   : > { %v5869_v5 = vadd.f32 %v1785_v12, %v1561_v54  ;;  %v752_v23 = vpop.f32.mrf.mxu0  ;;  %v969_v39 = vpop.f32.mrf.mxu1 }
 0x343   : > { %v970_v50 = vadd.f32 %v969_v39, %v752_v23  ;;  %v5876_v54 = vpop.trf.xlu1  ;;  %v4095_v39 = vsel %vm1907_vm13, 1.0, %v6295_v24  ;;  %vm1923_vm13 = vcmp.eq.s32.totalorder %v5613_v15, %v5078_v45 }
 0x347   : > { %v1490_v51 = vpop.f32.mrf.mxu2  ;;  %v1787_v63 = vpop.f32.mrf.mxu3 }
 0x348   : > { %v1562_v62 = vadd.f32 %v1490_v51, %v970_v50  ;;  %v5892_v17 = vpop.trf.xlu2  ;;  %v4098_v50 = vsel %vm1910_vm14, 1.0, %v6295_v24  ;;  %vm1926_vm14 = vcmp.eq.s32.totalorder %v5616_v55, %v5075_v42 }
 0x349   : > { %v2086_v51 = vpack.c.bf16 %v4098_v50, %v4094_v28  ;;  %v4231_v28 = vsel %vm2797_vm1, 1.0, %v6295_v24  ;;  %v4235_v50 = vsel %vm2801_vm3, 1.0, %v6295_v24  ;;  %vm2813_vm1 = vcmp.eq.s32.totalorder %v5635_v35, %v5078_v45 }
 0x34a   : > { %v5874_v12 = vadd.f32 %v1787_v63, %v1562_v62  ;;  %v755_v14 = vpop.f32.mrf.mxu0  ;;  %v972_v40 = vpop.f32.mrf.mxu1  ;;  %vm2817_vm3 = vcmp.eq.s32.totalorder %v5638_v1, %v5078_v45 }
 0x34b   : > { %v973_v4 = vadd.f32 %v972_v40, %v755_v14 }
 0x34c   : > { %3136 = vmatmul.bf16.gmra.mxu2 %v3022_v20  ;;  %3433 = vmatmul.bf16.gmra.mxu3 %v3022_v20 }
 0x34d   : > { %2254 = vmatmul.bf16.gmra.mxu0 %v2140_v29  ;;  %2551 = vmatmul.bf16.gmra.mxu1 %v2140_v29  ;;  %v4099_v29 = vsel %vm1911_vm15, 1.0, %v6295_v24  ;;  %vm1927_vm15 = vcmp.eq.s32.totalorder %v5616_v55, %v5078_v45  ;;  %v6326_v55 = vld [vmem:[#allocation13_spill] sm:$0xff] }
 0x34e   : > { %v2087_v63 = vpack.c.bf16 %v4099_v29, %v4095_v39  ;;  %v4234_v39 = vsel %vm2800_vm2, 1.0, %v6295_v24  ;;  %vm2816_vm2 = vcmp.eq.s32.totalorder %v5638_v1, %v5075_v42 }
 0x34f   : > { %v1493_v25 = vpop.f32.mrf.mxu2  ;;  %v1790_v46 = vpop.f32.mrf.mxu3  ;;  %3029 = vxpose.binary.xlu0.c.b16.cont [4/16] %v2969_v8, %v2968_v11, 128  ;;  %v4230_v8 = vsel %vm2796_vm0, 1.0, %v6295_v24  ;;  %vm2812_vm0 = vcmp.eq.s32.totalorder %v5635_v35, %v5075_v42  ;;  %v4251_v35 = vsel %vm2817_vm3, 1.0, %v6295_v24 }
 0x350   : > { %v1563_v20 = vadd.f32 %v1493_v25, %v973_v4  ;;  %2147 = vxpose.binary.xlu1.c.b16.cont [4/16] %v2087_v63, %v2086_v51, 128  ;;  %v3024_v25 = vpop.trf.xlu1  ;;  %v2972_v36 = vpack.c.bf16 %v4234_v39, %v4230_v8  ;;  %v2973_v51 = vpack.c.bf16 %v4235_v50, %v4231_v28  ;;  %v4238_v50 = vsel %vm2804_vm8, 1.0, %v6295_v24 }
 0x352   : > { %v5901_v23 = vadd.f32 %v1790_v46, %v1563_v20  ;;  %v757_v59 = vpop.f32.mrf.mxu0  ;;  %v974_v62 = vpop.f32.mrf.mxu1 }
 0x353   : > { %v975_v14 = vadd.f32 %v974_v62, %v757_v59  ;;  %v2142_v46 = vpop.trf.xlu2  ;;  %v4103_v59 = vsel %vm1915_vm5, 1.0, %v6295_v24  ;;  %v4106_v62 = vsel %vm1918_vm6, 1.0, %v6295_v24  ;;  %vm1931_vm5 = vcmp.eq.s32.totalorder %v5657_v26, %v5078_v45 }
 0x354   : > { %vm1934_vm6 = vcmp.eq.s32.totalorder %v5660_v52, %v5075_v42 }
 0x357   : > { %v1495_v40 = vpop.f32.mrf.mxu2  ;;  %v1792_v4 = vpop.f32.mrf.mxu3 }
 0x358   : > { %v1564_v16 = vadd.f32 %v1495_v40, %v975_v14  ;;  %v4107_v14 = vsel %vm1919_vm7, 1.0, %v6295_v24  ;;  %v2090_v40 = vpack.c.bf16 %v4106_v62, %v4102_v61  ;;  %v4110_v61 = vsel %vm1922_vm12, 1.0, %v6295_v24 }
 0x359   : > { %v4114_v62 = vsel %vm1926_vm14, 1.0, %v6295_v24  ;;  %vm1935_vm7 = vcmp.eq.s32.totalorder %v5660_v52, %v5078_v45  ;;  %vm1938_vm12 = vcmp.eq.s32.totalorder %v5701_v60, %v5075_v42  ;;  %vm1942_vm14 = vcmp.eq.s32.totalorder %v5704_v31, %v5075_v42 }
 0x35a   : > { %v5906_v3 = vadd.f32 %v1792_v4, %v1564_v16  ;;  %v760_v57 = vpop.f32.mrf.mxu0  ;;  %v977_v34 = vpop.f32.mrf.mxu1  ;;  %v2091_v4 = vpack.c.bf16 %v4107_v14, %v4103_v59  ;;  %v4111_v59 = vsel %vm1923_vm13, 1.0, %v6295_v24  ;;  %v4115_v14 = vsel %vm1927_vm15, 1.0, %v6295_v24 }
 0x35b   : > { %v978_v6 = vadd.f32 %v977_v34, %v760_v57  ;;  %v2095_v15 = vpack.c.bf16 %v4115_v14, %v4111_v59  ;;  %v4123_v59 = vsel %vm1935_vm7, 1.0, %v6295_v24  ;;  %vm1939_vm13 = vcmp.eq.s32.totalorder %v5701_v60, %v5078_v45 }
 0x35c   : > { %3141 = vmatmul.bf16.gmra.mxu2 %v3024_v25  ;;  %3438 = vmatmul.bf16.gmra.mxu3 %v3024_v25  ;;  %vm1943_vm15 = vcmp.eq.s32.totalorder %v5704_v31, %v5078_v45 }
 0x35d   : > { %2259 = vmatmul.bf16.gmra.mxu0 %v2142_v46  ;;  %2556 = vmatmul.bf16.gmra.mxu1 %v2142_v46 }
 0x35f   : > { %v1498_v20 = vpop.f32.mrf.mxu2  ;;  %v1795_v11 = vpop.f32.mrf.mxu3  ;;  %3030 = vxpose.binary.xlu0.c.b16.cont [5/16] %v2973_v51, %v2972_v36, 128  ;;  %v4243_v36 = vsel %vm2809_vm11, 1.0, %v6295_v24  ;;  %v2976_v51 = vpack.c.bf16 %v4242_v47, %v4238_v50  ;;  %v4247_v47 = vsel %vm2813_vm1, 1.0, %v6295_v24 }
 0x360   : > { %v1565_v29 = vadd.f32 %v1498_v20, %v978_v6  ;;  %2148 = vxpose.binary.xlu1.c.b16.cont [5/16] %v2091_v4, %v2090_v40, 128  ;;  %v2094_v4 = vpack.c.bf16 %v4114_v62, %v4110_v61  ;;  %v4122_v61 = vsel %vm1934_vm6, 1.0, %v6295_v24 }
 0x362   : > { %v5929_v63 = vadd.f32 %v1795_v11, %v1565_v29  ;;  %v762_v30 = vpop.f32.mrf.mxu0  ;;  %v979_v16 = vpop.f32.mrf.mxu1  ;;  %v6325_v11 = vld [vmem:[#allocation12_spill] sm:$0xff]  ;;  %v4239_v29 = vsel %vm2805_vm9, 1.0, %v6295_v24 }
 0x363   : > { %v980_v25 = vadd.f32 %v979_v16, %v762_v30 }
 0x367   : > { %v1500_v46 = vpop.f32.mrf.mxu2  ;;  %v1797_v57 = vpop.f32.mrf.mxu3 }
 0x368   : > { %v1566_v9 = vadd.f32 %v1500_v46, %v980_v25 }
 0x36a   : > { %v5934_v34 = vadd.f32 %v1797_v57, %v1566_v9  ;;  %v2225_v6 = vpop.f32.mrf.mxu0  ;;  %v2522_v20 = vpop.f32.mrf.mxu1 }
 0x36b   : > { %v2385_v8 = vadd.f32 %v2225_v6, %v6325_v11 }
 0x36c   : > { %3146 = vmatmul.bf16.gmra.mxu2 %v5752_v37  ;;  %3443 = vmatmul.bf16.gmra.mxu3 %v5752_v37 }
 0x36d   : > { %v2682_v28 = vadd.f32 %v2522_v20, %v2385_v8  ;;  %2264 = vmatmul.bf16.gmra.mxu0 %v5750_v19  ;;  %2561 = vmatmul.bf16.gmra.mxu1 %v5750_v19  ;;  %v2977_v19 = vpack.c.bf16 %v4243_v36, %v4239_v29  ;;  %v4246_v29 = vsel %vm2812_vm0, 1.0, %v6295_v24  ;;  %v4250_v36 = vsel %vm2816_vm2, 1.0, %v6295_v24 }
 0x36f   : > { %v3107_v37 = vpop.f32.mrf.mxu2  ;;  %v3404_v39 = vpop.f32.mrf.mxu3  ;;  %3031 = vxpose.binary.xlu0.c.b16.cont [6/16] %v2977_v19, %v2976_v51, 128  ;;  %v2980_v51 = vpack.c.bf16 %v4250_v36, %v4246_v29  ;;  %v4119_v19 = vsel %vm1931_vm5, 1.0, %v6295_v24 }
 0x370   : > { %v3267_v56 = vadd.f32 %v3107_v37, %v2682_v28  ;;  %2149 = vxpose.binary.xlu1.c.b16.cont [6/16] %v2095_v15, %v2094_v4, 128  ;;  %v6327_v28 = vld [vmem:[#allocation14_spill] sm:$0xff]  ;;  %v2099_v26 = vpack.c.bf16 %v4123_v59, %v4119_v19  ;;  %v6328_v15 = vld [vmem:[#allocation15_spill] sm:$0xff] }
 0x372   : > { %v3564_v40 = vadd.f32 %v3404_v39, %v3267_v56  ;;  %v2227_v30 = vpop.f32.mrf.mxu0  ;;  %v2524_v16 = vpop.f32.mrf.mxu1  ;;  %v4118_v56 = vsel %vm1930_vm4, 1.0, %v6295_v24 }
 0x373   : > { %v2386_v25 = vadd.f32 %v2227_v30, %v6326_v55  ;;  %v2098_v14 = vpack.c.bf16 %v4122_v61, %v4118_v56 }
 0x374   : > { %3628 = vst [vmem:[%s5966_s9] sm:$0xff] %v3564_v40 }
 0x375   : > { %v2683_v46 = vadd.f32 %v2524_v16, %v2386_v25 }
 0x377   : > { %v3109_v57 = vpop.f32.mrf.mxu2  ;;  %v3406_v9 = vpop.f32.mrf.mxu3 }
 0x378   : > { %v3268_v6 = vadd.f32 %v3109_v57, %v2683_v46 }
 0x37a   : > { %v3565_v20 = vadd.f32 %v3406_v9, %v3268_v6  ;;  %v2230_v11 = vpop.f32.mrf.mxu0  ;;  %v2527_v8 = vpop.f32.mrf.mxu1  ;;  %v6329_v6 = vld [vmem:[#allocation16_spill] sm:$0xff] }
 0x37b   : > { %v2387_v37 = vadd.f32 %v2230_v11, %v6327_v28  ;;  %v6330_v11 = vld [vmem:[#allocation48_spill] sm:$0xff] }
 0x37c   : > { %3151 = vmatmul.bf16.gmra.mxu2 %v5760_v2  ;;  %3448 = vmatmul.bf16.gmra.mxu3 %v5760_v2  ;;  %3629 = vst [vmem:[%s5966_s9 + $0x8] sm:$0xff] %v3565_v20  ;;  %vm2820_vm8 = vcmp.eq.s32.totalorder %v6330_v11, %v5075_v42  ;;  %vm2821_vm9 = vcmp.eq.s32.totalorder %v6330_v11, %v5078_v45 }
 0x37d   : > { %v2684_v39 = vadd.f32 %v2527_v8, %v2387_v37  ;;  %2269 = vmatmul.bf16.gmra.mxu0 %v5758_v49  ;;  %2566 = vmatmul.bf16.gmra.mxu1 %v5758_v49  ;;  %v2981_v49 = vpack.c.bf16 %v4251_v35, %v4247_v47  ;;  %v6331_v8 = vld [vmem:[#allocation49_spill] sm:$0xff]  ;;  %v4126_v35 = vsel %vm1938_vm12, 1.0, %v6295_v24 }
 0x37e   : > { %vm2824_vm10 = vcmp.eq.s32.totalorder %v6331_v8, %v5075_v42  ;;  %vm2825_vm11 = vcmp.eq.s32.totalorder %v6331_v8, %v5078_v45  ;;  %v6332_v42 = vld [vmem:[#allocation17_spill] sm:$0xff] }
 0x37f   : > { %v3112_v2 = vpop.f32.mrf.mxu2  ;;  %v3409_v50 = vpop.f32.mrf.mxu3  ;;  %3032 = vxpose.binary.xlu0.c.b16.cont [7/16] %v2981_v49, %v2980_v51, 128  ;;  %v4259_v29 = vsel %vm2825_vm11, 1.0, %v6295_v24  ;;  %v4127_v51 = vsel %vm1939_vm13, 1.0, %v6295_v24  ;;  %v4131_v49 = vsel %vm1943_vm15, 1.0, %v6295_v24 }
 0x380   : > { %v3269_v1 = vadd.f32 %v3112_v2, %v2684_v39  ;;  %2150 = vxpose.binary.xlu1.c.b16.cont [7/16] %v2099_v26, %v2098_v14, 128  ;;  %v4254_v39 = vsel %vm2820_vm8, 1.0, %v6295_v24  ;;  %v4255_v2 = vsel %vm2821_vm9, 1.0, %v6295_v24  ;;  %v2103_v60 = vpack.c.bf16 %v4131_v49, %v4127_v51 }
 0x382   : > { %v3566_v62 = vadd.f32 %v3409_v50, %v3269_v1  ;;  %v2232_v40 = vpop.f32.mrf.mxu0  ;;  %v2529_v4 = vpop.f32.mrf.mxu1  ;;  %v4258_v50 = vsel %vm2824_vm10, 1.0, %v6295_v24  ;;  %v4130_v1 = vsel %vm1942_vm14, 1.0, %v6295_v24  ;;  %v6333_v24 = vld [vmem:[#allocation18_spill] sm:$0xff] }
 0x383   : > { %v2388_v30 = vadd.f32 %v2232_v40, %v6328_v15  ;;  %v2984_v47 = vpack.c.bf16 %v4258_v50, %v4254_v39  ;;  %v2102_v19 = vpack.c.bf16 %v4130_v1, %v4126_v35  ;;  %v6336_v1 = vld [vmem:[#allocation21_spill] sm:$0xff] }
 0x384   : > { %3630 = vst [vmem:[%s5966_s9 + $0x10] sm:$0xff] %v3566_v62 }
 0x385   : > { %v2685_v52 = vadd.f32 %v2529_v4, %v2388_v30 }
 0x387   : > { %v3114_v16 = vpop.f32.mrf.mxu2  ;;  %v3411_v55 = vpop.f32.mrf.mxu3 }
 0x388   : > { %v3270_v25 = vadd.f32 %v3114_v16, %v2685_v52 }
 0x38a   : > { %v3567_v46 = vadd.f32 %v3411_v55, %v3270_v25  ;;  %v2235_v57 = vpop.f32.mrf.mxu0  ;;  %v2532_v9 = vpop.f32.mrf.mxu1 }
 0x38b   : > { %v2389_v20 = vadd.f32 %v2235_v57, %v6329_v6  ;;  %v6334_v6 = vld [vmem:[#allocation19_spill] sm:$0xff] }
 0x38c   : > { %3156 = vmatmul.bf16.gmra.mxu2 %v5766_v44  ;;  %3453 = vmatmul.bf16.gmra.mxu3 %v5766_v44  ;;  %3631 = vst [vmem:[%s5966_s9 + $0x18] sm:$0xff] %v3567_v46 }
 0x38d   : > { %v2686_v28 = vadd.f32 %v2532_v9, %v2389_v20  ;;  %2274 = vmatmul.bf16.gmra.mxu0 %v5770_v7  ;;  %2571 = vmatmul.bf16.gmra.mxu1 %v5770_v7  ;;  %v2985_v7 = vpack.c.bf16 %v4259_v29, %v4255_v2 }
 0x38f   : > { %v3117_v44 = vpop.f32.mrf.mxu2  ;;  %v3414_v37 = vpop.f32.mrf.mxu3  ;;  %3033 = vxpose.binary.xlu0.c.b16.end [8/16] %v2985_v7, %v2984_v47, 128 }
 0x390   : > { %v3271_v36 = vadd.f32 %v3117_v44, %v2686_v28  ;;  %2151 = vxpose.binary.xlu1.c.b16.end [8/16] %v2103_v60, %v2102_v19, 128 }
 0x392   : > { %v3568_v56 = vadd.f32 %v3414_v37, %v3271_v36  ;;  %v2237_v61 = vpop.f32.mrf.mxu0  ;;  %v2534_v59 = vpop.f32.mrf.mxu1 }
 0x393   : > { %v2390_v62 = vadd.f32 %v2237_v61, %v6332_v42 }
 0x394   : > { %3632 = vst [vmem:[%s5966_s9 + $0x20] sm:$0xff] %v3568_v56 }
 0x395   : > { %v2687_v45 = vadd.f32 %v2534_v59, %v2390_v62 }
 0x397   : > { %v3119_v31 = vpop.f32.mrf.mxu2  ;;  %v3416_v14 = vpop.f32.mrf.mxu3 }
 0x398   : > { %v3272_v26 = vadd.f32 %v3119_v31, %v2687_v45 }
 0x39a   : > { %v3569_v40 = vadd.f32 %v3416_v14, %v3272_v26  ;;  %v2240_v4 = vpop.f32.mrf.mxu0  ;;  %v2537_v15 = vpop.f32.mrf.mxu1 }
 0x39b   : > { %v2391_v30 = vadd.f32 %v2240_v4, %v6333_v24  ;;  %v6338_v24 = vld [vmem:[#allocation23_spill] sm:$0xff] }
 0x39c   : > { %3161 = vmatmul.bf16.gmra.mxu2 %v5776_v27  ;;  %3458 = vmatmul.bf16.gmra.mxu3 %v5776_v27  ;;  %3633 = vst [vmem:[%s5966_s9 + $0x28] sm:$0xff] %v3569_v40 }
 0x39d   : > { %v2688_v52 = vadd.f32 %v2537_v15, %v2391_v30  ;;  %2279 = vmatmul.bf16.gmra.mxu0 %v5778_v43  ;;  %2576 = vmatmul.bf16.gmra.mxu1 %v5778_v43  ;;  %v6335_v43 = vld [vmem:[#allocation20_spill] sm:$0xff] }
 0x39f   : > { %v3122_v16 = vpop.f32.mrf.mxu2  ;;  %v3419_v55 = vpop.f32.mrf.mxu3 }
 0x3a0   : > { %v3273_v25 = vadd.f32 %v3122_v16, %v2688_v52 }
 0x3a2   : > { %v3570_v46 = vadd.f32 %v3419_v55, %v3273_v25  ;;  %v2242_v57 = vpop.f32.mrf.mxu0  ;;  %v2539_v9 = vpop.f32.mrf.mxu1 }
 0x3a3   : > { %v2392_v20 = vadd.f32 %v2242_v57, %v6334_v6  ;;  %v3025_v25 = vpop.trf.xlu1 }
 0x3a4   : > { %3634 = vst [vmem:[%s5966_s9 + $0x30] sm:$0xff] %v3570_v46 }
 0x3a5   : > { %v2689_v11 = vadd.f32 %v2539_v9, %v2392_v20 }
 0x3a7   : > { %v3124_v27 = vpop.f32.mrf.mxu2  ;;  %v3421_v8 = vpop.f32.mrf.mxu3 }
 0x3a8   : > { %v3274_v28 = vadd.f32 %v3124_v27, %v2689_v11 }
 0x3aa   : > { %v3571_v44 = vadd.f32 %v3421_v8, %v3274_v28  ;;  %v2245_v37 = vpop.f32.mrf.mxu0  ;;  %v2542_v39 = vpop.f32.mrf.mxu1 }
 0x3ab   : > { %v2393_v2 = vadd.f32 %v2245_v37, %v6335_v43 }
 0x3ac   : > { %3166 = vmatmul.bf16.gmra.mxu2 %v5810_v33  ;;  %3463 = vmatmul.bf16.gmra.mxu3 %v5810_v33  ;;  %3635 = vst [vmem:[%s5966_s9 + $0x38] sm:$0xff] %v3571_v44 }
 0x3ad   : > { %v2690_v50 = vadd.f32 %v2542_v39, %v2393_v2  ;;  %2284 = vmatmul.bf16.gmra.mxu0 %v5812_v21  ;;  %2581 = vmatmul.bf16.gmra.mxu1 %v5812_v21  ;;  %v6337_v21 = vld [vmem:[#allocation22_spill] sm:$0xff]  ;;  %v6340_v2 = vld [vmem:[#allocation25_spill] sm:$0xff] }
 0x3af   : > { %v3127_v29 = vpop.f32.mrf.mxu2  ;;  %v3424_v47 = vpop.f32.mrf.mxu3 }
 0x3b0   : > { %v3275_v36 = vadd.f32 %v3127_v29, %v2690_v50 }
 0x3b2   : > { %v3572_v7 = vadd.f32 %v3424_v47, %v3275_v36  ;;  %v2247_v35 = vpop.f32.mrf.mxu0  ;;  %v2544_v51 = vpop.f32.mrf.mxu1 }
 0x3b3   : > { %v2394_v49 = vadd.f32 %v2247_v35, %v6336_v1 }
 0x3b4   : > { %3636 = vst [vmem:[%s5966_s9 + $0x40] sm:$0xff] %v3572_v7 }
 0x3b5   : > { %v2691_v56 = vadd.f32 %v2544_v51, %v2394_v49  ;;  %v2143_v51 = vpop.trf.xlu2 }
 0x3b7   : > { %v3129_v33 = vpop.f32.mrf.mxu2  ;;  %v3426_v19 = vpop.f32.mrf.mxu3 }
 0x3b8   : > { %v3276_v60 = vadd.f32 %v3129_v33, %v2691_v56  ;;  %v6341_v56 = vld [vmem:[#allocation26_spill] sm:$0xff] }
 0x3ba   : > { %v3573_v61 = vadd.f32 %v3426_v19, %v3276_v60  ;;  %v2250_v59 = vpop.f32.mrf.mxu0  ;;  %v2547_v42 = vpop.f32.mrf.mxu1 }
 0x3bb   : > { %v2395_v62 = vadd.f32 %v2250_v59, %v6337_v21 }
 0x3bc   : > { %3171 = vmatmul.bf16.gmra.mxu2 %v5842_v18  ;;  %3468 = vmatmul.bf16.gmra.mxu3 %v5842_v18  ;;  %3637 = vst [vmem:[%s5966_s9 + $0x48] sm:$0xff] %v3573_v61 }
 0x3bd   : > { %v2692_v45 = vadd.f32 %v2547_v42, %v2395_v62  ;;  %2289 = vmatmul.bf16.gmra.mxu0 %v5846_v41  ;;  %2586 = vmatmul.bf16.gmra.mxu1 %v5846_v41  ;;  %v6339_v41 = vld [vmem:[#allocation24_spill] sm:$0xff] }
 0x3bf   : > { %v3132_v31 = vpop.f32.mrf.mxu2  ;;  %v3429_v14 = vpop.f32.mrf.mxu3 }
 0x3c0   : > { %v3277_v26 = vadd.f32 %v3132_v31, %v2692_v45 }
 0x3c2   : > { %v3574_v40 = vadd.f32 %v3429_v14, %v3277_v26  ;;  %v2252_v4 = vpop.f32.mrf.mxu0  ;;  %v2549_v15 = vpop.f32.mrf.mxu1  ;;  %v6342_v14 = vld [vmem:[#allocation27_spill] sm:$0xff] }
 0x3c3   : > { %v2396_v30 = vadd.f32 %v2252_v4, %v6338_v24 }
 0x3c4   : > { %3638 = vst [vmem:[%s5966_s9 + $0x50] sm:$0xff] %v3574_v40 }
 0x3c5   : > { %v2693_v52 = vadd.f32 %v2549_v15, %v2396_v30 }
 0x3c7   : > { %v3134_v18 = vpop.f32.mrf.mxu2  ;;  %v3431_v16 = vpop.f32.mrf.mxu3 }
 0x3c8   : > { %v3278_v55 = vadd.f32 %v3134_v18, %v2693_v52 }
 0x3ca   : > { %v3575_v46 = vadd.f32 %v3431_v16, %v3278_v55  ;;  %v2255_v57 = vpop.f32.mrf.mxu0  ;;  %v2552_v9 = vpop.f32.mrf.mxu1 }
 0x3cb   : > { %v2397_v6 = vadd.f32 %v2255_v57, %v6339_v41  ;;  %v3034_v8 = vpop.trf.xlu0 }
 0x3cc   : > { %3176 = vmatmul.bf16.gmra.mxu2 %v5876_v54  ;;  %3473 = vmatmul.bf16.gmra.mxu3 %v5876_v54  ;;  %3639 = vst [vmem:[%s5966_s9 + $0x58] sm:$0xff] %v3575_v46  ;;  %v2152_v44 = vpop.trf.xlu1 }
 0x3cd   : > { %v2694_v20 = vadd.f32 %v2552_v9, %v2397_v6  ;;  %2294 = vmatmul.bf16.gmra.mxu0 %v5892_v17  ;;  %2591 = vmatmul.bf16.gmra.mxu1 %v5892_v17 }
 0x3cf   : > { %v3137_v11 = vpop.f32.mrf.mxu2  ;;  %v3434_v27 = vpop.f32.mrf.mxu3 }
 0x3d0   : > { %v3279_v28 = vadd.f32 %v3137_v11, %v2694_v20 }
 0x3d2   : > { %v3576_v37 = vadd.f32 %v3434_v27, %v3279_v28  ;;  %v2257_v39 = vpop.f32.mrf.mxu0  ;;  %v2554_v43 = vpop.f32.mrf.mxu1 }
 0x3d3   : > { %v2398_v54 = vadd.f32 %v2257_v39, %v6340_v2  ;;  %v6066_v36 = vpop.trf.xlu0  ;;  %v6344_v39 = vld [vmem:[#allocation29_spill] sm:$0xff] }
 0x3d4   : > { %3640 = vst [vmem:[%s5966_s9 + $0x60] sm:$0xff] %v3576_v37  ;;  %v6068_v35 = vpop.trf.xlu1 }
 0x3d5   : > { %v2695_v50 = vadd.f32 %v2554_v43, %v2398_v54 }
 0x3d7   : > { %v3139_v29 = vpop.f32.mrf.mxu2  ;;  %v3436_v47 = vpop.f32.mrf.mxu3 }
 0x3d8   : > { %v3280_v7 = vadd.f32 %v3139_v29, %v2695_v50 }
 0x3da   : > { %v3577_v17 = vadd.f32 %v3436_v47, %v3280_v7  ;;  %v2260_v1 = vpop.f32.mrf.mxu0  ;;  %v2557_v49 = vpop.f32.mrf.mxu1 }
 0x3db   : > { %v2399_v33 = vadd.f32 %v2260_v1, %v6341_v56  ;;  %v3036_v59 = vpop.trf.xlu0 }
 0x3dc   : > { %3181 = vmatmul.bf16.gmra.mxu2 %v3025_v25  ;;  %3478 = vmatmul.bf16.gmra.mxu3 %v3025_v25  ;;  %3641 = vst [vmem:[%s5966_s9 + $0x68] sm:$0xff] %v3577_v17  ;;  %v2154_v21 = vpop.trf.xlu1  ;;  %v6343_v25 = vld [vmem:[#allocation28_spill] sm:$0xff] }
 0x3dd   : > { %v2696_v19 = vadd.f32 %v2557_v49, %v2399_v33  ;;  %2299 = vmatmul.bf16.gmra.mxu0 %v2143_v51  ;;  %2596 = vmatmul.bf16.gmra.mxu1 %v2143_v51  ;;  %v6345_v51 = vld [vmem:[#allocation30_spill] sm:$0xff] }
 0x3df   : > { %v3142_v60 = vpop.f32.mrf.mxu2  ;;  %v3439_v61 = vpop.f32.mrf.mxu3 }
 0x3e0   : > { %v3281_v42 = vadd.f32 %v3142_v60, %v2696_v19 }
 0x3e2   : > { %v3578_v62 = vadd.f32 %v3439_v61, %v3281_v42  ;;  %v2262_v45 = vpop.f32.mrf.mxu0  ;;  %v2559_v31 = vpop.f32.mrf.mxu1 }
 0x3e3   : > { %v2400_v26 = vadd.f32 %v2262_v45, %v6342_v14  ;;  %v6074_v24 = vpop.trf.xlu0  ;;  %v6346_v45 = vld [vmem:[#allocation31_spill] sm:$0xff] }
 0x3e4   : > { %3642 = vst [vmem:[%s5966_s9 + $0x70] sm:$0xff] %v3578_v62  ;;  %v6076_v52 = vpop.trf.xlu1 }
 0x3e5   : > { %v2697_v40 = vadd.f32 %v2559_v31, %v2400_v26 }
 0x3e7   : > { %v3144_v4 = vpop.f32.mrf.mxu2  ;;  %v3441_v15 = vpop.f32.mrf.mxu3 }
 0x3e8   : > { %v3282_v30 = vadd.f32 %v3144_v4, %v2697_v40 }
 0x3ea   : > { %v3579_v18 = vadd.f32 %v3441_v15, %v3282_v30  ;;  %v2265_v16 = vpop.f32.mrf.mxu0  ;;  %v2562_v55 = vpop.f32.mrf.mxu1 }
 0x3eb   : > { %v2401_v46 = vadd.f32 %v2265_v16, %v6343_v25  ;;  %v3038_v6 = vpop.trf.xlu0 }
 0x3ec   : > { %3186 = vmatmul.bf16.gmra.mxu2 %v3034_v8  ;;  %3483 = vmatmul.bf16.gmra.mxu3 %v3034_v8  ;;  %3643 = vst [vmem:[%s5966_s9 + $0x78] sm:$0xff] %v3579_v18  ;;  %v2156_v11 = vpop.trf.xlu1 }
 0x3ed   : > { %v2698_v57 = vadd.f32 %v2562_v55, %v2401_v46  ;;  %2304 = vmatmul.bf16.gmra.mxu0 %v2152_v44  ;;  %2601 = vmatmul.bf16.gmra.mxu1 %v2152_v44 }
 0x3ef   : > { %v3147_v9 = vpop.f32.mrf.mxu2  ;;  %v3444_v41 = vpop.f32.mrf.mxu3 }
 0x3f0   : > { %v3283_v20 = vadd.f32 %v3147_v9, %v2698_v57 }
 0x3f2   : > { %v3580_v27 = vadd.f32 %v3444_v41, %v3283_v20  ;;  %v2267_v28 = vpop.f32.mrf.mxu0  ;;  %v2564_v37 = vpop.f32.mrf.mxu1 }
 0x3f3   : > { %v2402_v43 = vadd.f32 %v2267_v28, %v6344_v39  ;;  %v6082_v29 = vpop.trf.xlu0 }
 0x3f4   : > { %3644 = vst [vmem:[%s5966_s9 + $0x80] sm:$0xff] %v3580_v27  ;;  %v6084_v44 = vpop.trf.xlu1 }
 0x3f5   : > { %v2699_v2 = vadd.f32 %v2564_v37, %v2402_v43  ;;  %v6348_v37 = vld [vmem:[#allocation33_spill] sm:$0xff] }
 0x3f7   : > { %v3149_v8 = vpop.f32.mrf.mxu2  ;;  %v3446_v54 = vpop.f32.mrf.mxu3 }
 0x3f8   : > { %v3284_v50 = vadd.f32 %v3149_v8, %v2699_v2 }
 0x3fa   : > { %v3581_v47 = vadd.f32 %v3446_v54, %v3284_v50  ;;  %v2270_v7 = vpop.f32.mrf.mxu0  ;;  %v2567_v17 = vpop.f32.mrf.mxu1 }
 0x3fb   : > { %v2403_v1 = vadd.f32 %v2270_v7, %v6345_v51  ;;  %v3040_v61 = vpop.trf.xlu0 }
 0x3fc   : > { %3191 = vmatmul.bf16.gmra.mxu2 %v3036_v59  ;;  %3488 = vmatmul.bf16.gmra.mxu3 %v3036_v59  ;;  %3645 = vst [vmem:[%s5966_s9 + $0x88] sm:$0xff] %v3581_v47  ;;  %v2158_v14 = vpop.trf.xlu1 }
 0x3fd   : > { %v2700_v49 = vadd.f32 %v2567_v17, %v2403_v1  ;;  %2309 = vmatmul.bf16.gmra.mxu0 %v2154_v21  ;;  %2606 = vmatmul.bf16.gmra.mxu1 %v2154_v21  ;;  %v6347_v21 = vld [vmem:[#allocation32_spill] sm:$0xff]  ;;  %v6349_v17 = vld [vmem:[#allocation34_spill] sm:$0xff] }
 0x3ff   : > { %v3152_v56 = vpop.f32.mrf.mxu2  ;;  %v3449_v33 = vpop.f32.mrf.mxu3 }
 0x400   : > { %v3285_v19 = vadd.f32 %v3152_v56, %v2700_v49 }
 0x402   : > { %v3582_v60 = vadd.f32 %v3449_v33, %v3285_v19  ;;  %v2272_v42 = vpop.f32.mrf.mxu0  ;;  %v2569_v62 = vpop.f32.mrf.mxu1 }
 0x403   : > { %v2404_v31 = vadd.f32 %v2272_v42, %v6346_v45  ;;  %v6092_v55 = vpop.trf.xlu0  ;;  %v6350_v45 = vld [vmem:[#allocation35_spill] sm:$0xff] }
 0x404   : > { %3646 = vst [vmem:[%s5966_s9 + $0x90] sm:$0xff] %v3582_v60  ;;  %v6094_v41 = vpop.trf.xlu1 }
 0x405   : > { %v2701_v26 = vadd.f32 %v2569_v62, %v2404_v31 }
 0x407   : > { %v3154_v59 = vpop.f32.mrf.mxu2  ;;  %v3451_v40 = vpop.f32.mrf.mxu3 }
 0x408   : > { %v3286_v4 = vadd.f32 %v3154_v59, %v2701_v26 }
 0x40a   : > { %v3583_v15 = vadd.f32 %v3451_v40, %v3286_v4  ;;  %v2275_v30 = vpop.f32.mrf.mxu0  ;;  %v2572_v18 = vpop.f32.mrf.mxu1 }
 0x40b   : > { %v2405_v16 = vadd.f32 %v2275_v30, %v6347_v21  ;;  %v3042_v54 = vpop.trf.xlu0 }
 0x40c   : > { %3196 = vmatmul.bf16.gmra.mxu2 %v3038_v6  ;;  %3493 = vmatmul.bf16.gmra.mxu3 %v3038_v6  ;;  %3647 = vst [vmem:[%s5966_s9 + $0x98] sm:$0xff] %v3583_v15  ;;  %v2160_v47 = vpop.trf.xlu1 }
 0x40d   : > { %v2702_v25 = vadd.f32 %v2572_v18, %v2405_v16  ;;  %2314 = vmatmul.bf16.gmra.mxu0 %v2156_v11  ;;  %2611 = vmatmul.bf16.gmra.mxu1 %v2156_v11  ;;  %v6351_v18 = vld [vmem:[#allocation36_spill] sm:$0xff] }
 0x40f   : > { %v3157_v46 = vpop.f32.mrf.mxu2  ;;  %v3454_v57 = vpop.f32.mrf.mxu3 }
 0x410   : > { %v3287_v9 = vadd.f32 %v3157_v46, %v2702_v25 }
 0x412   : > { %v3584_v20 = vadd.f32 %v3454_v57, %v3287_v9  ;;  %v2277_v27 = vpop.f32.mrf.mxu0  ;;  %v2574_v28 = vpop.f32.mrf.mxu1 }
 0x413   : > { %v2406_v6 = vadd.f32 %v2277_v27, %v6348_v37  ;;  %v6100_v60 = vpop.trf.xlu0 }
 0x414   : > { %3648 = vst [vmem:[%s5966_s9 + $0xa0] sm:$0xff] %v3584_v20  ;;  %v6104_v26 = vpop.trf.xlu1 }
 0x415   : > { %v2703_v39 = vadd.f32 %v2574_v28, %v2406_v6  ;;  %v6352_v6 = vld [vmem:[#allocation37_spill] sm:$0xff] }
 0x417   : > { %v3159_v43 = vpop.f32.mrf.mxu2  ;;  %v3456_v2 = vpop.f32.mrf.mxu3 }
 0x418   : > { %v3288_v8 = vadd.f32 %v3159_v43, %v2703_v39 }
 0x41a   : > { %v3585_v50 = vadd.f32 %v3456_v2, %v3288_v8  ;;  %v2280_v11 = vpop.f32.mrf.mxu0  ;;  %v2577_v7 = vpop.f32.mrf.mxu1 }
 0x41b   : > { %v2407_v51 = vadd.f32 %v2280_v11, %v6349_v17  ;;  %v3044_v16 = vpop.trf.xlu0 }
 0x41c   : > { %3201 = vmatmul.bf16.gmra.mxu2 %v3040_v61  ;;  %3498 = vmatmul.bf16.gmra.mxu3 %v3040_v61  ;;  %3649 = vst [vmem:[%s5966_s9 + $0xa8] sm:$0xff] %v3585_v50  ;;  %v2162_v20 = vpop.trf.xlu1 }
 0x41d   : > { %v2704_v1 = vadd.f32 %v2577_v7, %v2407_v51  ;;  %2319 = vmatmul.bf16.gmra.mxu0 %v2158_v14  ;;  %2616 = vmatmul.bf16.gmra.mxu1 %v2158_v14  ;;  %v6353_v51 = vld [vmem:[#allocation38_spill] sm:$0xff] }
 0x41f   : > { %v3162_v49 = vpop.f32.mrf.mxu2  ;;  %v3459_v56 = vpop.f32.mrf.mxu3 }
 0x420   : > { %v3289_v33 = vadd.f32 %v3162_v49, %v2704_v1 }
 0x422   : > { %v3586_v19 = vadd.f32 %v3459_v56, %v3289_v33  ;;  %v2282_v42 = vpop.f32.mrf.mxu0  ;;  %v2579_v62 = vpop.f32.mrf.mxu1 }
 0x423   : > { %v2408_v31 = vadd.f32 %v2282_v42, %v6350_v45  ;;  %v6110_v50 = vpop.trf.xlu0 }
 0x424   : > { %3650 = vst [vmem:[%s5966_s9 + $0xb0] sm:$0xff] %v3586_v19  ;;  %v6112_v7 = vpop.trf.xlu1 }
 0x425   : > { %v2705_v61 = vadd.f32 %v2579_v62, %v2408_v31 }
 0x427   : > { %v3164_v59 = vpop.f32.mrf.mxu2  ;;  %v3461_v40 = vpop.f32.mrf.mxu3 }
 0x428   : > { %v3290_v4 = vadd.f32 %v3164_v59, %v2705_v61  ;;  %v6354_v61 = vld [vmem:[#allocation39_spill] sm:$0xff] }
 0x42a   : > { %v3587_v15 = vadd.f32 %v3461_v40, %v3290_v4  ;;  %v2285_v14 = vpop.f32.mrf.mxu0  ;;  %v2582_v30 = vpop.f32.mrf.mxu1 }
 0x42b   : > { %v2409_v21 = vadd.f32 %v2285_v14, %v6351_v18  ;;  %v3046_v62 = vpop.trf.xlu0 }
 0x42c   : > { %3206 = vmatmul.bf16.gmra.mxu2 %v3042_v54  ;;  %3503 = vmatmul.bf16.gmra.mxu3 %v3042_v54  ;;  %3651 = vst [vmem:[%s5966_s9 + $0xb8] sm:$0xff] %v3587_v15  ;;  %v2164_v40 = vpop.trf.xlu1 }
 0x42d   : > { %v2706_v25 = vadd.f32 %v2582_v30, %v2409_v21  ;;  %2324 = vmatmul.bf16.gmra.mxu0 %v2160_v47  ;;  %2621 = vmatmul.bf16.gmra.mxu1 %v2160_v47 }
 0x42f   : > { %v3167_v46 = vpop.f32.mrf.mxu2  ;;  %v3464_v57 = vpop.f32.mrf.mxu3 }
 0x430   : > { %v3291_v9 = vadd.f32 %v3167_v46, %v2706_v25  ;;  %v6355_v25 = vld [vmem:[#allocation40_spill] sm:$0xff] }
 0x432   : > { %v3588_v27 = vadd.f32 %v3464_v57, %v3291_v9  ;;  %v2287_v28 = vpop.f32.mrf.mxu0  ;;  %v2584_v37 = vpop.f32.mrf.mxu1 }
 0x433   : > { %v2410_v39 = vadd.f32 %v2287_v28, %v6352_v6  ;;  %v6120_v57 = vpop.trf.xlu0 }
 0x434   : > { %3652 = vst [vmem:[%s5966_s9 + $0xc0] sm:$0xff] %v3588_v27 }
 0x435   : > { %v2707_v43 = vadd.f32 %v2584_v37, %v2410_v39  ;;  %v6122_v37 = vpop.trf.xlu1 }
 0x437   : > { %v3169_v2 = vpop.f32.mrf.mxu2  ;;  %v3466_v8 = vpop.f32.mrf.mxu3 }
 0x438   : > { %v3292_v54 = vadd.f32 %v3169_v2, %v2707_v43  ;;  %v6356_v2 = vld [vmem:[#allocation41_spill] sm:$0xff] }
 0x43a   : > { %v3589_v11 = vadd.f32 %v3466_v8, %v3292_v54  ;;  %v2290_v47 = vpop.f32.mrf.mxu0  ;;  %v2587_v17 = vpop.f32.mrf.mxu1 }
 0x43b   : > { %v2411_v1 = vadd.f32 %v2290_v47, %v6353_v51  ;;  %v3048_v51 = vpop.trf.xlu0 }
 0x43c   : > { %3211 = vmatmul.bf16.gmra.mxu2 %v3044_v16  ;;  %3508 = vmatmul.bf16.gmra.mxu3 %v3044_v16  ;;  %3653 = vst [vmem:[%s5966_s9 + $0xc8] sm:$0xff] %v3589_v11 }
 0x43d   : > { %v2708_v49 = vadd.f32 %v2587_v17, %v2411_v1  ;;  %2329 = vmatmul.bf16.gmra.mxu0 %v2162_v20  ;;  %2626 = vmatmul.bf16.gmra.mxu1 %v2162_v20 }
 0x43f   : > { %v3172_v56 = vpop.f32.mrf.mxu2  ;;  %v3469_v33 = vpop.f32.mrf.mxu3 }
 0x440   : > { %v3293_v19 = vadd.f32 %v3172_v56, %v2708_v49  ;;  %v2166_v49 = vpop.trf.xlu1 }
 0x442   : > { %v3590_v42 = vadd.f32 %v3469_v33, %v3293_v19  ;;  %v2292_v45 = vpop.f32.mrf.mxu0  ;;  %v2589_v31 = vpop.f32.mrf.mxu1  ;;  %v6357_v19 = vld [vmem:[#allocation42_spill] sm:$0xff] }
 0x443   : > { %v2412_v59 = vadd.f32 %v2292_v45, %v6354_v61 }
 0x444   : > { %3654 = vst [vmem:[%s5966_s9 + $0xd0] sm:$0xff] %v3590_v42 }
 0x445   : > { %v2709_v4 = vadd.f32 %v2589_v31, %v2412_v59 }
 0x447   : > { %v3174_v15 = vpop.f32.mrf.mxu2  ;;  %v3471_v14 = vpop.f32.mrf.mxu3 }
 0x448   : > { %v3294_v30 = vadd.f32 %v3174_v15, %v2709_v4  ;;  %v6358_v15 = vld [vmem:[#allocation43_spill] sm:$0xff] }
 0x44a   : > { %v3591_v18 = vadd.f32 %v3471_v14, %v3294_v30  ;;  %v2295_v21 = vpop.f32.mrf.mxu0  ;;  %v2592_v16 = vpop.f32.mrf.mxu1 }
 0x44b   : > { %v2413_v46 = vadd.f32 %v2295_v21, %v6355_v25 }
 0x44c   : > { %3216 = vmatmul.bf16.gmra.mxu2 %v3046_v62  ;;  %3513 = vmatmul.bf16.gmra.mxu3 %v3046_v62  ;;  %3655 = vst [vmem:[%s5966_s9 + $0xd8] sm:$0xff] %v3591_v18 }
 0x44d   : > { %v2710_v9 = vadd.f32 %v2592_v16, %v2413_v46  ;;  %2334 = vmatmul.bf16.gmra.mxu0 %v2164_v40  ;;  %2631 = vmatmul.bf16.gmra.mxu1 %v2164_v40 }
 0x44f   : > { %v3177_v20 = vpop.f32.mrf.mxu2  ;;  %v3474_v27 = vpop.f32.mrf.mxu3 }
 0x450   : > { %v3295_v28 = vadd.f32 %v3177_v20, %v2710_v9  ;;  %v6359_v20 = vld [vmem:[#allocation44_spill] sm:$0xff] }
 0x452   : > { %v3592_v6 = vadd.f32 %v3474_v27, %v3295_v28  ;;  %v2297_v39 = vpop.f32.mrf.mxu0  ;;  %v2594_v43 = vpop.f32.mrf.mxu1 }
 0x453   : > { %v2414_v8 = vadd.f32 %v2297_v39, %v6356_v2 }
 0x454   : > { %3656 = vst [vmem:[%s5966_s9 + $0xe0] sm:$0xff] %v3592_v6 }
 0x455   : > { %v2711_v54 = vadd.f32 %v2594_v43, %v2414_v8 }
 0x457   : > { %v3179_v11 = vpop.f32.mrf.mxu2  ;;  %v3476_v47 = vpop.f32.mrf.mxu3 }
 0x458   : > { %v3296_v17 = vadd.f32 %v3179_v11, %v2711_v54  ;;  %v6360_v11 = vld [vmem:[#allocation45_spill] sm:$0xff] }
 0x45a   : > { %v3593_v1 = vadd.f32 %v3476_v47, %v3296_v17  ;;  %v2300_v56 = vpop.f32.mrf.mxu0  ;;  %v2597_v33 = vpop.f32.mrf.mxu1 }
 0x45b   : > { %v2415_v42 = vadd.f32 %v2300_v56, %v6357_v19 }
 0x45c   : > { %3221 = vmatmul.bf16.gmra.mxu2 %v3048_v51  ;;  %3518 = vmatmul.bf16.gmra.mxu3 %v3048_v51  ;;  %3657 = vst [vmem:[%s5966_s9 + $0xe8] sm:$0xff] %v3593_v1 }
 0x45d   : > { %v2712_v62 = vadd.f32 %v2597_v33, %v2415_v42  ;;  %2339 = vmatmul.bf16.gmra.mxu0 %v2166_v49  ;;  %2636 = vmatmul.bf16.gmra.mxu1 %v2166_v49 }
 0x45f   : > { %v3182_v45 = vpop.f32.mrf.mxu2  ;;  %v3479_v31 = vpop.f32.mrf.mxu3 }
 0x460   : > { %v3297_v61 = vadd.f32 %v3182_v45, %v2712_v62 }
 0x462   : > { %v3594_v59 = vadd.f32 %v3479_v31, %v3297_v61  ;;  %v2302_v40 = vpop.f32.mrf.mxu0  ;;  %v2599_v4 = vpop.f32.mrf.mxu1 }
 0x463   : > { %v2416_v14 = vadd.f32 %v2302_v40, %v6358_v15 }
 0x464   : > { %3658 = vst [vmem:[%s5966_s9 + $0xf0] sm:$0xff] %v3594_v59 }
 0x465   : > { %v2713_v30 = vadd.f32 %v2599_v4, %v2416_v14  ;;  %v6362_v4 = vld [vmem:[#allocation47_spill] sm:$0xff] }
 0x467   : > { %v3184_v18 = vpop.f32.mrf.mxu2  ;;  %v3481_v21 = vpop.f32.mrf.mxu3 }
 0x468   : > { %v3298_v16 = vadd.f32 %v3184_v18, %v2713_v30 }
 0x46a   : > { %v3595_v25 = vadd.f32 %v3481_v21, %v3298_v16  ;;  %v2305_v46 = vpop.f32.mrf.mxu0  ;;  %v2602_v9 = vpop.f32.mrf.mxu1 }
 0x46b   : > { %v2417_v27 = vadd.f32 %v2305_v46, %v6359_v20 }
 0x46c   : > { %3226 = vmatmul.bf16.gmra.mxu2 %v6066_v36  ;;  %3523 = vmatmul.bf16.gmra.mxu3 %v6066_v36  ;;  %3659 = vst [vmem:[%s5966_s9 + $0xf8] sm:$0xff] %v3595_v25 }
 0x46d   : > { %v2714_v28 = vadd.f32 %v2602_v9, %v2417_v27  ;;  %2344 = vmatmul.bf16.gmra.mxu0 %v6068_v35  ;;  %2641 = vmatmul.bf16.gmra.mxu1 %v6068_v35  ;;  %v6361_v35 = vld [vmem:[#allocation46_spill] sm:$0xff] }
 0x46f   : > { %v3187_v6 = vpop.f32.mrf.mxu2  ;;  %v3484_v39 = vpop.f32.mrf.mxu3 }
 0x470   : > { %v3299_v43 = vadd.f32 %v3187_v6, %v2714_v28 }
 0x472   : > { %v3596_v2 = vadd.f32 %v3484_v39, %v3299_v43  ;;  %v2307_v8 = vpop.f32.mrf.mxu0  ;;  %v2604_v54 = vpop.f32.mrf.mxu1 }
 0x473   : > { %v2418_v47 = vadd.f32 %v2307_v8, %v6360_v11 }
 0x474   : > { %3660 = vst [vmem:[%s5966_s9 + $0x100] sm:$0xff] %v3596_v2 }
 0x475   : > { %v2715_v17 = vadd.f32 %v2604_v54, %v2418_v47 }
 0x477   : > { %v3189_v36 = vpop.f32.mrf.mxu2  ;;  %v3486_v51 = vpop.f32.mrf.mxu3 }
 0x478   : > { %v3300_v1 = vadd.f32 %v3189_v36, %v2715_v17 }
 0x47a   : > { %v3597_v49 = vadd.f32 %v3486_v51, %v3300_v1  ;;  %v2310_v56 = vpop.f32.mrf.mxu0  ;;  %v2607_v33 = vpop.f32.mrf.mxu1 }
 0x47b   : > { %v2419_v19 = vadd.f32 %v2310_v56, %v6361_v35 }
 0x47c   : > { %3231 = vmatmul.bf16.gmra.mxu2 %v6074_v24  ;;  %3528 = vmatmul.bf16.gmra.mxu3 %v6074_v24  ;;  %3661 = vst [vmem:[%s5966_s9 + $0x108] sm:$0xff] %v3597_v49 }
 0x47d   : > { %v2716_v42 = vadd.f32 %v2607_v33, %v2419_v19  ;;  %2349 = vmatmul.bf16.gmra.mxu0 %v6076_v52  ;;  %2646 = vmatmul.bf16.gmra.mxu1 %v6076_v52 }
 0x47f   : > { %v3192_v62 = vpop.f32.mrf.mxu2  ;;  %v3489_v45 = vpop.f32.mrf.mxu3 }
 0x480   : > { %v3301_v31 = vadd.f32 %v3192_v62, %v2716_v42 }
 0x482   : > { %v3598_v61 = vadd.f32 %v3489_v45, %v3301_v31  ;;  %v2312_v59 = vpop.f32.mrf.mxu0  ;;  %v2609_v40 = vpop.f32.mrf.mxu1 }
 0x483   : > { %v2420_v15 = vadd.f32 %v2312_v59, %v6362_v4 }
 0x484   : > { %3662 = vst [vmem:[%s5966_s9 + $0x110] sm:$0xff] %v3598_v61 }
 0x485   : > { %v2717_v14 = vadd.f32 %v2609_v40, %v2420_v15 }
 0x487   : > { %v3194_v24 = vpop.f32.mrf.mxu2  ;;  %v3491_v30 = vpop.f32.mrf.mxu3 }
 0x488   : > { %v3302_v18 = vadd.f32 %v3194_v24, %v2717_v14  ;;  %v6364_v24 = vld [vmem:[#allocation51_spill] sm:$0xff] }
 0x48a   : > { %v3599_v21 = vadd.f32 %v3491_v30, %v3302_v18  ;;  %v2315_v16 = vpop.f32.mrf.mxu0  ;;  %v2612_v25 = vpop.f32.mrf.mxu1 }
 0x48b   : > { %v2421_v52 = vadd.f32 %v2315_v16, %v5698_v48 }
 0x48c   : > { %3236 = vmatmul.bf16.gmra.mxu2 %v6082_v29  ;;  %3533 = vmatmul.bf16.gmra.mxu3 %v6082_v29  ;;  %3663 = vst [vmem:[%s5966_s9 + $0x118] sm:$0xff] %v3599_v21 }
 0x48d   : > { %v2718_v46 = vadd.f32 %v2612_v25, %v2421_v52  ;;  %2354 = vmatmul.bf16.gmra.mxu0 %v6084_v44  ;;  %2651 = vmatmul.bf16.gmra.mxu1 %v6084_v44 }
 0x48f   : > { %v3197_v9 = vpop.f32.mrf.mxu2  ;;  %v3494_v20 = vpop.f32.mrf.mxu3 }
 0x490   : > { %v3303_v27 = vadd.f32 %v3197_v9, %v2718_v46 }
 0x492   : > { %v3600_v28 = vadd.f32 %v3494_v20, %v3303_v27  ;;  %v2317_v6 = vpop.f32.mrf.mxu0  ;;  %v2614_v39 = vpop.f32.mrf.mxu1 }
 0x493   : > { %v2422_v43 = vadd.f32 %v2317_v6, %v5714_v32 }
 0x494   : > { %3664 = vst [vmem:[%s5966_s9 + $0x120] sm:$0xff] %v3600_v28 }
 0x495   : > { %v2719_v2 = vadd.f32 %v2614_v39, %v2422_v43 }
 0x497   : > { %v3199_v29 = vpop.f32.mrf.mxu2  ;;  %v3496_v8 = vpop.f32.mrf.mxu3 }
 0x498   : > { %v3304_v54 = vadd.f32 %v3199_v29, %v2719_v2  ;;  %v6366_v29 = vld [vmem:[#allocation53_spill] sm:$0xff] }
 0x49a   : > { %v3601_v48 = vadd.f32 %v3496_v8, %v3304_v54  ;;  %v2320_v11 = vpop.f32.mrf.mxu0  ;;  %v2617_v47 = vpop.f32.mrf.mxu1 }
 0x49b   : > { %v2423_v44 = vadd.f32 %v2320_v11, %v5724_v53 }
 0x49c   : > { %3241 = vmatmul.bf16.gmra.mxu2 %v6092_v55  ;;  %3538 = vmatmul.bf16.gmra.mxu3 %v6092_v55  ;;  %3665 = vst [vmem:[%s5966_s9 + $0x128] sm:$0xff] %v3601_v48 }
 0x49d   : > { %v2720_v17 = vadd.f32 %v2617_v47, %v2423_v44  ;;  %2359 = vmatmul.bf16.gmra.mxu0 %v6094_v41  ;;  %2656 = vmatmul.bf16.gmra.mxu1 %v6094_v41  ;;  %v6363_v41 = vld [vmem:[#allocation50_spill] sm:$0xff] }
 0x49f   : > { %v3202_v32 = vpop.f32.mrf.mxu2  ;;  %v3499_v36 = vpop.f32.mrf.mxu3 }
 0x4a0   : > { %v3305_v51 = vadd.f32 %v3202_v32, %v2720_v17 }
 0x4a2   : > { %v3602_v1 = vadd.f32 %v3499_v36, %v3305_v51  ;;  %v2322_v49 = vpop.f32.mrf.mxu0  ;;  %v2619_v56 = vpop.f32.mrf.mxu1 }
 0x4a3   : > { %v2424_v33 = vadd.f32 %v2322_v49, %v5726_v0 }
 0x4a4   : > { %3666 = vst [vmem:[%s5966_s9 + $0x130] sm:$0xff] %v3602_v1 }
 0x4a5   : > { %v2721_v35 = vadd.f32 %v2619_v56, %v2424_v33 }
 0x4a7   : > { %v3204_v55 = vpop.f32.mrf.mxu2  ;;  %v3501_v19 = vpop.f32.mrf.mxu3 }
 0x4a8   : > { %v3306_v42 = vadd.f32 %v3204_v55, %v2721_v35  ;;  %v6368_v55 = vld [vmem:[#allocation55_spill] sm:$0xff] }
 0x4aa   : > { %v3603_v53 = vadd.f32 %v3501_v19, %v3306_v42  ;;  %v2325_v62 = vpop.f32.mrf.mxu0  ;;  %v2622_v45 = vpop.f32.mrf.mxu1 }
 0x4ab   : > { %v2425_v31 = vadd.f32 %v2325_v62, %v6363_v41 }
 0x4ac   : > { %3246 = vmatmul.bf16.gmra.mxu2 %v6100_v60  ;;  %3543 = vmatmul.bf16.gmra.mxu3 %v6100_v60  ;;  %3667 = vst [vmem:[%s5966_s9 + $0x138] sm:$0xff] %v3603_v53 }
 0x4ad   : > { %v2722_v61 = vadd.f32 %v2622_v45, %v2425_v31  ;;  %2364 = vmatmul.bf16.gmra.mxu0 %v6104_v26  ;;  %2661 = vmatmul.bf16.gmra.mxu1 %v6104_v26  ;;  %v6365_v26 = vld [vmem:[#allocation52_spill] sm:$0xff]  ;;  %v3049_v45 = vpop.trf.xlu0  ;;  %v2167_v31 = vpop.trf.xlu1 }
 0x4af   : > { %v3207_v0 = vpop.f32.mrf.mxu2  ;;  %v3504_v59 = vpop.f32.mrf.mxu3 }
 0x4b0   : > { %v3307_v40 = vadd.f32 %v3207_v0, %v2722_v61  ;;  %v6369_v0 = vld [vmem:[#allocation56_spill] sm:$0xff] }
 0x4b2   : > { %v3604_v4 = vadd.f32 %v3504_v59, %v3307_v40  ;;  %v2327_v15 = vpop.f32.mrf.mxu0  ;;  %v2624_v14 = vpop.f32.mrf.mxu1 }
 0x4b3   : > { %v2426_v30 = vadd.f32 %v2327_v15, %v6364_v24 }
 0x4b4   : > { %3668 = vst [vmem:[%s5966_s9 + $0x140] sm:$0xff] %v3604_v4 }
 0x4b5   : > { %v2723_v18 = vadd.f32 %v2624_v14, %v2426_v30 }
 0x4b7   : > { %v3209_v60 = vpop.f32.mrf.mxu2  ;;  %v3506_v21 = vpop.f32.mrf.mxu3 }
 0x4b8   : > { %v3308_v16 = vadd.f32 %v3209_v60, %v2723_v18  ;;  %v6370_v60 = vld [vmem:[#allocation57_spill] sm:$0xff] }
 0x4ba   : > { %v3605_v25 = vadd.f32 %v3506_v21, %v3308_v16  ;;  %v2330_v52 = vpop.f32.mrf.mxu0  ;;  %v2627_v46 = vpop.f32.mrf.mxu1 }
 0x4bb   : > { %v2427_v9 = vadd.f32 %v2330_v52, %v6365_v26 }
 0x4bc   : > { %3251 = vmatmul.bf16.gmra.mxu2 %v6110_v50  ;;  %3548 = vmatmul.bf16.gmra.mxu3 %v6110_v50  ;;  %3669 = vst [vmem:[%s5966_s9 + $0x148] sm:$0xff] %v3605_v25 }
 0x4bd   : > { %v2724_v20 = vadd.f32 %v2627_v46, %v2427_v9  ;;  %2369 = vmatmul.bf16.gmra.mxu0 %v6112_v7  ;;  %2666 = vmatmul.bf16.gmra.mxu1 %v6112_v7  ;;  %v6367_v7 = vld [vmem:[#allocation54_spill] sm:$0xff] }
 0x4bf   : > { %v3212_v27 = vpop.f32.mrf.mxu2  ;;  %v3509_v28 = vpop.f32.mrf.mxu3 }
 0x4c0   : > { %v3309_v6 = vadd.f32 %v3212_v27, %v2724_v20  ;;  %v6371_v27 = vld [vmem:[#allocation58_spill] sm:$0xff] }
 0x4c2   : > { %v3606_v39 = vadd.f32 %v3509_v28, %v3309_v6  ;;  %v2332_v43 = vpop.f32.mrf.mxu0  ;;  %v2629_v2 = vpop.f32.mrf.mxu1 }
 0x4c3   : > { %v2428_v8 = vadd.f32 %v2332_v43, %v6366_v29 }
 0x4c4   : > { %3670 = vst [vmem:[%s5966_s9 + $0x150] sm:$0xff] %v3606_v39 }
 0x4c5   : > { %v2725_v54 = vadd.f32 %v2629_v2, %v2428_v8 }
 0x4c7   : > { %v3214_v50 = vpop.f32.mrf.mxu2  ;;  %v3511_v48 = vpop.f32.mrf.mxu3 }
 0x4c8   : > { %v3310_v11 = vadd.f32 %v3214_v50, %v2725_v54  ;;  %v6372_v50 = vld [vmem:[#allocation59_spill] sm:$0xff] }
 0x4ca   : > { %v3607_v47 = vadd.f32 %v3511_v48, %v3310_v11  ;;  %v2335_v44 = vpop.f32.mrf.mxu0  ;;  %v2632_v17 = vpop.f32.mrf.mxu1 }
 0x4cb   : > { %v2429_v32 = vadd.f32 %v2335_v44, %v6367_v7 }
 0x4cc   : > { %3256 = vmatmul.bf16.gmra.mxu2 %v6120_v57  ;;  %3553 = vmatmul.bf16.gmra.mxu3 %v6120_v57  ;;  %3671 = vst [vmem:[%s5966_s9 + $0x158] sm:$0xff] %v3607_v47 }
 0x4cd   : > { %v2726_v36 = vadd.f32 %v2632_v17, %v2429_v32  ;;  %2374 = vmatmul.bf16.gmra.mxu0 %v6122_v37  ;;  %2671 = vmatmul.bf16.gmra.mxu1 %v6122_v37 }
 0x4cf   : > { %v3217_v51 = vpop.f32.mrf.mxu2  ;;  %v3514_v1 = vpop.f32.mrf.mxu3 }
 0x4d0   : > { %v3311_v49 = vadd.f32 %v3217_v51, %v2726_v36  ;;  %v6373_v51 = vld [vmem:[#allocation60_spill] sm:$0xff] }
 0x4d2   : > { %v3608_v56 = vadd.f32 %v3514_v1, %v3311_v49  ;;  %v2337_v33 = vpop.f32.mrf.mxu0  ;;  %v2634_v35 = vpop.f32.mrf.mxu1 }
 0x4d3   : > { %v2430_v19 = vadd.f32 %v2337_v33, %v6368_v55 }
 0x4d4   : > { %3672 = vst [vmem:[%s5966_s9 + $0x160] sm:$0xff] %v3608_v56 }
 0x4d5   : > { %v2727_v42 = vadd.f32 %v2634_v35, %v2430_v19 }
 0x4d7   : > { %v3219_v57 = vpop.f32.mrf.mxu2  ;;  %v3516_v53 = vpop.f32.mrf.mxu3 }
 0x4d8   : > { %v3312_v62 = vadd.f32 %v3219_v57, %v2727_v42  ;;  %v6374_v57 = vld [vmem:[#allocation61_spill] sm:$0xff] }
 0x4da   : > { %v3609_v41 = vadd.f32 %v3516_v53, %v3312_v62  ;;  %v2340_v61 = vpop.f32.mrf.mxu0  ;;  %v2637_v37 = vpop.f32.mrf.mxu1 }
 0x4db   : > { %v2431_v59 = vadd.f32 %v2340_v61, %v6369_v0 }
 0x4dc   : > { %3261 = vmatmul.bf16.gmra.mxu2 %v3049_v45  ;;  %3558 = vmatmul.bf16.gmra.mxu3 %v3049_v45  ;;  %3673 = vst [vmem:[%s5966_s9 + $0x168] sm:$0xff] %v3609_v41 }
 0x4dd   : > { %v2728_v40 = vadd.f32 %v2637_v37, %v2431_v59  ;;  %2379 = vmatmul.bf16.gmra.mxu0 %v2167_v31  ;;  %2676 = vmatmul.bf16.gmra.mxu1 %v2167_v31 }
 0x4df   : > { %v3222_v4 = vpop.f32.mrf.mxu2  ;;  %v3519_v15 = vpop.f32.mrf.mxu3 }
 0x4e0   : > { %v3313_v14 = vadd.f32 %v3222_v4, %v2728_v40 }
 0x4e2   : > { %v3610_v24 = vadd.f32 %v3519_v15, %v3313_v14  ;;  %v2342_v30 = vpop.f32.mrf.mxu0  ;;  %v2639_v18 = vpop.f32.mrf.mxu1 }
 0x4e3   : > { %v2432_v21 = vadd.f32 %v2342_v30, %v6370_v60 }
 0x4e4   : > { %3674 = vst [vmem:[%s5966_s9 + $0x170] sm:$0xff] %v3610_v24 }
 0x4e5   : > { %v2729_v16 = vadd.f32 %v2639_v18, %v2432_v21 }
 0x4e7   : > { %v3224_v25 = vpop.f32.mrf.mxu2  ;;  %v3521_v52 = vpop.f32.mrf.mxu3 }
 0x4e8   : > { %v3314_v46 = vadd.f32 %v3224_v25, %v2729_v16 }
 0x4ea   : > { %v3611_v26 = vadd.f32 %v3521_v52, %v3314_v46  ;;  %v2345_v9 = vpop.f32.mrf.mxu0  ;;  %v2642_v20 = vpop.f32.mrf.mxu1 }
 0x4eb   : > { %v2433_v28 = vadd.f32 %v2345_v9, %v6371_v27 }
 0x4ec   : > { %3675 = vst [vmem:[%s5966_s9 + $0x178] sm:$0xff] %v3611_v26 }
 0x4ed   : > { %v2730_v6 = vadd.f32 %v2642_v20, %v2433_v28 }
 0x4ef   : > { %v3227_v39 = vpop.f32.mrf.mxu2  ;;  %v3524_v43 = vpop.f32.mrf.mxu3 }
 0x4f0   : > { %v3315_v2 = vadd.f32 %v3227_v39, %v2730_v6 }
 0x4f2   : > { %v3612_v29 = vadd.f32 %v3524_v43, %v3315_v2  ;;  %v2347_v8 = vpop.f32.mrf.mxu0  ;;  %v2644_v54 = vpop.f32.mrf.mxu1 }
 0x4f3   : > { %v2434_v48 = vadd.f32 %v2347_v8, %v6372_v50 }
 0x4f4   : > { %3676 = vst [vmem:[%s5966_s9 + $0x180] sm:$0xff] %v3612_v29 }
 0x4f5   : > { %v2731_v11 = vadd.f32 %v2644_v54, %v2434_v48 }
 0x4f7   : > { %v3229_v47 = vpop.f32.mrf.mxu2  ;;  %v3526_v44 = vpop.f32.mrf.mxu3 }
 0x4f8   : > { %v3316_v17 = vadd.f32 %v3229_v47, %v2731_v11 }
 0x4fa   : > { %v3613_v7 = vadd.f32 %v3526_v44, %v3316_v17  ;;  %v2350_v32 = vpop.f32.mrf.mxu0  ;;  %v2647_v36 = vpop.f32.mrf.mxu1 }
 0x4fb   : > { %v2435_v1 = vadd.f32 %v2350_v32, %v6373_v51 }
 0x4fc   : > { %3677 = vst [vmem:[%s5966_s9 + $0x188] sm:$0xff] %v3613_v7 }
 0x4fd   : > { %v2732_v49 = vadd.f32 %v2647_v36, %v2435_v1 }
 0x4ff   : > { %v3232_v56 = vpop.f32.mrf.mxu2  ;;  %v3529_v33 = vpop.f32.mrf.mxu3 }
 0x500   : > { %v3317_v35 = vadd.f32 %v3232_v56, %v2732_v49 }
 0x502   : > { %v3614_v55 = vadd.f32 %v3529_v33, %v3317_v35  ;;  %v2352_v19 = vpop.f32.mrf.mxu0  ;;  %v2649_v42 = vpop.f32.mrf.mxu1 }
 0x503   : > { %v2436_v53 = vadd.f32 %v2352_v19, %v6374_v57 }
 0x504   : > { %3678 = vst [vmem:[%s5966_s9 + $0x190] sm:$0xff] %v3614_v55 }
 0x505   : > { %v2733_v62 = vadd.f32 %v2649_v42, %v2436_v53 }
 0x507   : > { %v3234_v45 = vpop.f32.mrf.mxu2  ;;  %v3531_v41 = vpop.f32.mrf.mxu3 }
 0x508   : > { %v3318_v31 = vadd.f32 %v3234_v45, %v2733_v62 }
 0x50a   : > { %v3615_v61 = vadd.f32 %v3531_v41, %v3318_v31  ;;  %v2355_v37 = vpop.f32.mrf.mxu0  ;;  %v2652_v0 = vpop.f32.mrf.mxu1 }
 0x50b   : > { %v2437_v59 = vadd.f32 %v2355_v37, %v5780_v10  ;;  %v6375_v10 = vld [vmem:[#allocation62_spill] sm:$0xff] }
 0x50c   : > { %3679 = vst [vmem:[%s5966_s9 + $0x198] sm:$0xff] %v3615_v61 }
 0x50d   : > { %v2734_v40 = vadd.f32 %v2652_v0, %v2437_v59 }
 0x50f   : > { %v3237_v4 = vpop.f32.mrf.mxu2  ;;  %v3534_v15 = vpop.f32.mrf.mxu3 }
 0x510   : > { %v3319_v14 = vadd.f32 %v3237_v4, %v2734_v40 }
 0x512   : > { %v3616_v24 = vadd.f32 %v3534_v15, %v3319_v14  ;;  %v2357_v30 = vpop.f32.mrf.mxu0  ;;  %v2654_v18 = vpop.f32.mrf.mxu1 }
 0x513   : > { %v2438_v60 = vadd.f32 %v2357_v30, %v5782_v38 }
 0x514   : > { %3680 = vst [vmem:[%s5966_s9 + $0x1a0] sm:$0xff] %v3616_v24 }
 0x515   : > { %v2735_v21 = vadd.f32 %v2654_v18, %v2438_v60 }
 0x517   : > { %v3239_v16 = vpop.f32.mrf.mxu2  ;;  %v3536_v25 = vpop.f32.mrf.mxu3 }
 0x518   : > { %v3320_v52 = vadd.f32 %v3239_v16, %v2735_v21 }
 0x51a   : > { %v3617_v46 = vadd.f32 %v3536_v25, %v3320_v52  ;;  %v2360_v26 = vpop.f32.mrf.mxu0  ;;  %v2657_v9 = vpop.f32.mrf.mxu1 }
 0x51b   : > { %v2439_v20 = vadd.f32 %v2360_v26, %v6375_v10 }
 0x51c   : > { %3681 = vst [vmem:[%s5966_s9 + $0x1a8] sm:$0xff] %v3617_v46 }
 0x51d   : > { %v2736_v27 = vadd.f32 %v2657_v9, %v2439_v20 }
 0x51f   : > { %v3242_v28 = vpop.f32.mrf.mxu2  ;;  %v3539_v6 = vpop.f32.mrf.mxu3 }
 0x520   : > { %v3321_v39 = vadd.f32 %v3242_v28, %v2736_v27 }
 0x522   : > { %v3618_v43 = vadd.f32 %v3539_v6, %v3321_v39  ;;  %v2362_v2 = vpop.f32.mrf.mxu0  ;;  %v2659_v29 = vpop.f32.mrf.mxu1 }
 0x523   : > { %v2440_v38 = vadd.f32 %v2362_v2, %v5814_v58 }
 0x524   : > { %3682 = vst [vmem:[%s5966_s9 + $0x1b0] sm:$0xff] %v3618_v43 }
 0x525   : > { %v2737_v8 = vadd.f32 %v2659_v29, %v2440_v38 }
 0x527   : > { %v3244_v54 = vpop.f32.mrf.mxu2  ;;  %v3541_v50 = vpop.f32.mrf.mxu3 }
 0x528   : > { %v3322_v48 = vadd.f32 %v3244_v54, %v2737_v8 }
 0x52a   : > { %v3619_v11 = vadd.f32 %v3541_v50, %v3322_v48  ;;  %v2365_v47 = vpop.f32.mrf.mxu0  ;;  %v2662_v44 = vpop.f32.mrf.mxu1 }
 0x52b   : > { %v2441_v17 = vadd.f32 %v2365_v47, %v5837_v13 }
 0x52c   : > { %3683 = vst [vmem:[%s5966_s9 + $0x1b8] sm:$0xff] %v3619_v11 }
 0x52d   : > { %v2738_v7 = vadd.f32 %v2662_v44, %v2441_v17 }
 0x52f   : > { %v3247_v32 = vpop.f32.mrf.mxu2  ;;  %v3544_v36 = vpop.f32.mrf.mxu3 }
 0x530   : > { %v3323_v51 = vadd.f32 %v3247_v32, %v2738_v7 }
 0x532   : > { %v3620_v1 = vadd.f32 %v3544_v36, %v3323_v51  ;;  %v2367_v49 = vpop.f32.mrf.mxu0  ;;  %v2664_v56 = vpop.f32.mrf.mxu1 }
 0x533   : > { %v2442_v58 = vadd.f32 %v2367_v49, %v5844_v22 }
 0x534   : > { %3684 = vst [vmem:[%s5966_s9 + $0x1c0] sm:$0xff] %v3620_v1 }
 0x535   : > { %v2739_v33 = vadd.f32 %v2664_v56, %v2442_v58 }
 0x537   : > { %v3249_v35 = vpop.f32.mrf.mxu2  ;;  %v3546_v55 = vpop.f32.mrf.mxu3 }
 0x538   : > { %v3324_v19 = vadd.f32 %v3249_v35, %v2739_v33 }
 0x53a   : > { %v3621_v42 = vadd.f32 %v3546_v55, %v3324_v19  ;;  %v2370_v57 = vpop.f32.mrf.mxu0  ;;  %v2667_v53 = vpop.f32.mrf.mxu1 }
 0x53b   : > { %v2443_v13 = vadd.f32 %v2370_v57, %v5869_v5 }
 0x53c   : > { %3685 = vst [vmem:[%s5966_s9 + $0x1c8] sm:$0xff] %v3621_v42 }
 0x53d   : > { %v2740_v62 = vadd.f32 %v2667_v53, %v2443_v13 }
 0x53f   : > { %v3252_v45 = vpop.f32.mrf.mxu2  ;;  %v3549_v41 = vpop.f32.mrf.mxu3 }
 0x540   : > { %v3325_v31 = vadd.f32 %v3252_v45, %v2740_v62 }
 0x542   : > { %v3622_v61 = vadd.f32 %v3549_v41, %v3325_v31  ;;  %v2372_v37 = vpop.f32.mrf.mxu0  ;;  %v2669_v0 = vpop.f32.mrf.mxu1 }
 0x543   : > { %v2444_v22 = vadd.f32 %v2372_v37, %v5874_v12 }
 0x544   : > { %3686 = vst [vmem:[%s5966_s9 + $0x1d0] sm:$0xff] %v3622_v61 }
 0x545   : > { %v2741_v59 = vadd.f32 %v2669_v0, %v2444_v22 }
 0x547   : > { %v3254_v40 = vpop.f32.mrf.mxu2  ;;  %v3551_v4 = vpop.f32.mrf.mxu3 }
 0x548   : > { %v3326_v15 = vadd.f32 %v3254_v40, %v2741_v59 }
 0x54a   : > { %v3623_v14 = vadd.f32 %v3551_v4, %v3326_v15  ;;  %v2375_v24 = vpop.f32.mrf.mxu0  ;;  %v2672_v30 = vpop.f32.mrf.mxu1 }
 0x54b   : > { %v2445_v5 = vadd.f32 %v2375_v24, %v5901_v23 }
 0x54c   : > { %3687 = vst [vmem:[%s5966_s9 + $0x1d8] sm:$0xff] %v3623_v14 }
 0x54d   : > { %v2742_v18 = vadd.f32 %v2672_v30, %v2445_v5 }
 0x54f   : > { %v3257_v60 = vpop.f32.mrf.mxu2  ;;  %v3554_v21 = vpop.f32.mrf.mxu3 }
 0x550   : > { %v3327_v16 = vadd.f32 %v3257_v60, %v2742_v18 }
 0x552   : > { %v3624_v25 = vadd.f32 %v3554_v21, %v3327_v16  ;;  %v2377_v52 = vpop.f32.mrf.mxu0  ;;  %v2674_v46 = vpop.f32.mrf.mxu1 }
 0x553   : > { %v2446_v12 = vadd.f32 %v2377_v52, %v5906_v3 }
 0x554   : > { %3688 = vst [vmem:[%s5966_s9 + $0x1e0] sm:$0xff] %v3624_v25 }
 0x555   : > { %v2743_v26 = vadd.f32 %v2674_v46, %v2446_v12 }
 0x557   : > { %v3259_v9 = vpop.f32.mrf.mxu2  ;;  %v3556_v10 = vpop.f32.mrf.mxu3 }
 0x558   : > { %v3328_v20 = vadd.f32 %v3259_v9, %v2743_v26 }
 0x55a   : > { %v3625_v27 = vadd.f32 %v3556_v10, %v3328_v20  ;;  %v2380_v28 = vpop.f32.mrf.mxu0  ;;  %v2677_v23 = vpop.f32.mrf.mxu1 }
 0x55b   : > { %v2447_v6 = vadd.f32 %v2380_v28, %v5929_v63 }
 0x55c   : > { %3689 = vst [vmem:[%s5966_s9 + $0x1e8] sm:$0xff] %v3625_v27 }
 0x55d   : > { %v2744_v39 = vadd.f32 %v2677_v23, %v2447_v6 }
 0x55f   : > { %v3262_v43 = vpop.f32.mrf.mxu2  ;;  %v3559_v2 = vpop.f32.mrf.mxu3 }
 0x560   : > { %v3329_v29 = vadd.f32 %v3262_v43, %v2744_v39 }
 0x562   : > { %v3626_v38 = vadd.f32 %v3559_v2, %v3329_v29  ;;  %v2382_v3 = vpop.f32.mrf.mxu0  ;;  %v2679_v54 = vpop.f32.mrf.mxu1 }
 0x563   : > { %v2448_v8 = vadd.f32 %v2382_v3, %v5934_v34 }
 0x564   : > { %3690 = vst [vmem:[%s5966_s9 + $0x1f0] sm:$0xff] %v3626_v38 }
 0x565   : > { %v2745_v50 = vadd.f32 %v2679_v54, %v2448_v8 }
 0x567   : > { %v3264_v63 = vpop.f32.mrf.mxu2  ;;  %v3561_v11 = vpop.f32.mrf.mxu3 }
 0x568   : > { %v3330_v48 = vadd.f32 %v3264_v63, %v2745_v50 }
 0x56a   : > { %v3627_v47 = vadd.f32 %v3561_v11, %v3330_v48 }
 0x56c   : > { %3691 = vst [vmem:[%s5966_s9 + $0x1f8] sm:$0xff] %v3627_v47 }
 0x56d   : > { %4583 = shalt.err (!%p4580_p9)
}
 0x56e   : > { %s4633_s10 = smov 128   ;;  %s4634_s22 = smov 8  }
 0x56f   : > { %4404 = dma.vmem_to_hbm [thread:$0]  (%p4724_p4), %s3706_s28, 8192, %s3708_s29, %s3693_s19, %s4633_s10, %s4633_s10, %s4634_s22  }
 0x570 PF: > { %s3722_s23 = sand.u32 1, %s4614_s12   ;;  %p6376_p10 = scmp.ge.s32.totalorder %s4626_s15, 2 }
 0x571   : > { %s3723_s20 = scalar_lea.sflag [#allocation4], %s3722_s23 }
 0x572   : > { %p4418_p13 = pnand %p6376_p10, %p4728_p6 }
 0x574   : > { %p4419_p11 = pneg %p4418_p13 }
 0x576   : > { %4609 = dma.done.wait (%p4419_p11), %s3723_s20, 8192  }
 0x577   : > { %4611 = vsyncadd (%p4419_p11), %s3723_s20, 4294959104  ;;  %p17_p0 = scmp.ge.s32.totalorder %s4698_s4, 4   ;;  %s6377_s12 = smov %s4618_s13 }
 0x578   : > { %s6378_s13 = smov %s4622_s14  ;;  %s6379_s14 = smov %s4709_s7 }
 0x579   : > { %s6380_s15 = smov %s4698_s4  ;;  %19 = sbr.rel (!%p17_p0) target bundleno = 6 (0x6), region = 85 }
 0x57e   :  { %3729 = vsyncpa [#allocation3], 1 }
 0x57f   :  { %3731 = vsyncpa [#allocation3 + $0x1], 1 }
 0x580   :  { %3732 = vsyncpa [#allocation6], 1 }
 0x581   :  { %3733 = vsyncpa [#allocation4], 1 }
 0x582   :  { %3735 = vsyncpa [#allocation4 + $0x1], 1 }

</bundles_post_ra>
